<compile_context>
chip_gen: v7x
topology: tpu7x:2x2x1
jax: 0.10.0
libtpu: 0.0.40
codegen_flags: <defaults>
</compile_context>

<pallas_src>
import functools

import jax
import jax.numpy as jnp
from jax import lax
from jax.experimental import pallas as pl
from jax.experimental.pallas import tpu as pltpu


def _round_up(v, m):
    return (v + m - 1) // m * m


def _conv_geometry(H, W, KS):
    pad = KS // 2
    w_row = W + 2 * pad                     # padded row length
    n_row = H + 2 * pad                     # padded row count
    l_map = n_row * w_row                   # row-padded flat map length
    l_acc = _round_up(l_map, 128)           # lane-dense accumulator length
    guard = _round_up(pad * w_row + pad, 128)   # covers the widest tap offset
    l_buf = guard + l_acc + guard
    return pad, w_row, n_row, l_map, l_acc, guard, l_buf


def _vmem_capacity_bytes():
    """Physical VMEM of the current TPU generation (conservative fallback)."""
    try:
        info = pltpu.get_tpu_info()
        cap = getattr(info, "vmem_capacity_bytes", None)
        if cap:
            return int(cap)
    except Exception:
        pass
    return 64 << 20   # v7x-sized conservative default


def _spatial_attention_kernel(x_ref, w_ref, o_ref, sum_acc, max_acc, pbuf,
                              *, C, H, W, KS, C_TILE):
    """Grid = (N, num_C_tiles).

    x_ref:   (1, C_TILE, H*W) VMEM input block (C tile of one image)
    w_ref:   (2*KS*KS,)       SMEM conv weights
    o_ref:   (1, 1, l_acc)    VMEM output block (resident across the C axis)
    sum_acc: (8, H*W) f32     running channel-sum (full-sublane-width carry)
    max_acc: (8, H*W) f32     running channel-max
    pbuf:    (2, 1, l_buf) f32 row-padded flat [avg, max] maps + zero guards
    """
    pad, w_row, n_row, l_map, l_acc, GUARD, l_buf = _conv_geometry(H, W, KS)
    HW = H * W
    CT = 8
    nsub = C_TILE // CT                     # C_TILE is a multiple of 8

    c = pl.program_id(1)
    nc = pl.num_programs(1)

    # ---- per-image accumulator init at the first C tile ---------------------
    @pl.when(c == 0)
    def _():
        sum_acc[...] = jnp.zeros_like(sum_acc)
        max_acc[...] = jnp.full_like(max_acc, -jnp.inf)

    # ---- channel reduction: lane-dense over H*W, full (8, HW) carries -------
    # Only mask when C is not a multiple of C_TILE (last block padded rows).
    needs_mask = (C % C_TILE) != 0          # static

    def body(i, carry):
        s, m = carry
        c0 = pl.multiple_of(i * CT, CT)
        chunk = x_ref[0, pl.ds(c0, CT), :].astype(jnp.float32)      # (CT, HW)
        if needs_mask:
            gidx = c * C_TILE + i * CT + lax.broadcasted_iota(jnp.int32, (CT, 1), 0)
            valid = gidx < C
            s = s + jnp.where(valid, chunk, 0.0)
            m = jnp.maximum(m, jnp.where(valid, chunk, -jnp.inf))
        else:
            s = s + chunk
            m = jnp.maximum(m, chunk)
        return s, m

    init = (sum_acc[...], max_acc[...])
    s, m = lax.fori_loop(0, nsub, body, init, unroll=min(nsub, 8))
    sum_acc[...] = s
    max_acc[...] = m

    # ---- epilogue: reduce, scatter, 7x7 conv, sigmoid, store ----------------
    @pl.when(c == nc - 1)
    def _():
        # Single cross-sublane reduce per image.
        avg = jnp.sum(s, axis=0, keepdims=True) * (1.0 / C)          # (1, HW)
        mx = jnp.max(m, axis=0, keepdims=True)                       # (1, HW)

        # Zero guards / padding lanes, then scatter interior rows into the
        # row-padded flat [avg, max] maps.
        pbuf[...] = jnp.zeros(pbuf.shape, pbuf.dtype)
        # TODO(synk): batch 8 images (or 8 rows) into the sublane dim so these
        # 2*H narrow stores become full-width stores (helps v5e's single vst).
        for r in range(H):
            off = GUARD + (r + pad) * w_row + pad
            pbuf[0, :, off:off + W] = avg[:, r * W:(r + 1) * W]
            pbuf[1, :, off:off + W] = mx[:, r * W:(r + 1) * W]

        # 7x7, 2-in / 1-out conv: 2*KS*KS lane-dense window FMAs at static
        # flat offsets.  GUARD >= pad*w_row + pad keeps every read in-bounds.
        w = [w_ref[i] for i in range(2 * KS * KS)]       # hoisted scalar reads
        acc = jnp.zeros((1, l_acc), jnp.float32)
        # TODO(synk): for very large H*W, chunk the conv over lane ranges (and
        # generate kw shifts with pltpu.roll) so acc stays vreg-resident.
        for kh in range(KS):
            for kw in range(KS):
                start = GUARD + (kh - pad) * w_row + (kw - pad)
                w_avg = w[0 * KS * KS + kh * KS + kw]
                w_max = w[1 * KS * KS + kh * KS + kw]
                acc = acc + w_avg * pbuf[0, :, start:start + l_acc]
                acc = acc + w_max * pbuf[1, :, start:start + l_acc]

        o_ref[0] = jax.nn.sigmoid(acc).astype(o_ref.dtype)


def spatial_attention(x, conv_weight):
    """x: (N, C, H, W); conv_weight: (1, 2, KS, KS) — Conv2d(2, 1, KS, bias=False)."""
    N, C, H, W = x.shape
    KS = conv_weight.shape[-1]
    assert KS % 2 == 1, "SAME padding assumes an odd kernel size"
    pad, w_row, n_row, l_map, l_acc, GUARD, l_buf = _conv_geometry(H, W, KS)
    HW = H * W
    itemsize = x.dtype.itemsize

    # C tile: multiple of 8, one input block ~4 MiB.  Bounds VMEM independently
    # of C*H*W and multiplies grid steps so double-buffering hides DMA.
    tile_budget = 4 << 20
    ct_cap = max(8, (tile_budget // max(HW * itemsize, 1)) // 8 * 8)
    C_TILE = int(min(_round_up(C, 8), ct_cap))
    NC = pl.cdiv(C, C_TILE)

    x_flat = x.reshape(N, C, HW)                           # free, layout-preserving
    w_flat = conv_weight.reshape(-1).astype(jnp.float32)   # (2*KS*KS,)

    kernel = functools.partial(_spatial_attention_kernel,
                               C=C, H=H, W=W, KS=KS, C_TILE=C_TILE)

    # Generation-aware VMEM budget (v7x has only 64 MiB physical VMEM).
    need = (2 * C_TILE * HW * itemsize        # double-buffered input block
            + 2 * 8 * l_acc * itemsize        # output block (sublane-padded)
            + 2 * 8 * HW * 4                  # sum / max accumulators
            + 2 * 8 * l_buf * 4               # pbuf (sublane-padded)
            + (4 << 20))                      # headroom
    cap = (_vmem_capacity_bytes() * 7) // 8
    vmem_bytes = int(min(max(need, 16 << 20), cap))

    cost = pl.CostEstimate(
        flops=int(N * HW * (2 * C + 4 * KS * KS)),
        transcendentals=int(N * HW),
        bytes_accessed=int(N * C * HW * itemsize + N * l_acc * itemsize
                           + 2 * KS * KS * 4),
    )

    out_flat = pl.pallas_call(
        kernel,
        out_shape=jax.ShapeDtypeStruct((N, 1, l_acc), x.dtype),
        grid_spec=pltpu.PrefetchScalarGridSpec(
            num_scalar_prefetch=0,
            grid=(N, NC),
            in_specs=[
                pl.BlockSpec((1, C_TILE, HW), lambda b, c: (b, c, 0)),
                pl.BlockSpec(memory_space=pltpu.MemorySpace.SMEM),
            ],
            out_specs=pl.BlockSpec((1, 1, l_acc), lambda b, c: (b, 0, 0)),
            scratch_shapes=[
                pltpu.VMEM((8, HW), jnp.float32),        # running channel sum
                pltpu.VMEM((8, HW), jnp.float32),        # running channel max
                pltpu.VMEM((2, 1, l_buf), jnp.float32),  # padded [avg, max] maps
            ],
        ),
        compiler_params=pltpu.CompilerParams(
            # N is independent per image -> parallel (uses both v7x TCs);
            # the C axis is a reduction -> arbitrary (sequential).
            dimension_semantics=("parallel", "arbitrary"),
            vmem_limit_bytes=vmem_bytes,
        ),
        cost_estimate=cost,
    )(x_flat, w_flat)

    out_rp = out_flat[:, 0, :l_map].reshape(N, n_row, w_row)
    return out_rp[:, pad:pad + H, pad:pad + W].reshape(N, 1, H, W)


def _reference(x, conv_weight):
    """Pure-JAX reference mirroring the PyTorch forward."""
    avg = jnp.mean(x, axis=1, keepdims=True)
    mx = jnp.max(x, axis=1, keepdims=True)
    attn = jnp.concatenate([avg, mx], axis=1)                 # (N,2,H,W)
    conv = lax.conv_general_dilated(
        attn.astype(jnp.float32),
        conv_weight.astype(jnp.float32),
        window_strides=(1, 1),
        padding="SAME",
        dimension_numbers=("NCHW", "OIHW", "NCHW"),
    )
    return jax.nn.sigmoid(conv)


if __name__ == "__main__":
    key = jax.random.PRNGKey(0)
    k_x, k_w = jax.random.split(key)

    N, C, H, W = 2, 4, 16, 16
    KS = 7

    x = jax.random.normal(k_x, (N, C, H, W), dtype=jnp.float32)
    # Deterministic synthetic Conv2d(2, 1, 7, bias=False) weight.
    conv_weight = 0.1 * jax.random.normal(k_w, (1, 2, KS, KS), dtype=jnp.float32)

    out = spatial_attention(x, conv_weight)
    out = jax.block_until_ready(out)

    ref = _reference(x, conv_weight)
    assert out.shape == (N, 1, H, W)
    assert jnp.allclose(out, ref.astype(out.dtype), atol=1e-5, rtol=1e-5)

    print("KERNEL_OK")
</pallas_src>

<mosaic_0001>
module attributes {stable_mosaic.version = 11 : i64} {
  func.func @_spatial_attention_kernel(%arg0: i32, %arg1: i32, %arg2: memref<1x8x256xf32, #tpu.memory_space<vmem>>, %arg3: memref<98xf32, #tpu.memory_space<smem>>, %arg4: memref<1x1x512xf32, #tpu.memory_space<vmem>>, %arg5: memref<8x256xf32, #tpu.memory_space<vmem>>, %arg6: memref<8x256xf32, #tpu.memory_space<vmem>>, %arg7: memref<2x1x768xf32, #tpu.memory_space<vmem>>) attributes {dimension_semantics = [#tpu.dimension_semantics<parallel>, #tpu.dimension_semantics<arbitrary>], iteration_bounds = array<i64: 2, 1>, scalar_prefetch = 0 : i64, scratch_operands = 3 : i64, tpu.core_type = #tpu.core_type<tc>, window_params = [{transform_indices = @transform_0, window_bounds = array<i64: 1, 8, 256>}, {transform_indices = @transform_1, window_bounds = array<i64: 98>}, {transform_indices = @transform_2, window_bounds = array<i64: 1, 1, 512>}]} {
    %c0_i32 = arith.constant 0 : i32
    %0 = arith.cmpi eq, %arg1, %c0_i32 : i32
    %1 = arith.extui %0 : i1 to i32
    %c0_i32_0 = arith.constant 0 : i32
    %2 = arith.cmpi ne, %1, %c0_i32_0 : i32
    scf.if %2 {
      %cst_16 = arith.constant 0.000000e+00 : f32
      %33 = vector.broadcast %cst_16 : f32 to vector<8x256xf32>
      %c0_17 = arith.constant 0 : index
      %c0_18 = arith.constant 0 : index
      %34 = vector.load %arg5[%c0_17, %c0_18] : memref<8x256xf32, #tpu.memory_space<vmem>>, vector<8x256xf32>
      tpu.vector_store %arg5[%c0_17, %c0_18], %33 {strides = array<i32>} : memref<8x256xf32, #tpu.memory_space<vmem>>, vector<8x256xf32>,
      %cst_19 = arith.constant 0xFF800000 : f32
      %35 = vector.broadcast %cst_19 : f32 to vector<8x256xf32>
      %c0_20 = arith.constant 0 : index
      %c0_21 = arith.constant 0 : index
      %36 = vector.load %arg6[%c0_20, %c0_21] : memref<8x256xf32, #tpu.memory_space<vmem>>, vector<8x256xf32>
      tpu.vector_store %arg6[%c0_20, %c0_21], %35 {strides = array<i32>} : memref<8x256xf32, #tpu.memory_space<vmem>>, vector<8x256xf32>,
    } else {
    }
    %c0 = arith.constant 0 : index
    %c0_1 = arith.constant 0 : index
    %3 = vector.load %arg5[%c0, %c0_1] : memref<8x256xf32, #tpu.memory_space<vmem>>, vector<8x256xf32>
    %c0_2 = arith.constant 0 : index
    %c0_3 = arith.constant 0 : index
    %4 = vector.load %arg6[%c0_2, %c0_3] : memref<8x256xf32, #tpu.memory_space<vmem>>, vector<8x256xf32>
    %c0_i32_4 = arith.constant 0 : i32
    %c8_i32 = arith.constant 8 : i32
    %5 = arith.muli %c0_i32_4, %c8_i32 : i32
    %6 = tpu.assume_multiple %5, 8 : i32
    %c0_5 = arith.constant 0 : index
    %7 = arith.index_cast %6 : i32 to index
    %c0_6 = arith.constant 0 : index
    %8 = vector.load %arg2[%c0_5, %7, %c0_6] : memref<1x8x256xf32, #tpu.memory_space<vmem>>, vector<1x8x256xf32>
    %9 = vector.shape_cast %8 : vector<1x8x256xf32> to vector<8x256xf32>
    %c8_i32_7 = arith.constant 8 : i32
    %10 = arith.muli %arg1, %c8_i32_7 : i32
    %c8_i32_8 = arith.constant 8 : i32
    %11 = arith.muli %c0_i32_4, %c8_i32_8 : i32
    %12 = arith.addi %10, %11 : i32
    %13 = tpu.iota {dimensions = array<i32: 0>} : vector<8x1xi32>
    %14 = vector.broadcast %12 : i32 to vector<8x1xi32>
    %15 = arith.addi %14, %13 : vector<8x1xi32>
    %c4_i32 = arith.constant 4 : i32
    %16 = vector.broadcast %c4_i32 : i32 to vector<8x1xi32>
    %17 = arith.cmpi slt, %15, %16 : vector<8x1xi32>
    %cst = arith.constant 0.000000e+00 : f32
    %18 = vector.shape_cast %17 : vector<8x1xi1> to vector<8x1xi1>
    %19 = vector.broadcast %18 : vector<8x1xi1> to vector<8x256xi1>
    %20 = vector.broadcast %cst : f32 to vector<8x256xf32>
    %21 = arith.select %19, %9, %20 : vector<8x256xi1>, vector<8x256xf32>
    %22 = arith.addf %3, %21 : vector<8x256xf32>
    %cst_9 = arith.constant 0xFF800000 : f32
    %23 = vector.shape_cast %17 : vector<8x1xi1> to vector<8x1xi1>
    %24 = vector.broadcast %23 : vector<8x1xi1> to vector<8x256xi1>
    %25 = vector.broadcast %cst_9 : f32 to vector<8x256xf32>
    %26 = arith.select %24, %9, %25 : vector<8x256xi1>, vector<8x256xf32>
    %27 = arith.maximumf %4, %26 : vector<8x256xf32>
    %c1_i32 = arith.constant 1 : i32
    %c0_10 = arith.constant 0 : index
    %c0_11 = arith.constant 0 : index
    %28 = vector.load %arg5[%c0_10, %c0_11] : memref<8x256xf32, #tpu.memory_space<vmem>>, vector<8x256xf32>
    tpu.vector_store %arg5[%c0_10, %c0_11], %22 {strides = array<i32>} : memref<8x256xf32, #tpu.memory_space<vmem>>, vector<8x256xf32>,
    %c0_12 = arith.constant 0 : index
    %c0_13 = arith.constant 0 : index
    %29 = vector.load %arg6[%c0_12, %c0_13] : memref<8x256xf32, #tpu.memory_space<vmem>>, vector<8x256xf32>
    tpu.vector_store %arg6[%c0_12, %c0_13], %27 {strides = array<i32>} : memref<8x256xf32, #tpu.memory_space<vmem>>, vector<8x256xf32>,
    %c0_i32_14 = arith.constant 0 : i32
    %30 = arith.cmpi eq, %arg1, %c0_i32_14 : i32
    %31 = arith.extui %30 : i1 to i32
    %c0_i32_15 = arith.constant 0 : i32
    %32 = arith.cmpi ne, %31, %c0_i32_15 : i32
    scf.if %32 {
      %cst_16 = arith.constant dense<0.000000e+00> : vector<256xf32>
      %33 = vector.multi_reduction <add>, %22, %cst_16 [0] : vector<8x256xf32> to vector<256xf32>
      %34 = vector.shape_cast %33 : vector<256xf32> to vector<1x256xf32>
      %cst_17 = arith.constant 2.500000e-01 : f32
      %35 = vector.broadcast %cst_17 : f32 to vector<1x256xf32>
      %36 = arith.mulf %34, %35 : vector<1x256xf32>
      %cst_18 = arith.constant dense<0xFF800000> : vector<256xf32>
      %37 = vector.multi_reduction <maximumf>, %27, %cst_18 [0] : vector<8x256xf32> to vector<256xf32>
      %38 = vector.shape_cast %37 : vector<256xf32> to vector<1x256xf32>
      %cst_19 = arith.constant 0.000000e+00 : f32
      %39 = vector.broadcast %cst_19 : f32 to vector<2x1x768xf32>
      %c0_20 = arith.constant 0 : index
      %c0_21 = arith.constant 0 : index
      %c0_22 = arith.constant 0 : index
      %40 = vector.load %arg7[%c0_20, %c0_21, %c0_22] : memref<2x1x768xf32, #tpu.memory_space<vmem>>, vector<2x1x768xf32>
      tpu.vector_store %arg7[%c0_20, %c0_21, %c0_22], %39 {strides = array<i32>} : memref<2x1x768xf32, #tpu.memory_space<vmem>>, vector<2x1x768xf32>,
      %41 = vector.extract_strided_slice %36 {offsets = [0, 0], sizes = [1, 16], strides = [1, 1]} : vector<1x256xf32> to vector<1x16xf32>
      %c0_23 = arith.constant 0 : index
      %c0_24 = arith.constant 0 : index
      %c197 = arith.constant 197 : index
      %42 = vector.load %arg7[%c0_23, %c0_24, %c197] : memref<2x1x768xf32, #tpu.memory_space<vmem>>, vector<1x1x16xf32>
      %43 = vector.shape_cast %42 : vector<1x1x16xf32> to vector<1x16xf32>
      %44 = vector.shape_cast %41 : vector<1x16xf32> to vector<1x1x16xf32>
      tpu.vector_store %arg7[%c0_23, %c0_24, %c197], %44 {strides = array<i32>} : memref<2x1x768xf32, #tpu.memory_space<vmem>>, vector<1x1x16xf32>,
      %45 = vector.extract_strided_slice %38 {offsets = [0, 0], sizes = [1, 16], strides = [1, 1]} : vector<1x256xf32> to vector<1x16xf32>
      %c1 = arith.constant 1 : index
      %c0_25 = arith.constant 0 : index
      %c197_26 = arith.constant 197 : index
      %46 = vector.load %arg7[%c1, %c0_25, %c197_26] : memref<2x1x768xf32, #tpu.memory_space<vmem>>, vector<1x1x16xf32>
      %47 = vector.shape_cast %46 : vector<1x1x16xf32> to vector<1x16xf32>
      %48 = vector.shape_cast %45 : vector<1x16xf32> to vector<1x1x16xf32>
      tpu.vector_store %arg7[%c1, %c0_25, %c197_26], %48 {strides = array<i32>} : memref<2x1x768xf32, #tpu.memory_space<vmem>>, vector<1x1x16xf32>,
      %49 = vector.extract_strided_slice %36 {offsets = [0, 16], sizes = [1, 16], strides = [1, 1]} : vector<1x256xf32> to vector<1x16xf32>
      %c0_27 = arith.constant 0 : index
      %c0_28 = arith.constant 0 : index
      %c219 = arith.constant 219 : index
      %50 = vector.load %arg7[%c0_27, %c0_28, %c219] : memref<2x1x768xf32, #tpu.memory_space<vmem>>, vector<1x1x16xf32>
      %51 = vector.shape_cast %50 : vector<1x1x16xf32> to vector<1x16xf32>
      %52 = vector.shape_cast %49 : vector<1x16xf32> to vector<1x1x16xf32>
      tpu.vector_store %arg7[%c0_27, %c0_28, %c219], %52 {strides = array<i32>} : memref<2x1x768xf32, #tpu.memory_space<vmem>>, vector<1x1x16xf32>,
      %53 = vector.extract_strided_slice %38 {offsets = [0, 16], sizes = [1, 16], strides = [1, 1]} : vector<1x256xf32> to vector<1x16xf32>
      %c1_29 = arith.constant 1 : index
      %c0_30 = arith.constant 0 : index
      %c219_31 = arith.constant 219 : index
      %54 = vector.load %arg7[%c1_29, %c0_30, %c219_31] : memref<2x1x768xf32, #tpu.memory_space<vmem>>, vector<1x1x16xf32>
      %55 = vector.shape_cast %54 : vector<1x1x16xf32> to vector<1x16xf32>
      %56 = vector.shape_cast %53 : vector<1x16xf32> to vector<1x1x16xf32>
      tpu.vector_store %arg7[%c1_29, %c0_30, %c219_31], %56 {strides = array<i32>} : memref<2x1x768xf32, #tpu.memory_space<vmem>>, vector<1x1x16xf32>,
      %57 = vector.extract_strided_slice %36 {offsets = [0, 32], sizes = [1, 16], strides = [1, 1]} : vector<1x256xf32> to vector<1x16xf32>
      %c0_32 = arith.constant 0 : index
      %c0_33 = arith.constant 0 : index
      %c241 = arith.constant 241 : index
      %58 = vector.load %arg7[%c0_32, %c0_33, %c241] : memref<2x1x768xf32, #tpu.memory_space<vmem>>, vector<1x1x16xf32>
      %59 = vector.shape_cast %58 : vector<1x1x16xf32> to vector<1x16xf32>
      %60 = vector.shape_cast %57 : vector<1x16xf32> to vector<1x1x16xf32>
      tpu.vector_store %arg7[%c0_32, %c0_33, %c241], %60 {strides = array<i32>} : memref<2x1x768xf32, #tpu.memory_space<vmem>>, vector<1x1x16xf32>,
      %61 = vector.extract_strided_slice %38 {offsets = [0, 32], sizes = [1, 16], strides = [1, 1]} : vector<1x256xf32> to vector<1x16xf32>
      %c1_34 = arith.constant 1 : index
      %c0_35 = arith.constant 0 : index
      %c241_36 = arith.constant 241 : index
      %62 = vector.load %arg7[%c1_34, %c0_35, %c241_36] : memref<2x1x768xf32, #tpu.memory_space<vmem>>, vector<1x1x16xf32>
      %63 = vector.shape_cast %62 : vector<1x1x16xf32> to vector<1x16xf32>
      %64 = vector.shape_cast %61 : vector<1x16xf32> to vector<1x1x16xf32>
      tpu.vector_store %arg7[%c1_34, %c0_35, %c241_36], %64 {strides = array<i32>} : memref<2x1x768xf32, #tpu.memory_space<vmem>>, vector<1x1x16xf32>,
      %65 = vector.extract_strided_slice %36 {offsets = [0, 48], sizes = [1, 16], strides = [1, 1]} : vector<1x256xf32> to vector<1x16xf32>
      %c0_37 = arith.constant 0 : index
      %c0_38 = arith.constant 0 : index
      %c263 = arith.constant 263 : index
      %66 = vector.load %arg7[%c0_37, %c0_38, %c263] : memref<2x1x768xf32, #tpu.memory_space<vmem>>, vector<1x1x16xf32>
      %67 = vector.shape_cast %66 : vector<1x1x16xf32> to vector<1x16xf32>
      %68 = vector.shape_cast %65 : vector<1x16xf32> to vector<1x1x16xf32>
      tpu.vector_store %arg7[%c0_37, %c0_38, %c263], %68 {strides = array<i32>} : memref<2x1x768xf32, #tpu.memory_space<vmem>>, vector<1x1x16xf32>,
      %69 = vector.extract_strided_slice %38 {offsets = [0, 48], sizes = [1, 16], strides = [1, 1]} : vector<1x256xf32> to vector<1x16xf32>
      %c1_39 = arith.constant 1 : index
      %c0_40 = arith.constant 0 : index
      %c263_41 = arith.constant 263 : index
      %70 = vector.load %arg7[%c1_39, %c0_40, %c263_41] : memref<2x1x768xf32, #tpu.memory_space<vmem>>, vector<1x1x16xf32>
      %71 = vector.shape_cast %70 : vector<1x1x16xf32> to vector<1x16xf32>
      %72 = vector.shape_cast %69 : vector<1x16xf32> to vector<1x1x16xf32>
      tpu.vector_store %arg7[%c1_39, %c0_40, %c263_41], %72 {strides = array<i32>} : memref<2x1x768xf32, #tpu.memory_space<vmem>>, vector<1x1x16xf32>,
      %73 = vector.extract_strided_slice %36 {offsets = [0, 64], sizes = [1, 16], strides = [1, 1]} : vector<1x256xf32> to vector<1x16xf32>
      %c0_42 = arith.constant 0 : index
      %c0_43 = arith.constant 0 : index
      %c285 = arith.constant 285 : index
      %74 = vector.load %arg7[%c0_42, %c0_43, %c285] : memref<2x1x768xf32, #tpu.memory_space<vmem>>, vector<1x1x16xf32>
      %75 = vector.shape_cast %74 : vector<1x1x16xf32> to vector<1x16xf32>
      %76 = vector.shape_cast %73 : vector<1x16xf32> to vector<1x1x16xf32>
      tpu.vector_store %arg7[%c0_42, %c0_43, %c285], %76 {strides = array<i32>} : memref<2x1x768xf32, #tpu.memory_space<vmem>>, vector<1x1x16xf32>,
      %77 = vector.extract_strided_slice %38 {offsets = [0, 64], sizes = [1, 16], strides = [1, 1]} : vector<1x256xf32> to vector<1x16xf32>
      %c1_44 = arith.constant 1 : index
      %c0_45 = arith.constant 0 : index
      %c285_46 = arith.constant 285 : index
      %78 = vector.load %arg7[%c1_44, %c0_45, %c285_46] : memref<2x1x768xf32, #tpu.memory_space<vmem>>, vector<1x1x16xf32>
      %79 = vector.shape_cast %78 : vector<1x1x16xf32> to vector<1x16xf32>
      %80 = vector.shape_cast %77 : vector<1x16xf32> to vector<1x1x16xf32>
      tpu.vector_store %arg7[%c1_44, %c0_45, %c285_46], %80 {strides = array<i32>} : memref<2x1x768xf32, #tpu.memory_space<vmem>>, vector<1x1x16xf32>,
      %81 = vector.extract_strided_slice %36 {offsets = [0, 80], sizes = [1, 16], strides = [1, 1]} : vector<1x256xf32> to vector<1x16xf32>
      %c0_47 = arith.constant 0 : index
      %c0_48 = arith.constant 0 : index
      %c307 = arith.constant 307 : index
      %82 = vector.load %arg7[%c0_47, %c0_48, %c307] : memref<2x1x768xf32, #tpu.memory_space<vmem>>, vector<1x1x16xf32>
      %83 = vector.shape_cast %82 : vector<1x1x16xf32> to vector<1x16xf32>
      %84 = vector.shape_cast %81 : vector<1x16xf32> to vector<1x1x16xf32>
      tpu.vector_store %arg7[%c0_47, %c0_48, %c307], %84 {strides = array<i32>} : memref<2x1x768xf32, #tpu.memory_space<vmem>>, vector<1x1x16xf32>,
      %85 = vector.extract_strided_slice %38 {offsets = [0, 80], sizes = [1, 16], strides = [1, 1]} : vector<1x256xf32> to vector<1x16xf32>
      %c1_49 = arith.constant 1 : index
      %c0_50 = arith.constant 0 : index
      %c307_51 = arith.constant 307 : index
      %86 = vector.load %arg7[%c1_49, %c0_50, %c307_51] : memref<2x1x768xf32, #tpu.memory_space<vmem>>, vector<1x1x16xf32>
      %87 = vector.shape_cast %86 : vector<1x1x16xf32> to vector<1x16xf32>
      %88 = vector.shape_cast %85 : vector<1x16xf32> to vector<1x1x16xf32>
      tpu.vector_store %arg7[%c1_49, %c0_50, %c307_51], %88 {strides = array<i32>} : memref<2x1x768xf32, #tpu.memory_space<vmem>>, vector<1x1x16xf32>,
      %89 = vector.extract_strided_slice %36 {offsets = [0, 96], sizes = [1, 16], strides = [1, 1]} : vector<1x256xf32> to vector<1x16xf32>
      %c0_52 = arith.constant 0 : index
      %c0_53 = arith.constant 0 : index
      %c329 = arith.constant 329 : index
      %90 = vector.load %arg7[%c0_52, %c0_53, %c329] : memref<2x1x768xf32, #tpu.memory_space<vmem>>, vector<1x1x16xf32>
      %91 = vector.shape_cast %90 : vector<1x1x16xf32> to vector<1x16xf32>
      %92 = vector.shape_cast %89 : vector<1x16xf32> to vector<1x1x16xf32>
      tpu.vector_store %arg7[%c0_52, %c0_53, %c329], %92 {strides = array<i32>} : memref<2x1x768xf32, #tpu.memory_space<vmem>>, vector<1x1x16xf32>,
      %93 = vector.extract_strided_slice %38 {offsets = [0, 96], sizes = [1, 16], strides = [1, 1]} : vector<1x256xf32> to vector<1x16xf32>
      %c1_54 = arith.constant 1 : index
      %c0_55 = arith.constant 0 : index
      %c329_56 = arith.constant 329 : index
      %94 = vector.load %arg7[%c1_54, %c0_55, %c329_56] : memref<2x1x768xf32, #tpu.memory_space<vmem>>, vector<1x1x16xf32>
      %95 = vector.shape_cast %94 : vector<1x1x16xf32> to vector<1x16xf32>
      %96 = vector.shape_cast %93 : vector<1x16xf32> to vector<1x1x16xf32>
      tpu.vector_store %arg7[%c1_54, %c0_55, %c329_56], %96 {strides = array<i32>} : memref<2x1x768xf32, #tpu.memory_space<vmem>>, vector<1x1x16xf32>,
      %97 = vector.extract_strided_slice %36 {offsets = [0, 112], sizes = [1, 16], strides = [1, 1]} : vector<1x256xf32> to vector<1x16xf32>
      %c0_57 = arith.constant 0 : index
      %c0_58 = arith.constant 0 : index
      %c351 = arith.constant 351 : index
      %98 = vector.load %arg7[%c0_57, %c0_58, %c351] : memref<2x1x768xf32, #tpu.memory_space<vmem>>, vector<1x1x16xf32>
      %99 = vector.shape_cast %98 : vector<1x1x16xf32> to vector<1x16xf32>
      %100 = vector.shape_cast %97 : vector<1x16xf32> to vector<1x1x16xf32>
      tpu.vector_store %arg7[%c0_57, %c0_58, %c351], %100 {strides = array<i32>} : memref<2x1x768xf32, #tpu.memory_space<vmem>>, vector<1x1x16xf32>,
      %101 = vector.extract_strided_slice %38 {offsets = [0, 112], sizes = [1, 16], strides = [1, 1]} : vector<1x256xf32> to vector<1x16xf32>
      %c1_59 = arith.constant 1 : index
      %c0_60 = arith.constant 0 : index
      %c351_61 = arith.constant 351 : index
      %102 = vector.load %arg7[%c1_59, %c0_60, %c351_61] : memref<2x1x768xf32, #tpu.memory_space<vmem>>, vector<1x1x16xf32>
      %103 = vector.shape_cast %102 : vector<1x1x16xf32> to vector<1x16xf32>
      %104 = vector.shape_cast %101 : vector<1x16xf32> to vector<1x1x16xf32>
      tpu.vector_store %arg7[%c1_59, %c0_60, %c351_61], %104 {strides = array<i32>} : memref<2x1x768xf32, #tpu.memory_space<vmem>>, vector<1x1x16xf32>,
      %105 = vector.extract_strided_slice %36 {offsets = [0, 128], sizes = [1, 16], strides = [1, 1]} : vector<1x256xf32> to vector<1x16xf32>
      %c0_62 = arith.constant 0 : index
      %c0_63 = arith.constant 0 : index
      %c373 = arith.constant 373 : index
      %106 = vector.load %arg7[%c0_62, %c0_63, %c373] : memref<2x1x768xf32, #tpu.memory_space<vmem>>, vector<1x1x16xf32>
      %107 = vector.shape_cast %106 : vector<1x1x16xf32> to vector<1x16xf32>
      %108 = vector.shape_cast %105 : vector<1x16xf32> to vector<1x1x16xf32>
      tpu.vector_store %arg7[%c0_62, %c0_63, %c373], %108 {strides = array<i32>} : memref<2x1x768xf32, #tpu.memory_space<vmem>>, vector<1x1x16xf32>,
      %109 = vector.extract_strided_slice %38 {offsets = [0, 128], sizes = [1, 16], strides = [1, 1]} : vector<1x256xf32> to vector<1x16xf32>
      %c1_64 = arith.constant 1 : index
      %c0_65 = arith.constant 0 : index
      %c373_66 = arith.constant 373 : index
      %110 = vector.load %arg7[%c1_64, %c0_65, %c373_66] : memref<2x1x768xf32, #tpu.memory_space<vmem>>, vector<1x1x16xf32>
      %111 = vector.shape_cast %110 : vector<1x1x16xf32> to vector<1x16xf32>
      %112 = vector.shape_cast %109 : vector<1x16xf32> to vector<1x1x16xf32>
      tpu.vector_store %arg7[%c1_64, %c0_65, %c373_66], %112 {strides = array<i32>} : memref<2x1x768xf32, #tpu.memory_space<vmem>>, vector<1x1x16xf32>,
      %113 = vector.extract_strided_slice %36 {offsets = [0, 144], sizes = [1, 16], strides = [1, 1]} : vector<1x256xf32> to vector<1x16xf32>
      %c0_67 = arith.constant 0 : index
      %c0_68 = arith.constant 0 : index
      %c395 = arith.constant 395 : index
      %114 = vector.load %arg7[%c0_67, %c0_68, %c395] : memref<2x1x768xf32, #tpu.memory_space<vmem>>, vector<1x1x16xf32>
      %115 = vector.shape_cast %114 : vector<1x1x16xf32> to vector<1x16xf32>
      %116 = vector.shape_cast %113 : vector<1x16xf32> to vector<1x1x16xf32>
      tpu.vector_store %arg7[%c0_67, %c0_68, %c395], %116 {strides = array<i32>} : memref<2x1x768xf32, #tpu.memory_space<vmem>>, vector<1x1x16xf32>,
      %117 = vector.extract_strided_slice %38 {offsets = [0, 144], sizes = [1, 16], strides = [1, 1]} : vector<1x256xf32> to vector<1x16xf32>
      %c1_69 = arith.constant 1 : index
      %c0_70 = arith.constant 0 : index
      %c395_71 = arith.constant 395 : index
      %118 = vector.load %arg7[%c1_69, %c0_70, %c395_71] : memref<2x1x768xf32, #tpu.memory_space<vmem>>, vector<1x1x16xf32>
      %119 = vector.shape_cast %118 : vector<1x1x16xf32> to vector<1x16xf32>
      %120 = vector.shape_cast %117 : vector<1x16xf32> to vector<1x1x16xf32>
      tpu.vector_store %arg7[%c1_69, %c0_70, %c395_71], %120 {strides = array<i32>} : memref<2x1x768xf32, #tpu.memory_space<vmem>>, vector<1x1x16xf32>,
      %121 = vector.extract_strided_slice %36 {offsets = [0, 160], sizes = [1, 16], strides = [1, 1]} : vector<1x256xf32> to vector<1x16xf32>
      %c0_72 = arith.constant 0 : index
      %c0_73 = arith.constant 0 : index
      %c417 = arith.constant 417 : index
      %122 = vector.load %arg7[%c0_72, %c0_73, %c417] : memref<2x1x768xf32, #tpu.memory_space<vmem>>, vector<1x1x16xf32>
      %123 = vector.shape_cast %122 : vector<1x1x16xf32> to vector<1x16xf32>
      %124 = vector.shape_cast %121 : vector<1x16xf32> to vector<1x1x16xf32>
      tpu.vector_store %arg7[%c0_72, %c0_73, %c417], %124 {strides = array<i32>} : memref<2x1x768xf32, #tpu.memory_space<vmem>>, vector<1x1x16xf32>,
      %125 = vector.extract_strided_slice %38 {offsets = [0, 160], sizes = [1, 16], strides = [1, 1]} : vector<1x256xf32> to vector<1x16xf32>
      %c1_74 = arith.constant 1 : index
      %c0_75 = arith.constant 0 : index
      %c417_76 = arith.constant 417 : index
      %126 = vector.load %arg7[%c1_74, %c0_75, %c417_76] : memref<2x1x768xf32, #tpu.memory_space<vmem>>, vector<1x1x16xf32>
      %127 = vector.shape_cast %126 : vector<1x1x16xf32> to vector<1x16xf32>
      %128 = vector.shape_cast %125 : vector<1x16xf32> to vector<1x1x16xf32>
      tpu.vector_store %arg7[%c1_74, %c0_75, %c417_76], %128 {strides = array<i32>} : memref<2x1x768xf32, #tpu.memory_space<vmem>>, vector<1x1x16xf32>,
      %129 = vector.extract_strided_slice %36 {offsets = [0, 176], sizes = [1, 16], strides = [1, 1]} : vector<1x256xf32> to vector<1x16xf32>
      %c0_77 = arith.constant 0 : index
      %c0_78 = arith.constant 0 : index
      %c439 = arith.constant 439 : index
      %130 = vector.load %arg7[%c0_77, %c0_78, %c439] : memref<2x1x768xf32, #tpu.memory_space<vmem>>, vector<1x1x16xf32>
      %131 = vector.shape_cast %130 : vector<1x1x16xf32> to vector<1x16xf32>
      %132 = vector.shape_cast %129 : vector<1x16xf32> to vector<1x1x16xf32>
      tpu.vector_store %arg7[%c0_77, %c0_78, %c439], %132 {strides = array<i32>} : memref<2x1x768xf32, #tpu.memory_space<vmem>>, vector<1x1x16xf32>,
      %133 = vector.extract_strided_slice %38 {offsets = [0, 176], sizes = [1, 16], strides = [1, 1]} : vector<1x256xf32> to vector<1x16xf32>
      %c1_79 = arith.constant 1 : index
      %c0_80 = arith.constant 0 : index
      %c439_81 = arith.constant 439 : index
      %134 = vector.load %arg7[%c1_79, %c0_80, %c439_81] : memref<2x1x768xf32, #tpu.memory_space<vmem>>, vector<1x1x16xf32>
      %135 = vector.shape_cast %134 : vector<1x1x16xf32> to vector<1x16xf32>
      %136 = vector.shape_cast %133 : vector<1x16xf32> to vector<1x1x16xf32>
      tpu.vector_store %arg7[%c1_79, %c0_80, %c439_81], %136 {strides = array<i32>} : memref<2x1x768xf32, #tpu.memory_space<vmem>>, vector<1x1x16xf32>,
      %137 = vector.extract_strided_slice %36 {offsets = [0, 192], sizes = [1, 16], strides = [1, 1]} : vector<1x256xf32> to vector<1x16xf32>
      %c0_82 = arith.constant 0 : index
      %c0_83 = arith.constant 0 : index
      %c461 = arith.constant 461 : index
      %138 = vector.load %arg7[%c0_82, %c0_83, %c461] : memref<2x1x768xf32, #tpu.memory_space<vmem>>, vector<1x1x16xf32>
      %139 = vector.shape_cast %138 : vector<1x1x16xf32> to vector<1x16xf32>
      %140 = vector.shape_cast %137 : vector<1x16xf32> to vector<1x1x16xf32>
      tpu.vector_store %arg7[%c0_82, %c0_83, %c461], %140 {strides = array<i32>} : memref<2x1x768xf32, #tpu.memory_space<vmem>>, vector<1x1x16xf32>,
      %141 = vector.extract_strided_slice %38 {offsets = [0, 192], sizes = [1, 16], strides = [1, 1]} : vector<1x256xf32> to vector<1x16xf32>
      %c1_84 = arith.constant 1 : index
      %c0_85 = arith.constant 0 : index
      %c461_86 = arith.constant 461 : index
      %142 = vector.load %arg7[%c1_84, %c0_85, %c461_86] : memref<2x1x768xf32, #tpu.memory_space<vmem>>, vector<1x1x16xf32>
      %143 = vector.shape_cast %142 : vector<1x1x16xf32> to vector<1x16xf32>
      %144 = vector.shape_cast %141 : vector<1x16xf32> to vector<1x1x16xf32>
      tpu.vector_store %arg7[%c1_84, %c0_85, %c461_86], %144 {strides = array<i32>} : memref<2x1x768xf32, #tpu.memory_space<vmem>>, vector<1x1x16xf32>,
      %145 = vector.extract_strided_slice %36 {offsets = [0, 208], sizes = [1, 16], strides = [1, 1]} : vector<1x256xf32> to vector<1x16xf32>
      %c0_87 = arith.constant 0 : index
      %c0_88 = arith.constant 0 : index
      %c483 = arith.constant 483 : index
      %146 = vector.load %arg7[%c0_87, %c0_88, %c483] : memref<2x1x768xf32, #tpu.memory_space<vmem>>, vector<1x1x16xf32>
      %147 = vector.shape_cast %146 : vector<1x1x16xf32> to vector<1x16xf32>
      %148 = vector.shape_cast %145 : vector<1x16xf32> to vector<1x1x16xf32>
      tpu.vector_store %arg7[%c0_87, %c0_88, %c483], %148 {strides = array<i32>} : memref<2x1x768xf32, #tpu.memory_space<vmem>>, vector<1x1x16xf32>,
      %149 = vector.extract_strided_slice %38 {offsets = [0, 208], sizes = [1, 16], strides = [1, 1]} : vector<1x256xf32> to vector<1x16xf32>
      %c1_89 = arith.constant 1 : index
      %c0_90 = arith.constant 0 : index
      %c483_91 = arith.constant 483 : index
      %150 = vector.load %arg7[%c1_89, %c0_90, %c483_91] : memref<2x1x768xf32, #tpu.memory_space<vmem>>, vector<1x1x16xf32>
      %151 = vector.shape_cast %150 : vector<1x1x16xf32> to vector<1x16xf32>
      %152 = vector.shape_cast %149 : vector<1x16xf32> to vector<1x1x16xf32>
      tpu.vector_store %arg7[%c1_89, %c0_90, %c483_91], %152 {strides = array<i32>} : memref<2x1x768xf32, #tpu.memory_space<vmem>>, vector<1x1x16xf32>,
      %153 = vector.extract_strided_slice %36 {offsets = [0, 224], sizes = [1, 16], strides = [1, 1]} : vector<1x256xf32> to vector<1x16xf32>
      %c0_92 = arith.constant 0 : index
      %c0_93 = arith.constant 0 : index
      %c505 = arith.constant 505 : index
      %154 = vector.load %arg7[%c0_92, %c0_93, %c505] : memref<2x1x768xf32, #tpu.memory_space<vmem>>, vector<1x1x16xf32>
      %155 = vector.shape_cast %154 : vector<1x1x16xf32> to vector<1x16xf32>
      %156 = vector.shape_cast %153 : vector<1x16xf32> to vector<1x1x16xf32>
      tpu.vector_store %arg7[%c0_92, %c0_93, %c505], %156 {strides = array<i32>} : memref<2x1x768xf32, #tpu.memory_space<vmem>>, vector<1x1x16xf32>,
      %157 = vector.extract_strided_slice %38 {offsets = [0, 224], sizes = [1, 16], strides = [1, 1]} : vector<1x256xf32> to vector<1x16xf32>
      %c1_94 = arith.constant 1 : index
      %c0_95 = arith.constant 0 : index
      %c505_96 = arith.constant 505 : index
      %158 = vector.load %arg7[%c1_94, %c0_95, %c505_96] : memref<2x1x768xf32, #tpu.memory_space<vmem>>, vector<1x1x16xf32>
      %159 = vector.shape_cast %158 : vector<1x1x16xf32> to vector<1x16xf32>
      %160 = vector.shape_cast %157 : vector<1x16xf32> to vector<1x1x16xf32>
      tpu.vector_store %arg7[%c1_94, %c0_95, %c505_96], %160 {strides = array<i32>} : memref<2x1x768xf32, #tpu.memory_space<vmem>>, vector<1x1x16xf32>,
      %161 = vector.extract_strided_slice %36 {offsets = [0, 240], sizes = [1, 16], strides = [1, 1]} : vector<1x256xf32> to vector<1x16xf32>
      %c0_97 = arith.constant 0 : index
      %c0_98 = arith.constant 0 : index
      %c527 = arith.constant 527 : index
      %162 = vector.load %arg7[%c0_97, %c0_98, %c527] : memref<2x1x768xf32, #tpu.memory_space<vmem>>, vector<1x1x16xf32>
      %163 = vector.shape_cast %162 : vector<1x1x16xf32> to vector<1x16xf32>
      %164 = vector.shape_cast %161 : vector<1x16xf32> to vector<1x1x16xf32>
      tpu.vector_store %arg7[%c0_97, %c0_98, %c527], %164 {strides = array<i32>} : memref<2x1x768xf32, #tpu.memory_space<vmem>>, vector<1x1x16xf32>,
      %165 = vector.extract_strided_slice %38 {offsets = [0, 240], sizes = [1, 16], strides = [1, 1]} : vector<1x256xf32> to vector<1x16xf32>
      %c1_99 = arith.constant 1 : index
      %c0_100 = arith.constant 0 : index
      %c527_101 = arith.constant 527 : index
      %166 = vector.load %arg7[%c1_99, %c0_100, %c527_101] : memref<2x1x768xf32, #tpu.memory_space<vmem>>, vector<1x1x16xf32>
      %167 = vector.shape_cast %166 : vector<1x1x16xf32> to vector<1x16xf32>
      %168 = vector.shape_cast %165 : vector<1x16xf32> to vector<1x1x16xf32>
      tpu.vector_store %arg7[%c1_99, %c0_100, %c527_101], %168 {strides = array<i32>} : memref<2x1x768xf32, #tpu.memory_space<vmem>>, vector<1x1x16xf32>,
      %c0_102 = arith.constant 0 : index
      %169 = memref.load %arg3[%c0_102] : memref<98xf32, #tpu.memory_space<smem>>
      %c1_103 = arith.constant 1 : index
      %170 = memref.load %arg3[%c1_103] : memref<98xf32, #tpu.memory_space<smem>>
      %c2 = arith.constant 2 : index
      %171 = memref.load %arg3[%c2] : memref<98xf32, #tpu.memory_space<smem>>
      %c3 = arith.constant 3 : index
      %172 = memref.load %arg3[%c3] : memref<98xf32, #tpu.memory_space<smem>>
      %c4 = arith.constant 4 : index
      %173 = memref.load %arg3[%c4] : memref<98xf32, #tpu.memory_space<smem>>
      %c5 = arith.constant 5 : index
      %174 = memref.load %arg3[%c5] : memref<98xf32, #tpu.memory_space<smem>>
      %c6 = arith.constant 6 : index
      %175 = memref.load %arg3[%c6] : memref<98xf32, #tpu.memory_space<smem>>
      %c7 = arith.constant 7 : index
      %176 = memref.load %arg3[%c7] : memref<98xf32, #tpu.memory_space<smem>>
      %c8 = arith.constant 8 : index
      %177 = memref.load %arg3[%c8] : memref<98xf32, #tpu.memory_space<smem>>
      %c9 = arith.constant 9 : index
      %178 = memref.load %arg3[%c9] : memref<98xf32, #tpu.memory_space<smem>>
      %c10 = arith.constant 10 : index
      %179 = memref.load %arg3[%c10] : memref<98xf32, #tpu.memory_space<smem>>
      %c11 = arith.constant 11 : index
      %180 = memref.load %arg3[%c11] : memref<98xf32, #tpu.memory_space<smem>>
      %c12 = arith.constant 12 : index
      %181 = memref.load %arg3[%c12] : memref<98xf32, #tpu.memory_space<smem>>
      %c13 = arith.constant 13 : index
      %182 = memref.load %arg3[%c13] : memref<98xf32, #tpu.memory_space<smem>>
      %c14 = arith.constant 14 : index
      %183 = memref.load %arg3[%c14] : memref<98xf32, #tpu.memory_space<smem>>
      %c15 = arith.constant 15 : index
      %184 = memref.load %arg3[%c15] : memref<98xf32, #tpu.memory_space<smem>>
      %c16 = arith.constant 16 : index
      %185 = memref.load %arg3[%c16] : memref<98xf32, #tpu.memory_space<smem>>
      %c17 = arith.constant 17 : index
      %186 = memref.load %arg3[%c17] : memref<98xf32, #tpu.memory_space<smem>>
      %c18 = arith.constant 18 : index
      %187 = memref.load %arg3[%c18] : memref<98xf32, #tpu.memory_space<smem>>
      %c19 = arith.constant 19 : index
      %188 = memref.load %arg3[%c19] : memref<98xf32, #tpu.memory_space<smem>>
      %c20 = arith.constant 20 : index
      %189 = memref.load %arg3[%c20] : memref<98xf32, #tpu.memory_space<smem>>
      %c21 = arith.constant 21 : index
      %190 = memref.load %arg3[%c21] : memref<98xf32, #tpu.memory_space<smem>>
      %c22 = arith.constant 22 : index
      %191 = memref.load %arg3[%c22] : memref<98xf32, #tpu.memory_space<smem>>
      %c23 = arith.constant 23 : index
      %192 = memref.load %arg3[%c23] : memref<98xf32, #tpu.memory_space<smem>>
      %c24 = arith.constant 24 : index
      %193 = memref.load %arg3[%c24] : memref<98xf32, #tpu.memory_space<smem>>
      %c25 = arith.constant 25 : index
      %194 = memref.load %arg3[%c25] : memref<98xf32, #tpu.memory_space<smem>>
      %c26 = arith.constant 26 : index
      %195 = memref.load %arg3[%c26] : memref<98xf32, #tpu.memory_space<smem>>
      %c27 = arith.constant 27 : index
      %196 = memref.load %arg3[%c27] : memref<98xf32, #tpu.memory_space<smem>>
      %c28 = arith.constant 28 : index
      %197 = memref.load %arg3[%c28] : memref<98xf32, #tpu.memory_space<smem>>
      %c29 = arith.constant 29 : index
      %198 = memref.load %arg3[%c29] : memref<98xf32, #tpu.memory_space<smem>>
      %c30 = arith.constant 30 : index
      %199 = memref.load %arg3[%c30] : memref<98xf32, #tpu.memory_space<smem>>
      %c31 = arith.constant 31 : index
      %200 = memref.load %arg3[%c31] : memref<98xf32, #tpu.memory_space<smem>>
      %c32 = arith.constant 32 : index
      %201 = memref.load %arg3[%c32] : memref<98xf32, #tpu.memory_space<smem>>
      %c33 = arith.constant 33 : index
      %202 = memref.load %arg3[%c33] : memref<98xf32, #tpu.memory_space<smem>>
      %c34 = arith.constant 34 : index
      %203 = memref.load %arg3[%c34] : memref<98xf32, #tpu.memory_space<smem>>
      %c35 = arith.constant 35 : index
      %204 = memref.load %arg3[%c35] : memref<98xf32, #tpu.memory_space<smem>>
      %c36 = arith.constant 36 : index
      %205 = memref.load %arg3[%c36] : memref<98xf32, #tpu.memory_space<smem>>
      %c37 = arith.constant 37 : index
      %206 = memref.load %arg3[%c37] : memref<98xf32, #tpu.memory_space<smem>>
      %c38 = arith.constant 38 : index
      %207 = memref.load %arg3[%c38] : memref<98xf32, #tpu.memory_space<smem>>
      %c39 = arith.constant 39 : index
      %208 = memref.load %arg3[%c39] : memref<98xf32, #tpu.memory_space<smem>>
      %c40 = arith.constant 40 : index
      %209 = memref.load %arg3[%c40] : memref<98xf32, #tpu.memory_space<smem>>
      %c41 = arith.constant 41 : index
      %210 = memref.load %arg3[%c41] : memref<98xf32, #tpu.memory_space<smem>>
      %c42 = arith.constant 42 : index
      %211 = memref.load %arg3[%c42] : memref<98xf32, #tpu.memory_space<smem>>
      %c43 = arith.constant 43 : index
      %212 = memref.load %arg3[%c43] : memref<98xf32, #tpu.memory_space<smem>>
      %c44 = arith.constant 44 : index
      %213 = memref.load %arg3[%c44] : memref<98xf32, #tpu.memory_space<smem>>
      %c45 = arith.constant 45 : index
      %214 = memref.load %arg3[%c45] : memref<98xf32, #tpu.memory_space<smem>>
      %c46 = arith.constant 46 : index
      %215 = memref.load %arg3[%c46] : memref<98xf32, #tpu.memory_space<smem>>
      %c47 = arith.constant 47 : index
      %216 = memref.load %arg3[%c47] : memref<98xf32, #tpu.memory_space<smem>>
      %c48 = arith.constant 48 : index
      %217 = memref.load %arg3[%c48] : memref<98xf32, #tpu.memory_space<smem>>
      %c49 = arith.constant 49 : index
      %218 = memref.load %arg3[%c49] : memref<98xf32, #tpu.memory_space<smem>>
      %c50 = arith.constant 50 : index
      %219 = memref.load %arg3[%c50] : memref<98xf32, #tpu.memory_space<smem>>
      %c51 = arith.constant 51 : index
      %220 = memref.load %arg3[%c51] : memref<98xf32, #tpu.memory_space<smem>>
      %c52 = arith.constant 52 : index
      %221 = memref.load %arg3[%c52] : memref<98xf32, #tpu.memory_space<smem>>
      %c53 = arith.constant 53 : index
      %222 = memref.load %arg3[%c53] : memref<98xf32, #tpu.memory_space<smem>>
      %c54 = arith.constant 54 : index
      %223 = memref.load %arg3[%c54] : memref<98xf32, #tpu.memory_space<smem>>
      %c55 = arith.constant 55 : index
      %224 = memref.load %arg3[%c55] : memref<98xf32, #tpu.memory_space<smem>>
      %c56 = arith.constant 56 : index
      %225 = memref.load %arg3[%c56] : memref<98xf32, #tpu.memory_space<smem>>
      %c57 = arith.constant 57 : index
      %226 = memref.load %arg3[%c57] : memref<98xf32, #tpu.memory_space<smem>>
      %c58 = arith.constant 58 : index
      %227 = memref.load %arg3[%c58] : memref<98xf32, #tpu.memory_space<smem>>
      %c59 = arith.constant 59 : index
      %228 = memref.load %arg3[%c59] : memref<98xf32, #tpu.memory_space<smem>>
      %c60 = arith.constant 60 : index
      %229 = memref.load %arg3[%c60] : memref<98xf32, #tpu.memory_space<smem>>
      %c61 = arith.constant 61 : index
      %230 = memref.load %arg3[%c61] : memref<98xf32, #tpu.memory_space<smem>>
      %c62 = arith.constant 62 : index
      %231 = memref.load %arg3[%c62] : memref<98xf32, #tpu.memory_space<smem>>
      %c63 = arith.constant 63 : index
      %232 = memref.load %arg3[%c63] : memref<98xf32, #tpu.memory_space<smem>>
      %c64 = arith.constant 64 : index
      %233 = memref.load %arg3[%c64] : memref<98xf32, #tpu.memory_space<smem>>
      %c65 = arith.constant 65 : index
      %234 = memref.load %arg3[%c65] : memref<98xf32, #tpu.memory_space<smem>>
      %c66 = arith.constant 66 : index
      %235 = memref.load %arg3[%c66] : memref<98xf32, #tpu.memory_space<smem>>
      %c67 = arith.constant 67 : index
      %236 = memref.load %arg3[%c67] : memref<98xf32, #tpu.memory_space<smem>>
      %c68 = arith.constant 68 : index
      %237 = memref.load %arg3[%c68] : memref<98xf32, #tpu.memory_space<smem>>
      %c69 = arith.constant 69 : index
      %238 = memref.load %arg3[%c69] : memref<98xf32, #tpu.memory_space<smem>>
      %c70 = arith.constant 70 : index
      %239 = memref.load %arg3[%c70] : memref<98xf32, #tpu.memory_space<smem>>
      %c71 = arith.constant 71 : index
      %240 = memref.load %arg3[%c71] : memref<98xf32, #tpu.memory_space<smem>>
      %c72 = arith.constant 72 : index
      %241 = memref.load %arg3[%c72] : memref<98xf32, #tpu.memory_space<smem>>
      %c73 = arith.constant 73 : index
      %242 = memref.load %arg3[%c73] : memref<98xf32, #tpu.memory_space<smem>>
      %c74 = arith.constant 74 : index
      %243 = memref.load %arg3[%c74] : memref<98xf32, #tpu.memory_space<smem>>
      %c75 = arith.constant 75 : index
      %244 = memref.load %arg3[%c75] : memref<98xf32, #tpu.memory_space<smem>>
      %c76 = arith.constant 76 : index
      %245 = memref.load %arg3[%c76] : memref<98xf32, #tpu.memory_space<smem>>
      %c77 = arith.constant 77 : index
      %246 = memref.load %arg3[%c77] : memref<98xf32, #tpu.memory_space<smem>>
      %c78 = arith.constant 78 : index
      %247 = memref.load %arg3[%c78] : memref<98xf32, #tpu.memory_space<smem>>
      %c79 = arith.constant 79 : index
      %248 = memref.load %arg3[%c79] : memref<98xf32, #tpu.memory_space<smem>>
      %c80 = arith.constant 80 : index
      %249 = memref.load %arg3[%c80] : memref<98xf32, #tpu.memory_space<smem>>
      %c81 = arith.constant 81 : index
      %250 = memref.load %arg3[%c81] : memref<98xf32, #tpu.memory_space<smem>>
      %c82 = arith.constant 82 : index
      %251 = memref.load %arg3[%c82] : memref<98xf32, #tpu.memory_space<smem>>
      %c83 = arith.constant 83 : index
      %252 = memref.load %arg3[%c83] : memref<98xf32, #tpu.memory_space<smem>>
      %c84 = arith.constant 84 : index
      %253 = memref.load %arg3[%c84] : memref<98xf32, #tpu.memory_space<smem>>
      %c85 = arith.constant 85 : index
      %254 = memref.load %arg3[%c85] : memref<98xf32, #tpu.memory_space<smem>>
      %c86 = arith.constant 86 : index
      %255 = memref.load %arg3[%c86] : memref<98xf32, #tpu.memory_space<smem>>
      %c87 = arith.constant 87 : index
      %256 = memref.load %arg3[%c87] : memref<98xf32, #tpu.memory_space<smem>>
      %c88 = arith.constant 88 : index
      %257 = memref.load %arg3[%c88] : memref<98xf32, #tpu.memory_space<smem>>
      %c89 = arith.constant 89 : index
      %258 = memref.load %arg3[%c89] : memref<98xf32, #tpu.memory_space<smem>>
      %c90 = arith.constant 90 : index
      %259 = memref.load %arg3[%c90] : memref<98xf32, #tpu.memory_space<smem>>
      %c91 = arith.constant 91 : index
      %260 = memref.load %arg3[%c91] : memref<98xf32, #tpu.memory_space<smem>>
      %c92 = arith.constant 92 : index
      %261 = memref.load %arg3[%c92] : memref<98xf32, #tpu.memory_space<smem>>
      %c93 = arith.constant 93 : index
      %262 = memref.load %arg3[%c93] : memref<98xf32, #tpu.memory_space<smem>>
      %c94 = arith.constant 94 : index
      %263 = memref.load %arg3[%c94] : memref<98xf32, #tpu.memory_space<smem>>
      %c95 = arith.constant 95 : index
      %264 = memref.load %arg3[%c95] : memref<98xf32, #tpu.memory_space<smem>>
      %c96 = arith.constant 96 : index
      %265 = memref.load %arg3[%c96] : memref<98xf32, #tpu.memory_space<smem>>
      %c97 = arith.constant 97 : index
      %266 = memref.load %arg3[%c97] : memref<98xf32, #tpu.memory_space<smem>>
      %cst_104 = arith.constant 0.000000e+00 : f32
      %267 = vector.broadcast %cst_104 : f32 to vector<1x512xf32>
      %c0_105 = arith.constant 0 : index
      %c0_106 = arith.constant 0 : index
      %c59_107 = arith.constant 59 : index
      %268 = vector.load %arg7[%c0_105, %c0_106, %c59_107] : memref<2x1x768xf32, #tpu.memory_space<vmem>>, vector<1x1x512xf32>
      %269 = vector.shape_cast %268 : vector<1x1x512xf32> to vector<1x512xf32>
      %270 = vector.broadcast %169 : f32 to vector<1x512xf32>
      %271 = arith.mulf %270, %269 : vector<1x512xf32>
      %272 = arith.addf %267, %271 : vector<1x512xf32>
      %c1_108 = arith.constant 1 : index
      %c0_109 = arith.constant 0 : index
      %c59_110 = arith.constant 59 : index
      %273 = vector.load %arg7[%c1_108, %c0_109, %c59_110] : memref<2x1x768xf32, #tpu.memory_space<vmem>>, vector<1x1x512xf32>
      %274 = vector.shape_cast %273 : vector<1x1x512xf32> to vector<1x512xf32>
      %275 = vector.broadcast %218 : f32 to vector<1x512xf32>
      %276 = arith.mulf %275, %274 : vector<1x512xf32>
      %277 = arith.addf %272, %276 : vector<1x512xf32>
      %c0_111 = arith.constant 0 : index
      %c0_112 = arith.constant 0 : index
      %c60_113 = arith.constant 60 : index
      %278 = vector.load %arg7[%c0_111, %c0_112, %c60_113] : memref<2x1x768xf32, #tpu.memory_space<vmem>>, vector<1x1x512xf32>
      %279 = vector.shape_cast %278 : vector<1x1x512xf32> to vector<1x512xf32>
      %280 = vector.broadcast %170 : f32 to vector<1x512xf32>
      %281 = arith.mulf %280, %279 : vector<1x512xf32>
      %282 = arith.addf %277, %281 : vector<1x512xf32>
      %c1_114 = arith.constant 1 : index
      %c0_115 = arith.constant 0 : index
      %c60_116 = arith.constant 60 : index
      %283 = vector.load %arg7[%c1_114, %c0_115, %c60_116] : memref<2x1x768xf32, #tpu.memory_space<vmem>>, vector<1x1x512xf32>
      %284 = vector.shape_cast %283 : vector<1x1x512xf32> to vector<1x512xf32>
      %285 = vector.broadcast %219 : f32 to vector<1x512xf32>
      %286 = arith.mulf %285, %284 : vector<1x512xf32>
      %287 = arith.addf %282, %286 : vector<1x512xf32>
      %c0_117 = arith.constant 0 : index
      %c0_118 = arith.constant 0 : index
      %c61_119 = arith.constant 61 : index
      %288 = vector.load %arg7[%c0_117, %c0_118, %c61_119] : memref<2x1x768xf32, #tpu.memory_space<vmem>>, vector<1x1x512xf32>
      %289 = vector.shape_cast %288 : vector<1x1x512xf32> to vector<1x512xf32>
      %290 = vector.broadcast %171 : f32 to vector<1x512xf32>
      %291 = arith.mulf %290, %289 : vector<1x512xf32>
      %292 = arith.addf %287, %291 : vector<1x512xf32>
      %c1_120 = arith.constant 1 : index
      %c0_121 = arith.constant 0 : index
      %c61_122 = arith.constant 61 : index
      %293 = vector.load %arg7[%c1_120, %c0_121, %c61_122] : memref<2x1x768xf32, #tpu.memory_space<vmem>>, vector<1x1x512xf32>
      %294 = vector.shape_cast %293 : vector<1x1x512xf32> to vector<1x512xf32>
      %295 = vector.broadcast %220 : f32 to vector<1x512xf32>
      %296 = arith.mulf %295, %294 : vector<1x512xf32>
      %297 = arith.addf %292, %296 : vector<1x512xf32>
      %c0_123 = arith.constant 0 : index
      %c0_124 = arith.constant 0 : index
      %c62_125 = arith.constant 62 : index
      %298 = vector.load %arg7[%c0_123, %c0_124, %c62_125] : memref<2x1x768xf32, #tpu.memory_space<vmem>>, vector<1x1x512xf32>
      %299 = vector.shape_cast %298 : vector<1x1x512xf32> to vector<1x512xf32>
      %300 = vector.broadcast %172 : f32 to vector<1x512xf32>
      %301 = arith.mulf %300, %299 : vector<1x512xf32>
      %302 = arith.addf %297, %301 : vector<1x512xf32>
      %c1_126 = arith.constant 1 : index
      %c0_127 = arith.constant 0 : index
      %c62_128 = arith.constant 62 : index
      %303 = vector.load %arg7[%c1_126, %c0_127, %c62_128] : memref<2x1x768xf32, #tpu.memory_space<vmem>>, vector<1x1x512xf32>
      %304 = vector.shape_cast %303 : vector<1x1x512xf32> to vector<1x512xf32>
      %305 = vector.broadcast %221 : f32 to vector<1x512xf32>
      %306 = arith.mulf %305, %304 : vector<1x512xf32>
      %307 = arith.addf %302, %306 : vector<1x512xf32>
      %c0_129 = arith.constant 0 : index
      %c0_130 = arith.constant 0 : index
      %c63_131 = arith.constant 63 : index
      %308 = vector.load %arg7[%c0_129, %c0_130, %c63_131] : memref<2x1x768xf32, #tpu.memory_space<vmem>>, vector<1x1x512xf32>
      %309 = vector.shape_cast %308 : vector<1x1x512xf32> to vector<1x512xf32>
      %310 = vector.broadcast %173 : f32 to vector<1x512xf32>
      %311 = arith.mulf %310, %309 : vector<1x512xf32>
      %312 = arith.addf %307, %311 : vector<1x512xf32>
      %c1_132 = arith.constant 1 : index
      %c0_133 = arith.constant 0 : index
      %c63_134 = arith.constant 63 : index
      %313 = vector.load %arg7[%c1_132, %c0_133, %c63_134] : memref<2x1x768xf32, #tpu.memory_space<vmem>>, vector<1x1x512xf32>
      %314 = vector.shape_cast %313 : vector<1x1x512xf32> to vector<1x512xf32>
      %315 = vector.broadcast %222 : f32 to vector<1x512xf32>
      %316 = arith.mulf %315, %314 : vector<1x512xf32>
      %317 = arith.addf %312, %316 : vector<1x512xf32>
      %c0_135 = arith.constant 0 : index
      %c0_136 = arith.constant 0 : index
      %c64_137 = arith.constant 64 : index
      %318 = vector.load %arg7[%c0_135, %c0_136, %c64_137] : memref<2x1x768xf32, #tpu.memory_space<vmem>>, vector<1x1x512xf32>
      %319 = vector.shape_cast %318 : vector<1x1x512xf32> to vector<1x512xf32>
      %320 = vector.broadcast %174 : f32 to vector<1x512xf32>
      %321 = arith.mulf %320, %319 : vector<1x512xf32>
      %322 = arith.addf %317, %321 : vector<1x512xf32>
      %c1_138 = arith.constant 1 : index
      %c0_139 = arith.constant 0 : index
      %c64_140 = arith.constant 64 : index
      %323 = vector.load %arg7[%c1_138, %c0_139, %c64_140] : memref<2x1x768xf32, #tpu.memory_space<vmem>>, vector<1x1x512xf32>
      %324 = vector.shape_cast %323 : vector<1x1x512xf32> to vector<1x512xf32>
      %325 = vector.broadcast %223 : f32 to vector<1x512xf32>
      %326 = arith.mulf %325, %324 : vector<1x512xf32>
      %327 = arith.addf %322, %326 : vector<1x512xf32>
      %c0_141 = arith.constant 0 : index
      %c0_142 = arith.constant 0 : index
      %c65_143 = arith.constant 65 : index
      %328 = vector.load %arg7[%c0_141, %c0_142, %c65_143] : memref<2x1x768xf32, #tpu.memory_space<vmem>>, vector<1x1x512xf32>
      %329 = vector.shape_cast %328 : vector<1x1x512xf32> to vector<1x512xf32>
      %330 = vector.broadcast %175 : f32 to vector<1x512xf32>
      %331 = arith.mulf %330, %329 : vector<1x512xf32>
      %332 = arith.addf %327, %331 : vector<1x512xf32>
      %c1_144 = arith.constant 1 : index
      %c0_145 = arith.constant 0 : index
      %c65_146 = arith.constant 65 : index
      %333 = vector.load %arg7[%c1_144, %c0_145, %c65_146] : memref<2x1x768xf32, #tpu.memory_space<vmem>>, vector<1x1x512xf32>
      %334 = vector.shape_cast %333 : vector<1x1x512xf32> to vector<1x512xf32>
      %335 = vector.broadcast %224 : f32 to vector<1x512xf32>
      %336 = arith.mulf %335, %334 : vector<1x512xf32>
      %337 = arith.addf %332, %336 : vector<1x512xf32>
      %c0_147 = arith.constant 0 : index
      %c0_148 = arith.constant 0 : index
      %c81_149 = arith.constant 81 : index
      %338 = vector.load %arg7[%c0_147, %c0_148, %c81_149] : memref<2x1x768xf32, #tpu.memory_space<vmem>>, vector<1x1x512xf32>
      %339 = vector.shape_cast %338 : vector<1x1x512xf32> to vector<1x512xf32>
      %340 = vector.broadcast %176 : f32 to vector<1x512xf32>
      %341 = arith.mulf %340, %339 : vector<1x512xf32>
      %342 = arith.addf %337, %341 : vector<1x512xf32>
      %c1_150 = arith.constant 1 : index
      %c0_151 = arith.constant 0 : index
      %c81_152 = arith.constant 81 : index
      %343 = vector.load %arg7[%c1_150, %c0_151, %c81_152] : memref<2x1x768xf32, #tpu.memory_space<vmem>>, vector<1x1x512xf32>
      %344 = vector.shape_cast %343 : vector<1x1x512xf32> to vector<1x512xf32>
      %345 = vector.broadcast %225 : f32 to vector<1x512xf32>
      %346 = arith.mulf %345, %344 : vector<1x512xf32>
      %347 = arith.addf %342, %346 : vector<1x512xf32>
      %c0_153 = arith.constant 0 : index
      %c0_154 = arith.constant 0 : index
      %c82_155 = arith.constant 82 : index
      %348 = vector.load %arg7[%c0_153, %c0_154, %c82_155] : memref<2x1x768xf32, #tpu.memory_space<vmem>>, vector<1x1x512xf32>
      %349 = vector.shape_cast %348 : vector<1x1x512xf32> to vector<1x512xf32>
      %350 = vector.broadcast %177 : f32 to vector<1x512xf32>
      %351 = arith.mulf %350, %349 : vector<1x512xf32>
      %352 = arith.addf %347, %351 : vector<1x512xf32>
      %c1_156 = arith.constant 1 : index
      %c0_157 = arith.constant 0 : index
      %c82_158 = arith.constant 82 : index
      %353 = vector.load %arg7[%c1_156, %c0_157, %c82_158] : memref<2x1x768xf32, #tpu.memory_space<vmem>>, vector<1x1x512xf32>
      %354 = vector.shape_cast %353 : vector<1x1x512xf32> to vector<1x512xf32>
      %355 = vector.broadcast %226 : f32 to vector<1x512xf32>
      %356 = arith.mulf %355, %354 : vector<1x512xf32>
      %357 = arith.addf %352, %356 : vector<1x512xf32>
      %c0_159 = arith.constant 0 : index
      %c0_160 = arith.constant 0 : index
      %c83_161 = arith.constant 83 : index
      %358 = vector.load %arg7[%c0_159, %c0_160, %c83_161] : memref<2x1x768xf32, #tpu.memory_space<vmem>>, vector<1x1x512xf32>
      %359 = vector.shape_cast %358 : vector<1x1x512xf32> to vector<1x512xf32>
      %360 = vector.broadcast %178 : f32 to vector<1x512xf32>
      %361 = arith.mulf %360, %359 : vector<1x512xf32>
      %362 = arith.addf %357, %361 : vector<1x512xf32>
      %c1_162 = arith.constant 1 : index
      %c0_163 = arith.constant 0 : index
      %c83_164 = arith.constant 83 : index
      %363 = vector.load %arg7[%c1_162, %c0_163, %c83_164] : memref<2x1x768xf32, #tpu.memory_space<vmem>>, vector<1x1x512xf32>
      %364 = vector.shape_cast %363 : vector<1x1x512xf32> to vector<1x512xf32>
      %365 = vector.broadcast %227 : f32 to vector<1x512xf32>
      %366 = arith.mulf %365, %364 : vector<1x512xf32>
      %367 = arith.addf %362, %366 : vector<1x512xf32>
      %c0_165 = arith.constant 0 : index
      %c0_166 = arith.constant 0 : index
      %c84_167 = arith.constant 84 : index
      %368 = vector.load %arg7[%c0_165, %c0_166, %c84_167] : memref<2x1x768xf32, #tpu.memory_space<vmem>>, vector<1x1x512xf32>
      %369 = vector.shape_cast %368 : vector<1x1x512xf32> to vector<1x512xf32>
      %370 = vector.broadcast %179 : f32 to vector<1x512xf32>
      %371 = arith.mulf %370, %369 : vector<1x512xf32>
      %372 = arith.addf %367, %371 : vector<1x512xf32>
      %c1_168 = arith.constant 1 : index
      %c0_169 = arith.constant 0 : index
      %c84_170 = arith.constant 84 : index
      %373 = vector.load %arg7[%c1_168, %c0_169, %c84_170] : memref<2x1x768xf32, #tpu.memory_space<vmem>>, vector<1x1x512xf32>
      %374 = vector.shape_cast %373 : vector<1x1x512xf32> to vector<1x512xf32>
      %375 = vector.broadcast %228 : f32 to vector<1x512xf32>
      %376 = arith.mulf %375, %374 : vector<1x512xf32>
      %377 = arith.addf %372, %376 : vector<1x512xf32>
      %c0_171 = arith.constant 0 : index
      %c0_172 = arith.constant 0 : index
      %c85_173 = arith.constant 85 : index
      %378 = vector.load %arg7[%c0_171, %c0_172, %c85_173] : memref<2x1x768xf32, #tpu.memory_space<vmem>>, vector<1x1x512xf32>
      %379 = vector.shape_cast %378 : vector<1x1x512xf32> to vector<1x512xf32>
      %380 = vector.broadcast %180 : f32 to vector<1x512xf32>
      %381 = arith.mulf %380, %379 : vector<1x512xf32>
      %382 = arith.addf %377, %381 : vector<1x512xf32>
      %c1_174 = arith.constant 1 : index
      %c0_175 = arith.constant 0 : index
      %c85_176 = arith.constant 85 : index
      %383 = vector.load %arg7[%c1_174, %c0_175, %c85_176] : memref<2x1x768xf32, #tpu.memory_space<vmem>>, vector<1x1x512xf32>
      %384 = vector.shape_cast %383 : vector<1x1x512xf32> to vector<1x512xf32>
      %385 = vector.broadcast %229 : f32 to vector<1x512xf32>
      %386 = arith.mulf %385, %384 : vector<1x512xf32>
      %387 = arith.addf %382, %386 : vector<1x512xf32>
      %c0_177 = arith.constant 0 : index
      %c0_178 = arith.constant 0 : index
      %c86_179 = arith.constant 86 : index
      %388 = vector.load %arg7[%c0_177, %c0_178, %c86_179] : memref<2x1x768xf32, #tpu.memory_space<vmem>>, vector<1x1x512xf32>
      %389 = vector.shape_cast %388 : vector<1x1x512xf32> to vector<1x512xf32>
      %390 = vector.broadcast %181 : f32 to vector<1x512xf32>
      %391 = arith.mulf %390, %389 : vector<1x512xf32>
      %392 = arith.addf %387, %391 : vector<1x512xf32>
      %c1_180 = arith.constant 1 : index
      %c0_181 = arith.constant 0 : index
      %c86_182 = arith.constant 86 : index
      %393 = vector.load %arg7[%c1_180, %c0_181, %c86_182] : memref<2x1x768xf32, #tpu.memory_space<vmem>>, vector<1x1x512xf32>
      %394 = vector.shape_cast %393 : vector<1x1x512xf32> to vector<1x512xf32>
      %395 = vector.broadcast %230 : f32 to vector<1x512xf32>
      %396 = arith.mulf %395, %394 : vector<1x512xf32>
      %397 = arith.addf %392, %396 : vector<1x512xf32>
      %c0_183 = arith.constant 0 : index
      %c0_184 = arith.constant 0 : index
      %c87_185 = arith.constant 87 : index
      %398 = vector.load %arg7[%c0_183, %c0_184, %c87_185] : memref<2x1x768xf32, #tpu.memory_space<vmem>>, vector<1x1x512xf32>
      %399 = vector.shape_cast %398 : vector<1x1x512xf32> to vector<1x512xf32>
      %400 = vector.broadcast %182 : f32 to vector<1x512xf32>
      %401 = arith.mulf %400, %399 : vector<1x512xf32>
      %402 = arith.addf %397, %401 : vector<1x512xf32>
      %c1_186 = arith.constant 1 : index
      %c0_187 = arith.constant 0 : index
      %c87_188 = arith.constant 87 : index
      %403 = vector.load %arg7[%c1_186, %c0_187, %c87_188] : memref<2x1x768xf32, #tpu.memory_space<vmem>>, vector<1x1x512xf32>
      %404 = vector.shape_cast %403 : vector<1x1x512xf32> to vector<1x512xf32>
      %405 = vector.broadcast %231 : f32 to vector<1x512xf32>
      %406 = arith.mulf %405, %404 : vector<1x512xf32>
      %407 = arith.addf %402, %406 : vector<1x512xf32>
      %c0_189 = arith.constant 0 : index
      %c0_190 = arith.constant 0 : index
      %c103 = arith.constant 103 : index
      %408 = vector.load %arg7[%c0_189, %c0_190, %c103] : memref<2x1x768xf32, #tpu.memory_space<vmem>>, vector<1x1x512xf32>
      %409 = vector.shape_cast %408 : vector<1x1x512xf32> to vector<1x512xf32>
      %410 = vector.broadcast %183 : f32 to vector<1x512xf32>
      %411 = arith.mulf %410, %409 : vector<1x512xf32>
      %412 = arith.addf %407, %411 : vector<1x512xf32>
      %c1_191 = arith.constant 1 : index
      %c0_192 = arith.constant 0 : index
      %c103_193 = arith.constant 103 : index
      %413 = vector.load %arg7[%c1_191, %c0_192, %c103_193] : memref<2x1x768xf32, #tpu.memory_space<vmem>>, vector<1x1x512xf32>
      %414 = vector.shape_cast %413 : vector<1x1x512xf32> to vector<1x512xf32>
      %415 = vector.broadcast %232 : f32 to vector<1x512xf32>
      %416 = arith.mulf %415, %414 : vector<1x512xf32>
      %417 = arith.addf %412, %416 : vector<1x512xf32>
      %c0_194 = arith.constant 0 : index
      %c0_195 = arith.constant 0 : index
      %c104 = arith.constant 104 : index
      %418 = vector.load %arg7[%c0_194, %c0_195, %c104] : memref<2x1x768xf32, #tpu.memory_space<vmem>>, vector<1x1x512xf32>
      %419 = vector.shape_cast %418 : vector<1x1x512xf32> to vector<1x512xf32>
      %420 = vector.broadcast %184 : f32 to vector<1x512xf32>
      %421 = arith.mulf %420, %419 : vector<1x512xf32>
      %422 = arith.addf %417, %421 : vector<1x512xf32>
      %c1_196 = arith.constant 1 : index
      %c0_197 = arith.constant 0 : index
      %c104_198 = arith.constant 104 : index
      %423 = vector.load %arg7[%c1_196, %c0_197, %c104_198] : memref<2x1x768xf32, #tpu.memory_space<vmem>>, vector<1x1x512xf32>
      %424 = vector.shape_cast %423 : vector<1x1x512xf32> to vector<1x512xf32>
      %425 = vector.broadcast %233 : f32 to vector<1x512xf32>
      %426 = arith.mulf %425, %424 : vector<1x512xf32>
      %427 = arith.addf %422, %426 : vector<1x512xf32>
      %c0_199 = arith.constant 0 : index
      %c0_200 = arith.constant 0 : index
      %c105 = arith.constant 105 : index
      %428 = vector.load %arg7[%c0_199, %c0_200, %c105] : memref<2x1x768xf32, #tpu.memory_space<vmem>>, vector<1x1x512xf32>
      %429 = vector.shape_cast %428 : vector<1x1x512xf32> to vector<1x512xf32>
      %430 = vector.broadcast %185 : f32 to vector<1x512xf32>
      %431 = arith.mulf %430, %429 : vector<1x512xf32>
      %432 = arith.addf %427, %431 : vector<1x512xf32>
      %c1_201 = arith.constant 1 : index
      %c0_202 = arith.constant 0 : index
      %c105_203 = arith.constant 105 : index
      %433 = vector.load %arg7[%c1_201, %c0_202, %c105_203] : memref<2x1x768xf32, #tpu.memory_space<vmem>>, vector<1x1x512xf32>
      %434 = vector.shape_cast %433 : vector<1x1x512xf32> to vector<1x512xf32>
      %435 = vector.broadcast %234 : f32 to vector<1x512xf32>
      %436 = arith.mulf %435, %434 : vector<1x512xf32>
      %437 = arith.addf %432, %436 : vector<1x512xf32>
      %c0_204 = arith.constant 0 : index
      %c0_205 = arith.constant 0 : index
      %c106 = arith.constant 106 : index
      %438 = vector.load %arg7[%c0_204, %c0_205, %c106] : memref<2x1x768xf32, #tpu.memory_space<vmem>>, vector<1x1x512xf32>
      %439 = vector.shape_cast %438 : vector<1x1x512xf32> to vector<1x512xf32>
      %440 = vector.broadcast %186 : f32 to vector<1x512xf32>
      %441 = arith.mulf %440, %439 : vector<1x512xf32>
      %442 = arith.addf %437, %441 : vector<1x512xf32>
      %c1_206 = arith.constant 1 : index
      %c0_207 = arith.constant 0 : index
      %c106_208 = arith.constant 106 : index
      %443 = vector.load %arg7[%c1_206, %c0_207, %c106_208] : memref<2x1x768xf32, #tpu.memory_space<vmem>>, vector<1x1x512xf32>
      %444 = vector.shape_cast %443 : vector<1x1x512xf32> to vector<1x512xf32>
      %445 = vector.broadcast %235 : f32 to vector<1x512xf32>
      %446 = arith.mulf %445, %444 : vector<1x512xf32>
      %447 = arith.addf %442, %446 : vector<1x512xf32>
      %c0_209 = arith.constant 0 : index
      %c0_210 = arith.constant 0 : index
      %c107 = arith.constant 107 : index
      %448 = vector.load %arg7[%c0_209, %c0_210, %c107] : memref<2x1x768xf32, #tpu.memory_space<vmem>>, vector<1x1x512xf32>
      %449 = vector.shape_cast %448 : vector<1x1x512xf32> to vector<1x512xf32>
      %450 = vector.broadcast %187 : f32 to vector<1x512xf32>
      %451 = arith.mulf %450, %449 : vector<1x512xf32>
      %452 = arith.addf %447, %451 : vector<1x512xf32>
      %c1_211 = arith.constant 1 : index
      %c0_212 = arith.constant 0 : index
      %c107_213 = arith.constant 107 : index
      %453 = vector.load %arg7[%c1_211, %c0_212, %c107_213] : memref<2x1x768xf32, #tpu.memory_space<vmem>>, vector<1x1x512xf32>
      %454 = vector.shape_cast %453 : vector<1x1x512xf32> to vector<1x512xf32>
      %455 = vector.broadcast %236 : f32 to vector<1x512xf32>
      %456 = arith.mulf %455, %454 : vector<1x512xf32>
      %457 = arith.addf %452, %456 : vector<1x512xf32>
      %c0_214 = arith.constant 0 : index
      %c0_215 = arith.constant 0 : index
      %c108 = arith.constant 108 : index
      %458 = vector.load %arg7[%c0_214, %c0_215, %c108] : memref<2x1x768xf32, #tpu.memory_space<vmem>>, vector<1x1x512xf32>
      %459 = vector.shape_cast %458 : vector<1x1x512xf32> to vector<1x512xf32>
      %460 = vector.broadcast %188 : f32 to vector<1x512xf32>
      %461 = arith.mulf %460, %459 : vector<1x512xf32>
      %462 = arith.addf %457, %461 : vector<1x512xf32>
      %c1_216 = arith.constant 1 : index
      %c0_217 = arith.constant 0 : index
      %c108_218 = arith.constant 108 : index
      %463 = vector.load %arg7[%c1_216, %c0_217, %c108_218] : memref<2x1x768xf32, #tpu.memory_space<vmem>>, vector<1x1x512xf32>
      %464 = vector.shape_cast %463 : vector<1x1x512xf32> to vector<1x512xf32>
      %465 = vector.broadcast %237 : f32 to vector<1x512xf32>
      %466 = arith.mulf %465, %464 : vector<1x512xf32>
      %467 = arith.addf %462, %466 : vector<1x512xf32>
      %c0_219 = arith.constant 0 : index
      %c0_220 = arith.constant 0 : index
      %c109 = arith.constant 109 : index
      %468 = vector.load %arg7[%c0_219, %c0_220, %c109] : memref<2x1x768xf32, #tpu.memory_space<vmem>>, vector<1x1x512xf32>
      %469 = vector.shape_cast %468 : vector<1x1x512xf32> to vector<1x512xf32>
      %470 = vector.broadcast %189 : f32 to vector<1x512xf32>
      %471 = arith.mulf %470, %469 : vector<1x512xf32>
      %472 = arith.addf %467, %471 : vector<1x512xf32>
      %c1_221 = arith.constant 1 : index
      %c0_222 = arith.constant 0 : index
      %c109_223 = arith.constant 109 : index
      %473 = vector.load %arg7[%c1_221, %c0_222, %c109_223] : memref<2x1x768xf32, #tpu.memory_space<vmem>>, vector<1x1x512xf32>
      %474 = vector.shape_cast %473 : vector<1x1x512xf32> to vector<1x512xf32>
      %475 = vector.broadcast %238 : f32 to vector<1x512xf32>
      %476 = arith.mulf %475, %474 : vector<1x512xf32>
      %477 = arith.addf %472, %476 : vector<1x512xf32>
      %c0_224 = arith.constant 0 : index
      %c0_225 = arith.constant 0 : index
      %c125 = arith.constant 125 : index
      %478 = vector.load %arg7[%c0_224, %c0_225, %c125] : memref<2x1x768xf32, #tpu.memory_space<vmem>>, vector<1x1x512xf32>
      %479 = vector.shape_cast %478 : vector<1x1x512xf32> to vector<1x512xf32>
      %480 = vector.broadcast %190 : f32 to vector<1x512xf32>
      %481 = arith.mulf %480, %479 : vector<1x512xf32>
      %482 = arith.addf %477, %481 : vector<1x512xf32>
      %c1_226 = arith.constant 1 : index
      %c0_227 = arith.constant 0 : index
      %c125_228 = arith.constant 125 : index
      %483 = vector.load %arg7[%c1_226, %c0_227, %c125_228] : memref<2x1x768xf32, #tpu.memory_space<vmem>>, vector<1x1x512xf32>
      %484 = vector.shape_cast %483 : vector<1x1x512xf32> to vector<1x512xf32>
      %485 = vector.broadcast %239 : f32 to vector<1x512xf32>
      %486 = arith.mulf %485, %484 : vector<1x512xf32>
      %487 = arith.addf %482, %486 : vector<1x512xf32>
      %c0_229 = arith.constant 0 : index
      %c0_230 = arith.constant 0 : index
      %c126 = arith.constant 126 : index
      %488 = vector.load %arg7[%c0_229, %c0_230, %c126] : memref<2x1x768xf32, #tpu.memory_space<vmem>>, vector<1x1x512xf32>
      %489 = vector.shape_cast %488 : vector<1x1x512xf32> to vector<1x512xf32>
      %490 = vector.broadcast %191 : f32 to vector<1x512xf32>
      %491 = arith.mulf %490, %489 : vector<1x512xf32>
      %492 = arith.addf %487, %491 : vector<1x512xf32>
      %c1_231 = arith.constant 1 : index
      %c0_232 = arith.constant 0 : index
      %c126_233 = arith.constant 126 : index
      %493 = vector.load %arg7[%c1_231, %c0_232, %c126_233] : memref<2x1x768xf32, #tpu.memory_space<vmem>>, vector<1x1x512xf32>
      %494 = vector.shape_cast %493 : vector<1x1x512xf32> to vector<1x512xf32>
      %495 = vector.broadcast %240 : f32 to vector<1x512xf32>
      %496 = arith.mulf %495, %494 : vector<1x512xf32>
      %497 = arith.addf %492, %496 : vector<1x512xf32>
      %c0_234 = arith.constant 0 : index
      %c0_235 = arith.constant 0 : index
      %c127 = arith.constant 127 : index
      %498 = vector.load %arg7[%c0_234, %c0_235, %c127] : memref<2x1x768xf32, #tpu.memory_space<vmem>>, vector<1x1x512xf32>
      %499 = vector.shape_cast %498 : vector<1x1x512xf32> to vector<1x512xf32>
      %500 = vector.broadcast %192 : f32 to vector<1x512xf32>
      %501 = arith.mulf %500, %499 : vector<1x512xf32>
      %502 = arith.addf %497, %501 : vector<1x512xf32>
      %c1_236 = arith.constant 1 : index
      %c0_237 = arith.constant 0 : index
      %c127_238 = arith.constant 127 : index
      %503 = vector.load %arg7[%c1_236, %c0_237, %c127_238] : memref<2x1x768xf32, #tpu.memory_space<vmem>>, vector<1x1x512xf32>
      %504 = vector.shape_cast %503 : vector<1x1x512xf32> to vector<1x512xf32>
      %505 = vector.broadcast %241 : f32 to vector<1x512xf32>
      %506 = arith.mulf %505, %504 : vector<1x512xf32>
      %507 = arith.addf %502, %506 : vector<1x512xf32>
      %c0_239 = arith.constant 0 : index
      %c0_240 = arith.constant 0 : index
      %c128 = arith.constant 128 : index
      %508 = vector.load %arg7[%c0_239, %c0_240, %c128] : memref<2x1x768xf32, #tpu.memory_space<vmem>>, vector<1x1x512xf32>
      %509 = vector.shape_cast %508 : vector<1x1x512xf32> to vector<1x512xf32>
      %510 = vector.broadcast %193 : f32 to vector<1x512xf32>
      %511 = arith.mulf %510, %509 : vector<1x512xf32>
      %512 = arith.addf %507, %511 : vector<1x512xf32>
      %c1_241 = arith.constant 1 : index
      %c0_242 = arith.constant 0 : index
      %c128_243 = arith.constant 128 : index
      %513 = vector.load %arg7[%c1_241, %c0_242, %c128_243] : memref<2x1x768xf32, #tpu.memory_space<vmem>>, vector<1x1x512xf32>
      %514 = vector.shape_cast %513 : vector<1x1x512xf32> to vector<1x512xf32>
      %515 = vector.broadcast %242 : f32 to vector<1x512xf32>
      %516 = arith.mulf %515, %514 : vector<1x512xf32>
      %517 = arith.addf %512, %516 : vector<1x512xf32>
      %c0_244 = arith.constant 0 : index
      %c0_245 = arith.constant 0 : index
      %c129 = arith.constant 129 : index
      %518 = vector.load %arg7[%c0_244, %c0_245, %c129] : memref<2x1x768xf32, #tpu.memory_space<vmem>>, vector<1x1x512xf32>
      %519 = vector.shape_cast %518 : vector<1x1x512xf32> to vector<1x512xf32>
      %520 = vector.broadcast %194 : f32 to vector<1x512xf32>
      %521 = arith.mulf %520, %519 : vector<1x512xf32>
      %522 = arith.addf %517, %521 : vector<1x512xf32>
      %c1_246 = arith.constant 1 : index
      %c0_247 = arith.constant 0 : index
      %c129_248 = arith.constant 129 : index
      %523 = vector.load %arg7[%c1_246, %c0_247, %c129_248] : memref<2x1x768xf32, #tpu.memory_space<vmem>>, vector<1x1x512xf32>
      %524 = vector.shape_cast %523 : vector<1x1x512xf32> to vector<1x512xf32>
      %525 = vector.broadcast %243 : f32 to vector<1x512xf32>
      %526 = arith.mulf %525, %524 : vector<1x512xf32>
      %527 = arith.addf %522, %526 : vector<1x512xf32>
      %c0_249 = arith.constant 0 : index
      %c0_250 = arith.constant 0 : index
      %c130 = arith.constant 130 : index
      %528 = vector.load %arg7[%c0_249, %c0_250, %c130] : memref<2x1x768xf32, #tpu.memory_space<vmem>>, vector<1x1x512xf32>
      %529 = vector.shape_cast %528 : vector<1x1x512xf32> to vector<1x512xf32>
      %530 = vector.broadcast %195 : f32 to vector<1x512xf32>
      %531 = arith.mulf %530, %529 : vector<1x512xf32>
      %532 = arith.addf %527, %531 : vector<1x512xf32>
      %c1_251 = arith.constant 1 : index
      %c0_252 = arith.constant 0 : index
      %c130_253 = arith.constant 130 : index
      %533 = vector.load %arg7[%c1_251, %c0_252, %c130_253] : memref<2x1x768xf32, #tpu.memory_space<vmem>>, vector<1x1x512xf32>
      %534 = vector.shape_cast %533 : vector<1x1x512xf32> to vector<1x512xf32>
      %535 = vector.broadcast %244 : f32 to vector<1x512xf32>
      %536 = arith.mulf %535, %534 : vector<1x512xf32>
      %537 = arith.addf %532, %536 : vector<1x512xf32>
      %c0_254 = arith.constant 0 : index
      %c0_255 = arith.constant 0 : index
      %c131 = arith.constant 131 : index
      %538 = vector.load %arg7[%c0_254, %c0_255, %c131] : memref<2x1x768xf32, #tpu.memory_space<vmem>>, vector<1x1x512xf32>
      %539 = vector.shape_cast %538 : vector<1x1x512xf32> to vector<1x512xf32>
      %540 = vector.broadcast %196 : f32 to vector<1x512xf32>
      %541 = arith.mulf %540, %539 : vector<1x512xf32>
      %542 = arith.addf %537, %541 : vector<1x512xf32>
      %c1_256 = arith.constant 1 : index
      %c0_257 = arith.constant 0 : index
      %c131_258 = arith.constant 131 : index
      %543 = vector.load %arg7[%c1_256, %c0_257, %c131_258] : memref<2x1x768xf32, #tpu.memory_space<vmem>>, vector<1x1x512xf32>
      %544 = vector.shape_cast %543 : vector<1x1x512xf32> to vector<1x512xf32>
      %545 = vector.broadcast %245 : f32 to vector<1x512xf32>
      %546 = arith.mulf %545, %544 : vector<1x512xf32>
      %547 = arith.addf %542, %546 : vector<1x512xf32>
      %c0_259 = arith.constant 0 : index
      %c0_260 = arith.constant 0 : index
      %c147 = arith.constant 147 : index
      %548 = vector.load %arg7[%c0_259, %c0_260, %c147] : memref<2x1x768xf32, #tpu.memory_space<vmem>>, vector<1x1x512xf32>
      %549 = vector.shape_cast %548 : vector<1x1x512xf32> to vector<1x512xf32>
      %550 = vector.broadcast %197 : f32 to vector<1x512xf32>
      %551 = arith.mulf %550, %549 : vector<1x512xf32>
      %552 = arith.addf %547, %551 : vector<1x512xf32>
      %c1_261 = arith.constant 1 : index
      %c0_262 = arith.constant 0 : index
      %c147_263 = arith.constant 147 : index
      %553 = vector.load %arg7[%c1_261, %c0_262, %c147_263] : memref<2x1x768xf32, #tpu.memory_space<vmem>>, vector<1x1x512xf32>
      %554 = vector.shape_cast %553 : vector<1x1x512xf32> to vector<1x512xf32>
      %555 = vector.broadcast %246 : f32 to vector<1x512xf32>
      %556 = arith.mulf %555, %554 : vector<1x512xf32>
      %557 = arith.addf %552, %556 : vector<1x512xf32>
      %c0_264 = arith.constant 0 : index
      %c0_265 = arith.constant 0 : index
      %c148 = arith.constant 148 : index
      %558 = vector.load %arg7[%c0_264, %c0_265, %c148] : memref<2x1x768xf32, #tpu.memory_space<vmem>>, vector<1x1x512xf32>
      %559 = vector.shape_cast %558 : vector<1x1x512xf32> to vector<1x512xf32>
      %560 = vector.broadcast %198 : f32 to vector<1x512xf32>
      %561 = arith.mulf %560, %559 : vector<1x512xf32>
      %562 = arith.addf %557, %561 : vector<1x512xf32>
      %c1_266 = arith.constant 1 : index
      %c0_267 = arith.constant 0 : index
      %c148_268 = arith.constant 148 : index
      %563 = vector.load %arg7[%c1_266, %c0_267, %c148_268] : memref<2x1x768xf32, #tpu.memory_space<vmem>>, vector<1x1x512xf32>
      %564 = vector.shape_cast %563 : vector<1x1x512xf32> to vector<1x512xf32>
      %565 = vector.broadcast %247 : f32 to vector<1x512xf32>
      %566 = arith.mulf %565, %564 : vector<1x512xf32>
      %567 = arith.addf %562, %566 : vector<1x512xf32>
      %c0_269 = arith.constant 0 : index
      %c0_270 = arith.constant 0 : index
      %c149 = arith.constant 149 : index
      %568 = vector.load %arg7[%c0_269, %c0_270, %c149] : memref<2x1x768xf32, #tpu.memory_space<vmem>>, vector<1x1x512xf32>
      %569 = vector.shape_cast %568 : vector<1x1x512xf32> to vector<1x512xf32>
      %570 = vector.broadcast %199 : f32 to vector<1x512xf32>
      %571 = arith.mulf %570, %569 : vector<1x512xf32>
      %572 = arith.addf %567, %571 : vector<1x512xf32>
      %c1_271 = arith.constant 1 : index
      %c0_272 = arith.constant 0 : index
      %c149_273 = arith.constant 149 : index
      %573 = vector.load %arg7[%c1_271, %c0_272, %c149_273] : memref<2x1x768xf32, #tpu.memory_space<vmem>>, vector<1x1x512xf32>
      %574 = vector.shape_cast %573 : vector<1x1x512xf32> to vector<1x512xf32>
      %575 = vector.broadcast %248 : f32 to vector<1x512xf32>
      %576 = arith.mulf %575, %574 : vector<1x512xf32>
      %577 = arith.addf %572, %576 : vector<1x512xf32>
      %c0_274 = arith.constant 0 : index
      %c0_275 = arith.constant 0 : index
      %c150 = arith.constant 150 : index
      %578 = vector.load %arg7[%c0_274, %c0_275, %c150] : memref<2x1x768xf32, #tpu.memory_space<vmem>>, vector<1x1x512xf32>
      %579 = vector.shape_cast %578 : vector<1x1x512xf32> to vector<1x512xf32>
      %580 = vector.broadcast %200 : f32 to vector<1x512xf32>
      %581 = arith.mulf %580, %579 : vector<1x512xf32>
      %582 = arith.addf %577, %581 : vector<1x512xf32>
      %c1_276 = arith.constant 1 : index
      %c0_277 = arith.constant 0 : index
      %c150_278 = arith.constant 150 : index
      %583 = vector.load %arg7[%c1_276, %c0_277, %c150_278] : memref<2x1x768xf32, #tpu.memory_space<vmem>>, vector<1x1x512xf32>
      %584 = vector.shape_cast %583 : vector<1x1x512xf32> to vector<1x512xf32>
      %585 = vector.broadcast %249 : f32 to vector<1x512xf32>
      %586 = arith.mulf %585, %584 : vector<1x512xf32>
      %587 = arith.addf %582, %586 : vector<1x512xf32>
      %c0_279 = arith.constant 0 : index
      %c0_280 = arith.constant 0 : index
      %c151 = arith.constant 151 : index
      %588 = vector.load %arg7[%c0_279, %c0_280, %c151] : memref<2x1x768xf32, #tpu.memory_space<vmem>>, vector<1x1x512xf32>
      %589 = vector.shape_cast %588 : vector<1x1x512xf32> to vector<1x512xf32>
      %590 = vector.broadcast %201 : f32 to vector<1x512xf32>
      %591 = arith.mulf %590, %589 : vector<1x512xf32>
      %592 = arith.addf %587, %591 : vector<1x512xf32>
      %c1_281 = arith.constant 1 : index
      %c0_282 = arith.constant 0 : index
      %c151_283 = arith.constant 151 : index
      %593 = vector.load %arg7[%c1_281, %c0_282, %c151_283] : memref<2x1x768xf32, #tpu.memory_space<vmem>>, vector<1x1x512xf32>
      %594 = vector.shape_cast %593 : vector<1x1x512xf32> to vector<1x512xf32>
      %595 = vector.broadcast %250 : f32 to vector<1x512xf32>
      %596 = arith.mulf %595, %594 : vector<1x512xf32>
      %597 = arith.addf %592, %596 : vector<1x512xf32>
      %c0_284 = arith.constant 0 : index
      %c0_285 = arith.constant 0 : index
      %c152 = arith.constant 152 : index
      %598 = vector.load %arg7[%c0_284, %c0_285, %c152] : memref<2x1x768xf32, #tpu.memory_space<vmem>>, vector<1x1x512xf32>
      %599 = vector.shape_cast %598 : vector<1x1x512xf32> to vector<1x512xf32>
      %600 = vector.broadcast %202 : f32 to vector<1x512xf32>
      %601 = arith.mulf %600, %599 : vector<1x512xf32>
      %602 = arith.addf %597, %601 : vector<1x512xf32>
      %c1_286 = arith.constant 1 : index
      %c0_287 = arith.constant 0 : index
      %c152_288 = arith.constant 152 : index
      %603 = vector.load %arg7[%c1_286, %c0_287, %c152_288] : memref<2x1x768xf32, #tpu.memory_space<vmem>>, vector<1x1x512xf32>
      %604 = vector.shape_cast %603 : vector<1x1x512xf32> to vector<1x512xf32>
      %605 = vector.broadcast %251 : f32 to vector<1x512xf32>
      %606 = arith.mulf %605, %604 : vector<1x512xf32>
      %607 = arith.addf %602, %606 : vector<1x512xf32>
      %c0_289 = arith.constant 0 : index
      %c0_290 = arith.constant 0 : index
      %c153 = arith.constant 153 : index
      %608 = vector.load %arg7[%c0_289, %c0_290, %c153] : memref<2x1x768xf32, #tpu.memory_space<vmem>>, vector<1x1x512xf32>
      %609 = vector.shape_cast %608 : vector<1x1x512xf32> to vector<1x512xf32>
      %610 = vector.broadcast %203 : f32 to vector<1x512xf32>
      %611 = arith.mulf %610, %609 : vector<1x512xf32>
      %612 = arith.addf %607, %611 : vector<1x512xf32>
      %c1_291 = arith.constant 1 : index
      %c0_292 = arith.constant 0 : index
      %c153_293 = arith.constant 153 : index
      %613 = vector.load %arg7[%c1_291, %c0_292, %c153_293] : memref<2x1x768xf32, #tpu.memory_space<vmem>>, vector<1x1x512xf32>
      %614 = vector.shape_cast %613 : vector<1x1x512xf32> to vector<1x512xf32>
      %615 = vector.broadcast %252 : f32 to vector<1x512xf32>
      %616 = arith.mulf %615, %614 : vector<1x512xf32>
      %617 = arith.addf %612, %616 : vector<1x512xf32>
      %c0_294 = arith.constant 0 : index
      %c0_295 = arith.constant 0 : index
      %c169 = arith.constant 169 : index
      %618 = vector.load %arg7[%c0_294, %c0_295, %c169] : memref<2x1x768xf32, #tpu.memory_space<vmem>>, vector<1x1x512xf32>
      %619 = vector.shape_cast %618 : vector<1x1x512xf32> to vector<1x512xf32>
      %620 = vector.broadcast %204 : f32 to vector<1x512xf32>
      %621 = arith.mulf %620, %619 : vector<1x512xf32>
      %622 = arith.addf %617, %621 : vector<1x512xf32>
      %c1_296 = arith.constant 1 : index
      %c0_297 = arith.constant 0 : index
      %c169_298 = arith.constant 169 : index
      %623 = vector.load %arg7[%c1_296, %c0_297, %c169_298] : memref<2x1x768xf32, #tpu.memory_space<vmem>>, vector<1x1x512xf32>
      %624 = vector.shape_cast %623 : vector<1x1x512xf32> to vector<1x512xf32>
      %625 = vector.broadcast %253 : f32 to vector<1x512xf32>
      %626 = arith.mulf %625, %624 : vector<1x512xf32>
      %627 = arith.addf %622, %626 : vector<1x512xf32>
      %c0_299 = arith.constant 0 : index
      %c0_300 = arith.constant 0 : index
      %c170 = arith.constant 170 : index
      %628 = vector.load %arg7[%c0_299, %c0_300, %c170] : memref<2x1x768xf32, #tpu.memory_space<vmem>>, vector<1x1x512xf32>
      %629 = vector.shape_cast %628 : vector<1x1x512xf32> to vector<1x512xf32>
      %630 = vector.broadcast %205 : f32 to vector<1x512xf32>
      %631 = arith.mulf %630, %629 : vector<1x512xf32>
      %632 = arith.addf %627, %631 : vector<1x512xf32>
      %c1_301 = arith.constant 1 : index
      %c0_302 = arith.constant 0 : index
      %c170_303 = arith.constant 170 : index
      %633 = vector.load %arg7[%c1_301, %c0_302, %c170_303] : memref<2x1x768xf32, #tpu.memory_space<vmem>>, vector<1x1x512xf32>
      %634 = vector.shape_cast %633 : vector<1x1x512xf32> to vector<1x512xf32>
      %635 = vector.broadcast %254 : f32 to vector<1x512xf32>
      %636 = arith.mulf %635, %634 : vector<1x512xf32>
      %637 = arith.addf %632, %636 : vector<1x512xf32>
      %c0_304 = arith.constant 0 : index
      %c0_305 = arith.constant 0 : index
      %c171 = arith.constant 171 : index
      %638 = vector.load %arg7[%c0_304, %c0_305, %c171] : memref<2x1x768xf32, #tpu.memory_space<vmem>>, vector<1x1x512xf32>
      %639 = vector.shape_cast %638 : vector<1x1x512xf32> to vector<1x512xf32>
      %640 = vector.broadcast %206 : f32 to vector<1x512xf32>
      %641 = arith.mulf %640, %639 : vector<1x512xf32>
      %642 = arith.addf %637, %641 : vector<1x512xf32>
      %c1_306 = arith.constant 1 : index
      %c0_307 = arith.constant 0 : index
      %c171_308 = arith.constant 171 : index
      %643 = vector.load %arg7[%c1_306, %c0_307, %c171_308] : memref<2x1x768xf32, #tpu.memory_space<vmem>>, vector<1x1x512xf32>
      %644 = vector.shape_cast %643 : vector<1x1x512xf32> to vector<1x512xf32>
      %645 = vector.broadcast %255 : f32 to vector<1x512xf32>
      %646 = arith.mulf %645, %644 : vector<1x512xf32>
      %647 = arith.addf %642, %646 : vector<1x512xf32>
      %c0_309 = arith.constant 0 : index
      %c0_310 = arith.constant 0 : index
      %c172 = arith.constant 172 : index
      %648 = vector.load %arg7[%c0_309, %c0_310, %c172] : memref<2x1x768xf32, #tpu.memory_space<vmem>>, vector<1x1x512xf32>
      %649 = vector.shape_cast %648 : vector<1x1x512xf32> to vector<1x512xf32>
      %650 = vector.broadcast %207 : f32 to vector<1x512xf32>
      %651 = arith.mulf %650, %649 : vector<1x512xf32>
      %652 = arith.addf %647, %651 : vector<1x512xf32>
      %c1_311 = arith.constant 1 : index
      %c0_312 = arith.constant 0 : index
      %c172_313 = arith.constant 172 : index
      %653 = vector.load %arg7[%c1_311, %c0_312, %c172_313] : memref<2x1x768xf32, #tpu.memory_space<vmem>>, vector<1x1x512xf32>
      %654 = vector.shape_cast %653 : vector<1x1x512xf32> to vector<1x512xf32>
      %655 = vector.broadcast %256 : f32 to vector<1x512xf32>
      %656 = arith.mulf %655, %654 : vector<1x512xf32>
      %657 = arith.addf %652, %656 : vector<1x512xf32>
      %c0_314 = arith.constant 0 : index
      %c0_315 = arith.constant 0 : index
      %c173 = arith.constant 173 : index
      %658 = vector.load %arg7[%c0_314, %c0_315, %c173] : memref<2x1x768xf32, #tpu.memory_space<vmem>>, vector<1x1x512xf32>
      %659 = vector.shape_cast %658 : vector<1x1x512xf32> to vector<1x512xf32>
      %660 = vector.broadcast %208 : f32 to vector<1x512xf32>
      %661 = arith.mulf %660, %659 : vector<1x512xf32>
      %662 = arith.addf %657, %661 : vector<1x512xf32>
      %c1_316 = arith.constant 1 : index
      %c0_317 = arith.constant 0 : index
      %c173_318 = arith.constant 173 : index
      %663 = vector.load %arg7[%c1_316, %c0_317, %c173_318] : memref<2x1x768xf32, #tpu.memory_space<vmem>>, vector<1x1x512xf32>
      %664 = vector.shape_cast %663 : vector<1x1x512xf32> to vector<1x512xf32>
      %665 = vector.broadcast %257 : f32 to vector<1x512xf32>
      %666 = arith.mulf %665, %664 : vector<1x512xf32>
      %667 = arith.addf %662, %666 : vector<1x512xf32>
      %c0_319 = arith.constant 0 : index
      %c0_320 = arith.constant 0 : index
      %c174 = arith.constant 174 : index
      %668 = vector.load %arg7[%c0_319, %c0_320, %c174] : memref<2x1x768xf32, #tpu.memory_space<vmem>>, vector<1x1x512xf32>
      %669 = vector.shape_cast %668 : vector<1x1x512xf32> to vector<1x512xf32>
      %670 = vector.broadcast %209 : f32 to vector<1x512xf32>
      %671 = arith.mulf %670, %669 : vector<1x512xf32>
      %672 = arith.addf %667, %671 : vector<1x512xf32>
      %c1_321 = arith.constant 1 : index
      %c0_322 = arith.constant 0 : index
      %c174_323 = arith.constant 174 : index
      %673 = vector.load %arg7[%c1_321, %c0_322, %c174_323] : memref<2x1x768xf32, #tpu.memory_space<vmem>>, vector<1x1x512xf32>
      %674 = vector.shape_cast %673 : vector<1x1x512xf32> to vector<1x512xf32>
      %675 = vector.broadcast %258 : f32 to vector<1x512xf32>
      %676 = arith.mulf %675, %674 : vector<1x512xf32>
      %677 = arith.addf %672, %676 : vector<1x512xf32>
      %c0_324 = arith.constant 0 : index
      %c0_325 = arith.constant 0 : index
      %c175 = arith.constant 175 : index
      %678 = vector.load %arg7[%c0_324, %c0_325, %c175] : memref<2x1x768xf32, #tpu.memory_space<vmem>>, vector<1x1x512xf32>
      %679 = vector.shape_cast %678 : vector<1x1x512xf32> to vector<1x512xf32>
      %680 = vector.broadcast %210 : f32 to vector<1x512xf32>
      %681 = arith.mulf %680, %679 : vector<1x512xf32>
      %682 = arith.addf %677, %681 : vector<1x512xf32>
      %c1_326 = arith.constant 1 : index
      %c0_327 = arith.constant 0 : index
      %c175_328 = arith.constant 175 : index
      %683 = vector.load %arg7[%c1_326, %c0_327, %c175_328] : memref<2x1x768xf32, #tpu.memory_space<vmem>>, vector<1x1x512xf32>
      %684 = vector.shape_cast %683 : vector<1x1x512xf32> to vector<1x512xf32>
      %685 = vector.broadcast %259 : f32 to vector<1x512xf32>
      %686 = arith.mulf %685, %684 : vector<1x512xf32>
      %687 = arith.addf %682, %686 : vector<1x512xf32>
      %c0_329 = arith.constant 0 : index
      %c0_330 = arith.constant 0 : index
      %c191 = arith.constant 191 : index
      %688 = vector.load %arg7[%c0_329, %c0_330, %c191] : memref<2x1x768xf32, #tpu.memory_space<vmem>>, vector<1x1x512xf32>
      %689 = vector.shape_cast %688 : vector<1x1x512xf32> to vector<1x512xf32>
      %690 = vector.broadcast %211 : f32 to vector<1x512xf32>
      %691 = arith.mulf %690, %689 : vector<1x512xf32>
      %692 = arith.addf %687, %691 : vector<1x512xf32>
      %c1_331 = arith.constant 1 : index
      %c0_332 = arith.constant 0 : index
      %c191_333 = arith.constant 191 : index
      %693 = vector.load %arg7[%c1_331, %c0_332, %c191_333] : memref<2x1x768xf32, #tpu.memory_space<vmem>>, vector<1x1x512xf32>
      %694 = vector.shape_cast %693 : vector<1x1x512xf32> to vector<1x512xf32>
      %695 = vector.broadcast %260 : f32 to vector<1x512xf32>
      %696 = arith.mulf %695, %694 : vector<1x512xf32>
      %697 = arith.addf %692, %696 : vector<1x512xf32>
      %c0_334 = arith.constant 0 : index
      %c0_335 = arith.constant 0 : index
      %c192 = arith.constant 192 : index
      %698 = vector.load %arg7[%c0_334, %c0_335, %c192] : memref<2x1x768xf32, #tpu.memory_space<vmem>>, vector<1x1x512xf32>
      %699 = vector.shape_cast %698 : vector<1x1x512xf32> to vector<1x512xf32>
      %700 = vector.broadcast %212 : f32 to vector<1x512xf32>
      %701 = arith.mulf %700, %699 : vector<1x512xf32>
      %702 = arith.addf %697, %701 : vector<1x512xf32>
      %c1_336 = arith.constant 1 : index
      %c0_337 = arith.constant 0 : index
      %c192_338 = arith.constant 192 : index
      %703 = vector.load %arg7[%c1_336, %c0_337, %c192_338] : memref<2x1x768xf32, #tpu.memory_space<vmem>>, vector<1x1x512xf32>
      %704 = vector.shape_cast %703 : vector<1x1x512xf32> to vector<1x512xf32>
      %705 = vector.broadcast %261 : f32 to vector<1x512xf32>
      %706 = arith.mulf %705, %704 : vector<1x512xf32>
      %707 = arith.addf %702, %706 : vector<1x512xf32>
      %c0_339 = arith.constant 0 : index
      %c0_340 = arith.constant 0 : index
      %c193 = arith.constant 193 : index
      %708 = vector.load %arg7[%c0_339, %c0_340, %c193] : memref<2x1x768xf32, #tpu.memory_space<vmem>>, vector<1x1x512xf32>
      %709 = vector.shape_cast %708 : vector<1x1x512xf32> to vector<1x512xf32>
      %710 = vector.broadcast %213 : f32 to vector<1x512xf32>
      %711 = arith.mulf %710, %709 : vector<1x512xf32>
      %712 = arith.addf %707, %711 : vector<1x512xf32>
      %c1_341 = arith.constant 1 : index
      %c0_342 = arith.constant 0 : index
      %c193_343 = arith.constant 193 : index
      %713 = vector.load %arg7[%c1_341, %c0_342, %c193_343] : memref<2x1x768xf32, #tpu.memory_space<vmem>>, vector<1x1x512xf32>
      %714 = vector.shape_cast %713 : vector<1x1x512xf32> to vector<1x512xf32>
      %715 = vector.broadcast %262 : f32 to vector<1x512xf32>
      %716 = arith.mulf %715, %714 : vector<1x512xf32>
      %717 = arith.addf %712, %716 : vector<1x512xf32>
      %c0_344 = arith.constant 0 : index
      %c0_345 = arith.constant 0 : index
      %c194 = arith.constant 194 : index
      %718 = vector.load %arg7[%c0_344, %c0_345, %c194] : memref<2x1x768xf32, #tpu.memory_space<vmem>>, vector<1x1x512xf32>
      %719 = vector.shape_cast %718 : vector<1x1x512xf32> to vector<1x512xf32>
      %720 = vector.broadcast %214 : f32 to vector<1x512xf32>
      %721 = arith.mulf %720, %719 : vector<1x512xf32>
      %722 = arith.addf %717, %721 : vector<1x512xf32>
      %c1_346 = arith.constant 1 : index
      %c0_347 = arith.constant 0 : index
      %c194_348 = arith.constant 194 : index
      %723 = vector.load %arg7[%c1_346, %c0_347, %c194_348] : memref<2x1x768xf32, #tpu.memory_space<vmem>>, vector<1x1x512xf32>
      %724 = vector.shape_cast %723 : vector<1x1x512xf32> to vector<1x512xf32>
      %725 = vector.broadcast %263 : f32 to vector<1x512xf32>
      %726 = arith.mulf %725, %724 : vector<1x512xf32>
      %727 = arith.addf %722, %726 : vector<1x512xf32>
      %c0_349 = arith.constant 0 : index
      %c0_350 = arith.constant 0 : index
      %c195 = arith.constant 195 : index
      %728 = vector.load %arg7[%c0_349, %c0_350, %c195] : memref<2x1x768xf32, #tpu.memory_space<vmem>>, vector<1x1x512xf32>
      %729 = vector.shape_cast %728 : vector<1x1x512xf32> to vector<1x512xf32>
      %730 = vector.broadcast %215 : f32 to vector<1x512xf32>
      %731 = arith.mulf %730, %729 : vector<1x512xf32>
      %732 = arith.addf %727, %731 : vector<1x512xf32>
      %c1_351 = arith.constant 1 : index
      %c0_352 = arith.constant 0 : index
      %c195_353 = arith.constant 195 : index
      %733 = vector.load %arg7[%c1_351, %c0_352, %c195_353] : memref<2x1x768xf32, #tpu.memory_space<vmem>>, vector<1x1x512xf32>
      %734 = vector.shape_cast %733 : vector<1x1x512xf32> to vector<1x512xf32>
      %735 = vector.broadcast %264 : f32 to vector<1x512xf32>
      %736 = arith.mulf %735, %734 : vector<1x512xf32>
      %737 = arith.addf %732, %736 : vector<1x512xf32>
      %c0_354 = arith.constant 0 : index
      %c0_355 = arith.constant 0 : index
      %c196 = arith.constant 196 : index
      %738 = vector.load %arg7[%c0_354, %c0_355, %c196] : memref<2x1x768xf32, #tpu.memory_space<vmem>>, vector<1x1x512xf32>
      %739 = vector.shape_cast %738 : vector<1x1x512xf32> to vector<1x512xf32>
      %740 = vector.broadcast %216 : f32 to vector<1x512xf32>
      %741 = arith.mulf %740, %739 : vector<1x512xf32>
      %742 = arith.addf %737, %741 : vector<1x512xf32>
      %c1_356 = arith.constant 1 : index
      %c0_357 = arith.constant 0 : index
      %c196_358 = arith.constant 196 : index
      %743 = vector.load %arg7[%c1_356, %c0_357, %c196_358] : memref<2x1x768xf32, #tpu.memory_space<vmem>>, vector<1x1x512xf32>
      %744 = vector.shape_cast %743 : vector<1x1x512xf32> to vector<1x512xf32>
      %745 = vector.broadcast %265 : f32 to vector<1x512xf32>
      %746 = arith.mulf %745, %744 : vector<1x512xf32>
      %747 = arith.addf %742, %746 : vector<1x512xf32>
      %c0_359 = arith.constant 0 : index
      %c0_360 = arith.constant 0 : index
      %c197_361 = arith.constant 197 : index
      %748 = vector.load %arg7[%c0_359, %c0_360, %c197_361] : memref<2x1x768xf32, #tpu.memory_space<vmem>>, vector<1x1x512xf32>
      %749 = vector.shape_cast %748 : vector<1x1x512xf32> to vector<1x512xf32>
      %750 = vector.broadcast %217 : f32 to vector<1x512xf32>
      %751 = arith.mulf %750, %749 : vector<1x512xf32>
      %752 = arith.addf %747, %751 : vector<1x512xf32>
      %c1_362 = arith.constant 1 : index
      %c0_363 = arith.constant 0 : index
      %c197_364 = arith.constant 197 : index
      %753 = vector.load %arg7[%c1_362, %c0_363, %c197_364] : memref<2x1x768xf32, #tpu.memory_space<vmem>>, vector<1x1x512xf32>
      %754 = vector.shape_cast %753 : vector<1x1x512xf32> to vector<1x512xf32>
      %755 = vector.broadcast %266 : f32 to vector<1x512xf32>
      %756 = arith.mulf %755, %754 : vector<1x512xf32>
      %757 = arith.addf %752, %756 : vector<1x512xf32>
      %758 = arith.negf %757 : vector<1x512xf32>
      %759 = math.exp %758 : vector<1x512xf32>
      %cst_365 = arith.constant 1.000000e+00 : f32
      %760 = vector.broadcast %cst_365 : f32 to vector<1x512xf32>
      %761 = arith.addf %760, %759 : vector<1x512xf32>
      %762 = arith.divf %760, %761 : vector<1x512xf32>
      %c0_366 = arith.constant 0 : index
      %c0_367 = arith.constant 0 : index
      %c0_368 = arith.constant 0 : index
      %763 = vector.load %arg4[%c0_366, %c0_367, %c0_368] : memref<1x1x512xf32, #tpu.memory_space<vmem>>, vector<1x1x512xf32>
      %764 = vector.shape_cast %763 : vector<1x1x512xf32> to vector<1x512xf32>
      %765 = vector.shape_cast %762 : vector<1x512xf32> to vector<1x1x512xf32>
      tpu.vector_store %arg4[%c0_366, %c0_367, %c0_368], %765 {strides = array<i32>} : memref<1x1x512xf32, #tpu.memory_space<vmem>>, vector<1x1x512xf32>,
    } else {
    }
    return
  }
  func.func @transform_0(%arg0: i32, %arg1: i32) -> (i32, i32, i32) {
    %c0_i32 = arith.constant 0 : i32
    %c0_i32_0 = arith.constant 0 : i32
    return %arg0, %arg1, %c0_i32 : i32, i32, i32
  }
  func.func @transform_1(%arg0: i32, %arg1: i32) -> i32 {
    %c0_i32 = arith.constant 0 : i32
    %c0_i32_0 = arith.constant 0 : i32
    return %c0_i32 : i32
  }
  func.func @transform_2(%arg0: i32, %arg1: i32) -> (i32, i32, i32) {
    %c0_i32 = arith.constant 0 : i32
    %c0_i32_0 = arith.constant 0 : i32
    %c0_i32_1 = arith.constant 0 : i32
    return %arg0, %c0_i32, %c0_i32_0 : i32, i32, i32
  }
}

</mosaic_0001>

<bundles_post_ra>
// kernel: tpu_custom_call.1
= control target key start
LH: loop header
LB: loop body
LE: loop exit
PB: predicated region body
PF: predicated region fallthrough
CT: control target
= control target key end

     0   :  { %7 = vsyncpa [#allocation6], 0  ;;  %s2950_s0 = inlined_call_operand.hbm [shape: f32[2,4,256], index: 0, kind: input, shape index: {}]   ;;  %s2951_s1 = inlined_call_operand.vmem [shape: f32[98], index: 1, kind: input, shape index: {}]   ;;  %s2952_s2 = inlined_call_operand.hbm [shape: f32[2,1,512], index: 2, kind: output, shape index: {}]  }
   0x1   :  { %9 = vsyncpa [#allocation6 + $0x1], 0 }
   0x2   :  { %10 = vsyncpa [#allocation8], 0 }
   0x3   :  { %11 = vsyncpa [#allocation7], 0 }
   0x4   :  { %13 = vsyncpa [#allocation7 + $0x1], 0  ;;  %s2132_s9 = smov 0   ;;  %s2134_s10 = smov 0  }
   0x5   :  { %s2136_s11 = smov 0   ;;  %s2138_s12 = smov 0  }
   0x6   :  { %s2140_s13 = smov 0   ;;  %s2142_s14 = smov 0  }
   0x7 LB: > { %s1674_s15 = sadd.s32 4294967295, %s2051_s14   ;;  %s1675_s16 = sadd.s32 4294967294, %s2051_s14   ;;  %s2051_s14 = sphi %s2142_s14, %s19_s14   ;;  %s2047_s13 = sphi %s2140_s13, %s3044_s13   ;;  %s2043_s12 = sphi %s2138_s12, %s3043_s12   ;;  %s2039_s11 = sphi %s2136_s11, %s3042_s11   ;;  %s2035_s10 = sphi %s2134_s10, %s3041_s10   ;;  %s2031_s9 = sphi %s2132_s9, %s3040_s9  }
   0x8   : > { %s31_s17 = sadd.s32 1, %s2047_s13  ;;  %s40_s18 = sadd.s32 1, %s2039_s11 }
   0x9   : > { %p33_p0 = scmp.ge.s32.totalorder %s31_s17, 2  ;;  %p47_p1 = scmp.ne.s32.totalorder %s2039_s11, %s2035_s10 }
   0xa   : > { %p48_p2 = scmp.eq.s32.totalorder %s2051_s14, 0  ;;  %p53_p3 = scmp.ne.s32.totalorder %s2035_s10, %s2031_s9 }
   0xb   : > { %s3046_s17 = smov (%p33_p0, %s31_s17), 0  ;;  %p2177_p5 = scmp.eq.s32.totalorder %s1674_s15, 0 }
   0xc   : > { %p2173_p4 = por %p48_p2, %p47_p1  ;;  %s35_s21 = ssub.s32 %s2047_s13, %s3046_s17 }
   0xd   : > { %p98_p6 = scmp.eq.s32.totalorder %s1674_s15, 1  ;;  %p38_p7 = scmp.eq.s32.totalorder %s35_s21, 0 }
   0xe   : > { %p2185_p8 = por %p2177_p5, %p53_p3  ;;  %p104_p10 = scmp.eq.s32.totalorder %s1675_s16, 1 }
   0xf   : > { %p2189_p9 = por %p98_p6, %p47_p1  ;;  %p1676_p12 = scmp.ge.s32.totalorder %s2051_s14, 1 }
  0x10   : > { %s2964_s22 = scalar_select %p2185_p8, 1, 0 }
  0x11   : > { %s2965_s23 = scalar_select %p2189_p9, 1, 0 }
  0x12   : > { %s2194_s24 = scalar_select %p38_p7, %s2039_s11, %s40_s18  }
  0x13   : > { %p2196_p11 = por %p104_p10, %p53_p3  ;;  %p111_p13 = scmp.lt.s32.totalorder %s2051_s14, 3 }
  0x14   : > { %s124_s29 = sshll.u32 %s2951_s1, 4  ;;  %s125_s29 = int_to_ptr.vmem [resolvable:$true] %s124_s29 }
  0x15   : > { %s2966_s25 = scalar_select %p2196_p11, 1, 0 }
  0x16   : > { %p2202_p0 = pnand %p1676_p12, %p111_p13  ;;  %s1926_s30 = scalar_lea.vmem %s125_s29, 16 }
  0x17   : > { %p1927_p3 = scmp.ne.s32.totalorder %s125_s29, %s1926_s30  ;;  %p1934_p11 = scmp.lt.s32.totalorder %s125_s29, %s125_s29 }
  0x18   : > { %p1798_p1 = pneg %p2202_p0  ;;  %p1935_p12 = scmp.lt.s32.totalorder %s1926_s30, %s1926_s30 }
  0x1a   : > { %p1799_p2 = pnand %p1798_p1, %p2177_p5  ;;  %p1936_p13 = por %p1935_p12, %p1934_p11 }
  0x1c   : > { %p1928_p6 = pneg %p1799_p2 }
  0x1e   : > { %p1929_p7 = pnand %p1928_p6, %p1927_p3 }
  0x20   : > { %p1930_p10 = pneg %p1929_p7 }
  0x22   : > { %p1937_p9 = pnand %p1936_p13, %p1930_p10 }
  0x24   : > { %1940 = shalt.err (!%p1937_p9)
}
  0x25   : > { %s2053_s3 = smov [#allocation9]   ;;  %p2955_p8 = scmp.ge.s32.totalorder %s2051_s14, 2 }
  0x26   : > { %1801 = dma.vmem_to_smem (!%p1799_p2), %s125_s29, 16, %s2053_s3, [#allocation8]  }
  0x27   : > { %131 = sbr.rel (%p2955_p8) target bundleno = 77 (0x4d), region = 20 }
  0x2e   : > { %134 = sbr.rel (!%p2173_p4) target bundleno = 77 (0x4d), region = 24  ;;  %s135_s4 = sand.u32 (%p2173_p4), 1, %s2039_s11  }
  0x2f   : > { %s1679_s5 = sshll.u32 (%p2173_p4), %s135_s4, 4  ;;  %s2219_s6 = scalar_lea.sflag (%p2173_p4), [#allocation6], %s135_s4 }
  0x30   : > { %s139_s7 = scalar_lea.vmem (%p2173_p4), [#allocation5], %s1679_s5 }
  0x35   : > { %146 = vsyncadd %s2219_s6, 128  ;;  %s1789_s8 = sshll.u32 %s2047_s13, 7  ;;  %s154_s15 = sshll.u32 %s139_s7, 4  ;;  %s155_s15 = int_to_ptr.vmem [resolvable:$true] %s154_s15 }
  0x36   : > { %s2226_s21 = scalar_lea.hbm %s2950_s0, %s1789_s8  ;;  %s1943_s29 = scalar_lea.hbm %s2950_s0, 256 }
  0x37   : > { %s1941_s19 = scalar_lea.hbm %s2226_s21, 128  ;;  %p1944_p9 = scmp.lt.u32.totalorder %s2226_s21, %s2950_s0 }
  0x38   : > { %p1942_p4 = scmp.ne.s32.totalorder %s2226_s21, %s1941_s19  ;;  %p1945_p11 = scmp.lt.u32.totalorder %s1943_s29, %s1941_s19 }
  0x39   : > { %p1947_p2 = scmp.lt.u32.totalorder %s1941_s19, %s2226_s21 }
  0x3a   : > { %p1946_p1 = por %p1945_p11, %p1944_p9 }
  0x3c   : > { %p1948_p3 = por %p1947_p2, %p1946_p1 }
  0x3e   : > { %p1949_p6 = pnand %p1948_p3, %p1942_p4 }
  0x40   : > { %1952 = shalt.err (!%p1949_p6)
}
  0x41   : > { %s1953_s4 = scalar_lea.vmem %s155_s15, 128  ;;  %s2054_s5 = smov [#allocation5]  }
  0x42   : > { %p1954_p7 = scmp.ne.s32.totalorder %s155_s15, %s1953_s4  ;;  %s1955_s7 = sshll.u32 %s2054_s5, 4  ;;  %s1956_s7 = int_to_ptr.vmem [resolvable:$false] %s1955_s7 }
  0x43   : > { %s1957_s8 = scalar_lea.vmem %s1956_s7, 512  ;;  %p1958_p10 = scmp.lt.s32.totalorder %s155_s15, %s1956_s7 }
  0x44   : > { %p1959_p12 = scmp.lt.s32.totalorder %s1957_s8, %s1953_s4 }
  0x46   : > { %p1960_p13 = por %p1959_p12, %p1958_p10 }
  0x48   : > { %p1961_p8 = pnand %p1960_p13, %p1954_p7 }
  0x4a   : > { %1964 = shalt.err (!%p1961_p8)
}
  0x4b   : > { %s2055_s16 = smov 128   ;;  %s2056_s18 = smov 8  }
  0x4c   : > { %160 = dma.hbm_to_vmem [thread:$0]  %s2226_s21, 128, %s155_s15, %s2219_s6, %s2055_s16, %s2055_s16, %s2056_s18  }
  0x4d PF: > { %166 = sbr.rel (%p2202_p0) target bundleno = 764 (0x2fc), region = 28  ;;  %s2243_s19 = sand.u32 (!%p2202_p0), 1, %s2035_s10  }
  0x4e   : > { %s1683_s27 = sshll.u32 (!%p2202_p0), %s2243_s19, 4  ;;  %s169_s28 = scalar_lea.sflag (!%p2202_p0), [#allocation6], %s2243_s19 }
  0x4f   : > { %s172_s29 = scalar_lea.vmem (!%p2202_p0), [#allocation5], %s1683_s27  ;;  %p2968_p8 = scmp.ne.s32.totalorder (!%p2202_p0), %s2964_s22, 0 }
  0x54   : > { %2018 = dma.done.wait (%p2968_p8), %s169_s28, 256  }
  0x55   : > { %2020 = vsyncadd (%p2968_p8), %s169_s28, 4294967040 }
  0x56   : > { %2022 = dma.done.wait (%p2177_p5), [#allocation8], 16  }
  0x57   : > { %2024 = vsyncadd (%p2177_p5), [#allocation8], 4294967280 }
  0x58   : > { %181 = sfence }
  0x59   : > { %v220_v0 = vlaneseq  ;;  %v1919_v1 = vld [vmem:[%s172_s29] ss:$8 sps:$4 sm:$0xff]   ;;  %v1921_v2 = vld [vmem:[%s172_s29 + $0x4] ss:$8 sps:$4 sm:$0xff]   ;;  %v2057_v4 = vmov 0.0   ;;  %s2059_s20 = smov 69  }
  0x5a   : > { %v2058_v9 = vmov 1966171168   ;;  %s2060_s22 = smov 81   ;;  %s2061_s26 = smov 87   ;;  %vm2956_vm11 = vcmask 662528  }
  0x5b   : > { %v221_v3 = vshrl.u32 %v220_v0, 7  ;;  %vm276_vm0 = vcmp.lt.s32.totalorder %v220_v0, 768  ;;  %v282_v10 = vunpack.c.l.s4 %v2058_v9  ;;  %s2062_s6 = smov 75   ;;  %s2063_s15 = smov 93   ;;  %vm2272_vm2 = vcmp.ge.s32.totalorder %v220_v0, 69 }
  0x5c   : > { %279 = vst.msk [vmem:[#allocation4 + $0x6] sm:$0x3f] %vm276_vm0, %v2057_v4  ;;  %278 = vst.msk [vmem:[#allocation4] sm:$0x3f] %vm276_vm0, %v2057_v4  ;;  %s2064_s21 = smov 99   ;;  %s2065_s30 = smov 117  }
  0x5d   : > { %vm224_vm1 = vcmp.lt.s32.totalorder %v221_v3, 4  ;;  %v283_v16 = vunpack.c.0.s8 %v282_v10  ;;  %s2066_s3 = smov 105   ;;  %s2067_s4 = smov 111   ;;  %vm2277_vm3 = vcmp.lt.s32.totalorder %v220_v0, 85  ;;  %vm2286_vm5 = vcmp.ge.s32.totalorder %v220_v0, 91 }
  0x5e   : > { %v237_v5 = vsel %vm224_vm1, %v1919_v1, -inf  ;;  %v233_v6 = vsel %vm224_vm1, %v1919_v1, 0.0  ;;  %v234_v7 = vsel %vm224_vm1, %v1921_v2, 0.0  ;;  %v238_v25 = vsel %vm224_vm1, %v1921_v2, -inf  ;;  %s2068_s5 = smov 1   ;;  %s2069_s7 = smov 123   ;;  %vm300_vm4 = vmand %vm2272_vm2, %vm2277_vm3 }
  0x5f   : > { %v262_v8 = vrot.slane %v237_v5, 4  ;;  %v248_v11 = vrot.slane %v233_v6, 4  ;;  %v254_v12 = vrot.slane %v234_v7, 4  ;;  %v286_v22 = vsub.s32 %v283_v16, %v221_v3  ;;  %s2070_s8 = smov 7   ;;  %s2071_s16 = smov 25  }
  0x60   : > { %v268_v31 = vrot.slane %v238_v25, 4  ;;  %s2072_s18 = smov 13   ;;  %s2073_s27 = smov 19   ;;  %vm2291_vm6 = vcmp.lt.s32.totalorder %v220_v0, 107  ;;  %vm2296_vm7 = vcmp.ge.s32.totalorder %v220_v0, 113  ;;  %vm2301_vm8 = vcmp.lt.s32.totalorder %v220_v0, 129 }
  0x61   : > { %v263_v13 = vmax.f32 %v237_v5, %v262_v8  ;;  %v249_v14 = vadd.f32 %v248_v11, %v233_v6  ;;  %v255_v18 = vadd.f32 %v254_v12, %v234_v7  ;;  %s2074_s28 = smov 31   ;;  %vm2311_vm9 = vcmp.ge.s32.totalorder %v220_v0, 7  ;;  %vm2957_vm12 = vmand %vm2286_vm5, %vm2291_vm6  ;;  %s1735_s29 = sld [smem:[#allocation9 + $0x32]] }
  0x62   : > { %v269_v35 = vmax.f32 %v238_v25, %v268_v31  ;;  %vm2316_vm10 = vcmp.lt.s32.totalorder %v220_v0, 23  ;;  %vm2960_vm13 = vmand %vm2296_vm7, %vm2301_vm8  ;;  %vm2329_vm14 = vcmp.ge.s32.totalorder %v220_v0, 29  ;;  %vm2334_vm15 = vcmp.lt.s32.totalorder %v220_v0, 45  ;;  %p3037_p0 = scmp.ne.s32.totalorder %s2965_s23, 0 }
  0x63   : > { %v264_v15 = vrot.slane %v263_v13, 2  ;;  %v250_v17 = vrot.slane %v249_v14, 2  ;;  %v256_v24 = vrot.slane %v255_v18, 2  ;;  %vm2958_vm0 = vmand %vm2311_vm9, %vm2316_vm10  ;;  %vm2408_vm3 = vcmp.ge.s32.totalorder %v220_v0, 73 }
  0x64   : > { %v270_v38 = vrot.slane %v269_v35, 2  ;;  %vm2959_vm1 = vmand %vm2329_vm14, %vm2334_vm15 }
  0x65   : > { %v265_v19 = vmax.f32 %v263_v13, %v264_v15  ;;  %v251_v20 = vadd.f32 %v250_v17, %v249_v14  ;;  %v257_v30 = vadd.f32 %v256_v24, %v255_v18  ;;  %vm2996_vm2 = vmand %vm2311_vm9, %vm2316_vm10  ;;  %vm2437_vm9 = vcmp.ge.s32.totalorder %v220_v0, 117 }
  0x66   : > { %v271_v40 = vmax.f32 %v269_v35, %v270_v38  ;;  %vm2442_vm10 = vcmp.lt.s32.totalorder %v220_v0, 133 }
  0x67   : > { %v266_v21 = vrot.slane %v265_v19, 1  ;;  %v252_v23 = vrot.slane %v251_v20, 1  ;;  %v258_v34 = vrot.slane %v257_v30, 1  ;;  %v648_v58 = vstv %s1735_s29  ;;  %s1690_s29 = sld [smem:[#allocation9 + $0x5]] }
  0x68   : > { %v272_v42 = vrot.slane %v271_v40, 1 }
  0x69   : > { %v267_v26 = vmax.f32 %v265_v19, %v266_v21  ;;  %v253_v27 = vadd.f32 %v252_v23, %v251_v20  ;;  %v259_v37 = vadd.f32 %v258_v34, %v257_v30 }
  0x6a   : > { %v273_v44 = vmax.f32 %v271_v40, %v272_v42 }
  0x6b   : > { %v309_v28 = vrot.slane %v267_v26, %v286_v22  ;;  %v260_v29 = vmul.f32 0.25, %v253_v27  ;;  %v261_v39 = vmul.f32 0.25, %v259_v37 }
  0x6c   : > { %v436_v45 = vrot.slane %v273_v44, %v286_v22 }
  0x6d   : > { %v316_v32 = vrot.slane %v309_v28, %v286_v22  ;;  %v287_v33 = vrot.slane %v260_v29, %v286_v22  ;;  %v411_v41 = vrot.slane %v261_v39, %v286_v22 }
  0x6e   : > { %v443_v46 = vrot.slane %v436_v45, %v286_v22 }
  0x6f   : > { %317 = vrot.lane.b32.xlu0 %v316_v32, %s2059_s20  ;;  %343 = vrot.lane.b32.xlu1 %v316_v32, %s2060_s22  ;;  %v294_v36 = vrot.slane %v287_v33, %v286_v22  ;;  %v418_v43 = vrot.slane %v411_v41, %v286_v22 }
  0x73   : > { %356 = vrot.lane.b32.xlu0 %v316_v32, %s2061_s26  ;;  %329 = vrot.lane.b32.xlu1 %v316_v32, %s2062_s6 }
  0x77   : > { %367 = vrot.lane.b32.xlu1 %v316_v32, %s2063_s15  ;;  %333 = vrot.lane.b32.xlu0 %v294_v36, %s2060_s22 }
  0x7b   : > { %378 = vrot.lane.b32.xlu1 %v316_v32, %s2064_s21  ;;  %295 = vrot.lane.b32.xlu0 %v294_v36, %s2059_s20 }
  0x7f   : > { %322 = vrot.lane.b32.xlu1 %v294_v36, %s2062_s6  ;;  %349 = vrot.lane.b32.xlu0 %v294_v36, %s2061_s26  ;;  %s1686_s26 = sld [smem:[#allocation9 + $0x1]]  ;;  %s1736_s6 = sld [smem:[#allocation9 + $0x33]] }
  0x83   : > { %360 = vrot.lane.b32.xlu1 %v294_v36, %s2063_s15  ;;  %419 = vrot.lane.b32.xlu0 %v418_v43, %s2065_s30  ;;  %s1687_s15 = sld [smem:[#allocation9 + $0x2]] }
  0x85   : > { %v638_v59 = vstv %s1686_s26  ;;  %v667_v1 = vstv %s1736_s6  ;;  %s2076_s26 = smov 126   ;;  %s1740_s6 = sld [smem:[#allocation9 + $0x37]] }
  0x87   : > { %371 = vrot.lane.b32.xlu1 %v294_v36, %s2064_s21  ;;  %382 = vrot.lane.b32.xlu0 %v294_v36, %s2066_s3  ;;  %s1737_s21 = sld [smem:[#allocation9 + $0x34]] }
  0x8b   : > { %444 = vrot.lane.b32.xlu1 %v443_v46, %s2065_s30  ;;  %393 = vrot.lane.b32.xlu0 %v294_v36, %s2067_s4  ;;  %s1688_s30 = sld [smem:[#allocation9 + $0x3]] }
  0x8f   : > { %400 = vrot.lane.b32.xlu1 %v316_v32, %s2067_s4  ;;  %389 = vrot.lane.b32.xlu0 %v316_v32, %s2066_s3  ;;  %s1738_s4 = sld [smem:[#allocation9 + $0x35]] }
  0x93   : > { %461 = vrot.lane.b32.xlu1 %v418_v43, %s2068_s5  ;;  %450 = vrot.lane.b32.xlu0 %v418_v43, %s2069_s7 }
  0x97   : > { %472 = vrot.lane.b32.xlu1 %v418_v43, %s2070_s8  ;;  %457 = vrot.lane.b32.xlu0 %v443_v46, %s2069_s7 }
  0x9b   : > { %468 = vrot.lane.b32.xlu1 %v443_v46, %s2068_s5  ;;  %505 = vrot.lane.b32.xlu0 %v418_v43, %s2071_s16  ;;  %s1689_s5 = sld [smem:[#allocation9 + $0x4]] }
  0x9f   : > { %479 = vrot.lane.b32.xlu1 %v443_v46, %s2070_s8  ;;  %483 = vrot.lane.b32.xlu0 %v418_v43, %s2072_s18  ;;  %s2075_s8 = smov 127  }
  0xa3   : > { %515 = vrot.lane.b32.xlu1 %v443_v46, %s2071_s16  ;;  %494 = vrot.lane.b32.xlu0 %v418_v43, %s2073_s27  ;;  %s532_s16 = sld [smem:[#allocation9]] }
  0xa7   : > { %501 = vrot.lane.b32.xlu1 %v443_v46, %s2073_s27  ;;  %490 = vrot.lane.b32.xlu0 %v443_v46, %s2072_s18  ;;  %s1734_s27 = sld [smem:[#allocation9 + $0x31]] }
  0xa9   : > { %v631_v13 = vstv %s532_s16  ;;  %s1743_s16 = sld [smem:[#allocation9 + $0x3a]] }
  0xab   : > { %528 = vrot.lane.b32.xlu1 %v443_v46, %s2074_s28  ;;  %521 = vrot.lane.b32.xlu0 %v418_v43, %s2074_s28  ;;  %s1739_s28 = sld [smem:[#allocation9 + $0x36]] }
  0xad   : > { %v635_v14 = vstv %s1734_s27  ;;  %s1694_s27 = sld [smem:[#allocation9 + $0x9]] }
  0xb1   : > { %v724_v15 = vstv %s1739_s28  ;;  %s2079_s28 = smov 122  }
  0xe1   : > { %v318_v51 = vpop.permute.xlu0 %317  ;;  %v344_v52 = vpop.permute.xlu1 %343 }
  0xe2   : > { %321 = vst.msk [vmem:[#allocation4 + $0x7] sm:$0x1] %vm300_vm4, %v318_v51  ;;  %v345_v55 = vrot.slane %v344_v52, 7 }
  0xe4   : > { %v346_v62 = vsel %vm2956_vm11, %v345_v55, %v344_v52  ;;  %vm2363_vm11 = vcmp.ge.s32.totalorder %v220_v0, 51 }
  0xe5   : > { %v357_v60 = vpop.permute.xlu0 %356  ;;  %v330_v61 = vpop.permute.xlu1 %329 }
  0xe6   : > { %332 = vst.msk [vmem:[#allocation4 + $0x7] sm:$0x1] %vm2957_vm12, %v330_v61  ;;  %vm2368_vm12 = vcmp.lt.s32.totalorder %v220_v0, 67 }
  0xe7   : > { %348 = vst.msk [vmem:[#allocation4 + $0x7] sm:$0x3] %vm2960_vm13, %v346_v62  ;;  %vm2994_vm13 = vmand %vm2286_vm5, %vm2291_vm6 }
  0xe8   : > { %359 = vst.msk [vmem:[#allocation4 + $0x8] sm:$0x1] %vm2958_vm0, %v357_v60  ;;  %vm2961_vm0 = vmand %vm2363_vm11, %vm2368_vm12 }
  0xe9   : > { %v368_v2 = vpop.permute.xlu1 %367  ;;  %v334_v3 = vpop.permute.xlu0 %333  ;;  %vm3001_vm5 = vmand %vm2329_vm14, %vm2334_vm15  ;;  %vm422_vm14 = vcmask 957440  }
  0xea   : > { %370 = vst.msk [vmem:[#allocation4 + $0x8] sm:$0x1] %vm2959_vm1, %v368_v2  ;;  %v335_v6 = vrot.slane %v334_v3, 7  ;;  %vm2993_vm1 = vcmask 662528   ;;  %v657_v2 = vstv %s1687_s15  ;;  %s1691_s15 = sld [smem:[#allocation9 + $0x6]] }
  0xec   : > { %v337_v9 = vsel %vm2993_vm1, %v335_v6, %v334_v3  ;;  %vm2486_vm1 = vcmp.ge.s32.totalorder %v220_v0, 33  ;;  %v676_v6 = vstv %s1688_s30  ;;  %s1692_s30 = sld [smem:[#allocation9 + $0x7]] }
  0xed   : > { %v379_v4 = vpop.permute.xlu1 %378  ;;  %v296_v5 = vpop.permute.xlu0 %295 }
  0xee   : > { %381 = vst.msk [vmem:[#allocation4 + $0x8] sm:$0x1] %vm2961_vm0, %v379_v4  ;;  %vm2995_vm0 = vmand %vm2296_vm7, %vm2301_vm8  ;;  %vm2427_vm7 = vcmp.ge.s32.totalorder %v220_v0, 95  ;;  %vm2432_vm8 = vcmp.lt.s32.totalorder %v220_v0, 111 }
  0xef   : > { %301 = vst.msk [vmem:[#allocation4 + $0x1] sm:$0x1] %vm300_vm4, %v296_v5  ;;  %vm2413_vm4 = vcmp.lt.s32.totalorder %v220_v0, 89  ;;  %vm398_vm15 = vmand %vm2427_vm7, %vm2432_vm8  ;;  %vm2544_vm8 = vcmp.ge.s32.totalorder %v220_v0, 77  ;;  %v686_v5 = vstv %s1737_s21  ;;  %s1741_s21 = sld [smem:[#allocation9 + $0x38]] }
  0xf0   : > { %vm387_vm6 = vmand %vm2408_vm3, %vm2413_vm4  ;;  %vm2520_vm4 = vcmp.ge.s32.totalorder %v220_v0, 55 }
  0xf1   : > { %v323_v7 = vpop.permute.xlu1 %322  ;;  %v350_v8 = vpop.permute.xlu0 %349 }
  0xf2   : > { %328 = vst.msk [vmem:[#allocation4 + $0x1] sm:$0x1] %vm2994_vm13, %v323_v7  ;;  %vm3010_vm13 = vmand %vm2363_vm11, %vm2368_vm12  ;;  %vm2476_vm11 = vcmp.ge.s32.totalorder %v220_v0, 11  ;;  %vm2481_vm12 = vcmp.lt.s32.totalorder %v220_v0, 27 }
  0xf3   : > { %342 = vst.msk [vmem:[#allocation4 + $0x1] sm:$0x3] %vm2995_vm0, %v337_v9  ;;  %vm427_vm0 = vmand %vm2437_vm9, %vm2442_vm10  ;;  %vm2549_vm9 = vcmp.lt.s32.totalorder %v220_v0, 93  ;;  %v705_v9 = vstv %s1738_s4  ;;  %s1742_s4 = sld [smem:[#allocation9 + $0x39]] }
  0xf4   : > { %355 = vst.msk [vmem:[#allocation4 + $0x2] sm:$0x1] %vm2996_vm2, %v350_v8  ;;  %vm2491_vm2 = vcmp.lt.s32.totalorder %v220_v0, 49  ;;  %vm488_vm10 = vmand %vm2544_vm8, %vm2549_vm9  ;;  %vm701_vm8 = vcmask 1014784   ;;  %vm720_vm9 = vcmask 1006592  }
  0xf5   : > { %v361_v10 = vpop.permute.xlu1 %360  ;;  %v420_v11 = vpop.permute.xlu0 %419  ;;  %vm466_vm3 = vmand %vm2486_vm1, %vm2491_vm2  ;;  %vm524_vm2 = vcmp.ge.s32.totalorder %v220_v0, 15  ;;  %v762_v26 = vstv %s1741_s21  ;;  %s1696_s21 = sld [smem:[#allocation9 + $0xb]] }
  0xf6   : > { %366 = vst.msk [vmem:[#allocation4 + $0x2] sm:$0x1] %vm3001_vm5, %v361_v10  ;;  %v421_v20 = vrot.slane %v420_v11, 7  ;;  %vm455_vm5 = vmand %vm2476_vm11, %vm2481_vm12  ;;  %vm508_vm11 = vcmask 203776   ;;  %v695_v10 = vstv %s1689_s5  ;;  %s1693_s5 = sld [smem:[#allocation9 + $0x8]] }
  0xf8   : > { %v423_v23 = vsel %vm422_vm14, %v421_v20, %v420_v11 }
  0xf9   : > { %v372_v16 = vpop.permute.xlu1 %371  ;;  %v383_v17 = vpop.permute.xlu0 %382  ;;  %v781_v30 = vstv %s1742_s4  ;;  %s1697_s4 = sld [smem:[#allocation9 + $0xc]] }
  0xfa   : > { %377 = vst.msk [vmem:[#allocation4 + $0x2] sm:$0x1] %vm3010_vm13, %v372_v16  ;;  %vm2563_vm13 = vcmp.ge.s32.totalorder %v220_v0, 99  ;;  %v714_v16 = vstv %s1690_s29  ;;  %s1744_s29 = sld [smem:[#allocation9 + $0x3b]] }
  0xfb   : > { %388 = vst.msk [vmem:[#allocation4 + $0x2] sm:$0x1] %vm387_vm6, %v383_v17  ;;  %v828_v43 = vstv %s1696_s21  ;;  %s1700_s21 = sld [smem:[#allocation9 + $0xf]] }
  0xfd   : > { %v445_v21 = vpop.permute.xlu1 %444  ;;  %v394_v22 = vpop.permute.xlu0 %393 }
  0xfe   : > { %399 = vst.msk [vmem:[#allocation4 + $0x2] sm:$0x1] %vm398_vm15, %v394_v22  ;;  %v446_v24 = vrot.slane %v445_v21, 7  ;;  %v733_v22 = vstv %s1691_s15  ;;  %s2080_s15 = smov 106  }
  0xff   : > { %428 = vst.msk [vmem:[#allocation4 + $0x2] sm:$0x3] %vm427_vm0, %v423_v23  ;;  %v847_v47 = vstv %s1697_s4  ;;  %s1701_s4 = sld [smem:[#allocation9 + $0x10]] }
 0x100   : > { %v447_v31 = vsel %vm422_vm14, %v446_v24, %v445_v21  ;;  %vm2568_vm14 = vcmp.lt.s32.totalorder %v220_v0, 115  ;;  %v743_v21 = vstv %s1740_s6  ;;  %s1695_s6 = sld [smem:[#allocation9 + $0xa]]  ;;  %v819_v38 = vstv %s1744_s29  ;;  %s1748_s29 = sld [smem:[#allocation9 + $0x3f]] }
 0x101   : > { %v401_v27 = vpop.permute.xlu1 %400  ;;  %v390_v28 = vpop.permute.xlu0 %389  ;;  %vm499_vm12 = vmand %vm2563_vm13, %vm2568_vm14  ;;  %vm758_vm13 = vcmask 867328   ;;  %vm777_vm14 = vcmask 859136  }
 0x102   : > { %392 = vst.msk [vmem:[#allocation4 + $0x8] sm:$0x1] %vm387_vm6, %v390_v28  ;;  %vm2525_vm6 = vcmp.lt.s32.totalorder %v220_v0, 71 }
 0x103   : > { %403 = vst.msk [vmem:[#allocation4 + $0x8] sm:$0x1] %vm398_vm15, %v401_v27  ;;  %vm477_vm7 = vmand %vm2520_vm4, %vm2525_vm6  ;;  %vm2573_vm15 = vcmp.ge.s32.totalorder %v220_v0, 121  ;;  %v752_v27 = vstv %s1692_s30  ;;  %s1746_s30 = sld [smem:[#allocation9 + $0x3d]]  ;;  %vm644_vm4 = vcmask 1039360   ;;  %vm663_vm6 = vcmask 1031168  }
 0x104   : > { %449 = vst.msk [vmem:[#allocation4 + $0x8] sm:$0x3] %vm427_vm0, %v447_v31  ;;  %vm2578_vm0 = vcmp.lt.s32.totalorder %v220_v0, 137  ;;  %v771_v31 = vstv %s1693_s5  ;;  %s2081_s5 = smov 104  }
 0x105   : > { %v462_v34 = vpop.permute.xlu1 %461  ;;  %v451_v35 = vpop.permute.xlu0 %450  ;;  %vm513_vm1 = vmand %vm2573_vm15, %vm2578_vm0  ;;  %vm796_vm15 = vcmask 850944   ;;  %vm815_vm0 = vcmask 842752  }
 0x106   : > { %456 = vst.msk [vmem:[#allocation4 + $0x3] sm:$0x1] %vm455_vm5, %v451_v35  ;;  %v790_v35 = vstv %s1694_s27  ;;  %v809_v39 = vstv %s1695_s6  ;;  %s1698_s27 = sld [smem:[#allocation9 + $0xd]]  ;;  %s1699_s6 = sld [smem:[#allocation9 + $0xe]] }
 0x107   : > { %467 = vst.msk [vmem:[#allocation4 + $0x3] sm:$0x1] %vm466_vm3, %v462_v34  ;;  %v800_v34 = vstv %s1743_s16  ;;  %s1747_s16 = sld [smem:[#allocation9 + $0x3e]] }
 0x109   : > { %v473_v36 = vpop.permute.xlu1 %472  ;;  %v458_v37 = vpop.permute.xlu0 %457  ;;  %v857_v46 = vstv %s1746_s30  ;;  %s1750_s30 = sld [smem:[#allocation9 + $0x41]] }
 0x10a   : > { %478 = vst.msk [vmem:[#allocation4 + $0x3] sm:$0x1] %vm477_vm7, %v473_v36 }
 0x10b   : > { %460 = vst.msk [vmem:[#allocation4 + $0x9] sm:$0x1] %vm455_vm5, %v458_v37  ;;  %vm525_vm5 = vcmp.lt.s32.totalorder %v220_v0, 31 }
 0x10d   : > { %v469_v40 = vpop.permute.xlu1 %468  ;;  %v506_v41 = vpop.permute.xlu0 %505 }
 0x10e   : > { %471 = vst.msk [vmem:[#allocation4 + $0x9] sm:$0x1] %vm466_vm3, %v469_v40  ;;  %v507_v48 = vrot.slane %v506_v41, 7  ;;  %vm526_vm3 = vmand %vm524_vm2, %vm525_vm5  ;;  %vm891_vm2 = vcmask 687104   ;;  %vm910_vm5 = vcmask 678912  }
 0x110   : > { %v509_v51 = vsel %vm508_vm11, %v507_v48, %v506_v41 }
 0x111   : > { %v480_v44 = vpop.permute.xlu1 %479  ;;  %v484_v45 = vpop.permute.xlu0 %483 }
 0x112   : > { %482 = vst.msk [vmem:[#allocation4 + $0x9] sm:$0x1] %vm477_vm7, %v480_v44  ;;  %vm682_vm7 = vcmask 1022976  }
 0x113   : > { %489 = vst.msk [vmem:[#allocation4 + $0x3] sm:$0x1] %vm488_vm10, %v484_v45 }
 0x115   : > { %v516_v49 = vpop.permute.xlu1 %515  ;;  %v495_v50 = vpop.permute.xlu0 %494 }
 0x116   : > { %500 = vst.msk [vmem:[#allocation4 + $0x3] sm:$0x1] %vm499_vm12, %v495_v50  ;;  %v517_v52 = vrot.slane %v516_v49, 7  ;;  %v876_v50 = vstv %s1747_s16  ;;  %s1751_s16 = sld [smem:[#allocation9 + $0x42]] }
 0x117   : > { %514 = vst.msk [vmem:[#allocation4 + $0x3] sm:$0x3] %vm513_vm1, %v509_v51  ;;  %v866_v51 = vstv %s1698_s27  ;;  %s1702_s27 = sld [smem:[#allocation9 + $0x11]] }
 0x118   : > { %v518_v55 = vsel %vm508_vm11, %v517_v52, %v516_v49  ;;  %vm834_vm11 = vcmask 834560  }
 0x119   : > { %v502_v53 = vpop.permute.xlu1 %501  ;;  %v491_v54 = vpop.permute.xlu0 %490 }
 0x11a   : > { %493 = vst.msk [vmem:[#allocation4 + $0x9] sm:$0x1] %vm488_vm10, %v491_v54  ;;  %v895_v54 = vstv %s1748_s29  ;;  %s1752_s29 = sld [smem:[#allocation9 + $0x43]]  ;;  %vm739_vm10 = vcmask 998400  }
 0x11b   : > { %504 = vst.msk [vmem:[#allocation4 + $0x9] sm:$0x1] %vm499_vm12, %v502_v53  ;;  %vm853_vm12 = vcmask 826368  }
 0x11c   : > { %520 = vst.msk [vmem:[#allocation4 + $0x9] sm:$0x3] %vm513_vm1, %v518_v55  ;;  %v885_v55 = vstv %s1699_s6  ;;  %s1703_s6 = sld [smem:[#allocation9 + $0x12]]  ;;  %vm872_vm1 = vcmask 818176  }
 0x11d   : > { %v529_v56 = vpop.permute.xlu1 %528  ;;  %v522_v57 = vpop.permute.xlu0 %521 }
 0x11e   : > { %531 = vst.msk [vmem:[#allocation4 + $0xa] sm:$0x1] %vm526_vm3, %v529_v56  ;;  %527 = vst.msk [vmem:[#allocation4 + $0x4] sm:$0x1] %vm526_vm3, %v522_v57  ;;  %vm929_vm3 = vcmask 670720  }
 0x125   : > { %v2617_v60 = vld [vmem:[#allocation4 + $0x6] sm:$0x1f]  ;;  %v2619_v61 = vld [vmem:[#allocation4] sm:$0x1f] }
 0x126   : > { %v649_v62 = vmul.f32 %v648_v58, %v2617_v60  ;;  %v639_v63 = vmul.f32 %v638_v59, %v2619_v61  ;;  %v668_v3 = vmul.f32 %v667_v1, %v2617_v60  ;;  %v658_v4 = vmul.f32 %v657_v2, %v2619_v61 }
 0x127   : > { %v687_v7 = vmul.f32 %v686_v5, %v2617_v60  ;;  %v677_v8 = vmul.f32 %v676_v6, %v2619_v61  ;;  %v706_v11 = vmul.f32 %v705_v9, %v2617_v60  ;;  %v696_v12 = vmul.f32 %v695_v10, %v2619_v61 }
 0x128   : > { %651 = vrot.lane.b32.xlu1 %v649_v62, %s2075_s8  ;;  %641 = vrot.lane.b32.xlu0 %v639_v63, %s2075_s8  ;;  %s2077_s8 = smov 125   ;;  %v636_v17 = vmul.f32 %v635_v14, %v2617_v60  ;;  %v632_v18 = vmul.f32 %v631_v13, %v2619_v61  ;;  %v725_v19 = vmul.f32 %v724_v15, %v2617_v60  ;;  %v904_v59 = vstv %s1700_s21  ;;  %s1704_s21 = sld [smem:[#allocation9 + $0x13]] }
 0x129   : > { %v715_v20 = vmul.f32 %v714_v16, %v2619_v61  ;;  %v744_v24 = vmul.f32 %v743_v21, %v2617_v60  ;;  %v734_v25 = vmul.f32 %v733_v22, %v2619_v61  ;;  %v763_v28 = vmul.f32 %v762_v26, %v2617_v60 }
 0x12a   : > { %v2635_v23 = vadd.f32 %v636_v17, %v632_v18  ;;  %v753_v29 = vmul.f32 %v752_v27, %v2619_v61  ;;  %v782_v32 = vmul.f32 %v781_v30, %v2617_v60  ;;  %v772_v33 = vmul.f32 %v771_v31, %v2619_v61 }
 0x12b   : > { %v801_v36 = vmul.f32 %v800_v34, %v2617_v60  ;;  %v791_v37 = vmul.f32 %v790_v35, %v2619_v61  ;;  %v820_v40 = vmul.f32 %v819_v38, %v2617_v60  ;;  %v810_v41 = vmul.f32 %v809_v39, %v2619_v61  ;;  %v1085_v34 = vld [vmem:[#allocation4 + $0x7] sm:$0xf] }
 0x12c   : > { %670 = vrot.lane.b32.xlu1 %v668_v3, %s2076_s26  ;;  %660 = vrot.lane.b32.xlu0 %v658_v4, %s2076_s26  ;;  %s2078_s26 = smov 124   ;;  %v829_v45 = vmul.f32 %v828_v43, %v2619_v61  ;;  %v858_v48 = vmul.f32 %v857_v46, %v2617_v60  ;;  %v848_v49 = vmul.f32 %v847_v47, %v2619_v61  ;;  %v933_v1 = vstv %s1750_s30  ;;  %s1754_s30 = sld [smem:[#allocation9 + $0x45]] }
 0x12d   : > { %v877_v52 = vmul.f32 %v876_v50, %v2617_v60  ;;  %v867_v53 = vmul.f32 %v866_v51, %v2619_v61  ;;  %v896_v56 = vmul.f32 %v895_v54, %v2617_v60  ;;  %v886_v57 = vmul.f32 %v885_v55, %v2619_v61 }
 0x12e   : > { %v905_v63 = vmul.f32 %v904_v59, %v2619_v61  ;;  %v923_v2 = vstv %s1701_s4  ;;  %v934_v3 = vmul.f32 %v933_v1, %v2617_v60  ;;  %v951_v5 = vstv %s1751_s16  ;;  %s1705_s4 = sld [smem:[#allocation9 + $0x14]]  ;;  %s1755_s16 = sld [smem:[#allocation9 + $0x46]] }
 0x12f   : > { %v924_v4 = vmul.f32 %v923_v2, %v2619_v61  ;;  %v942_v6 = vstv %s1702_s27  ;;  %v970_v9 = vstv %s1752_s29  ;;  %v960_v10 = vstv %s1703_s6  ;;  %s1706_s27 = sld [smem:[#allocation9 + $0x15]]  ;;  %s1756_s29 = sld [smem:[#allocation9 + $0x47]] }
 0x130   : > { %689 = vrot.lane.b32.xlu1 %v687_v7, %s2077_s8  ;;  %679 = vrot.lane.b32.xlu0 %v677_v8, %s2077_s8  ;;  %s1745_s8 = sld [smem:[#allocation9 + $0x3c]]  ;;  %v952_v7 = vmul.f32 %v951_v5, %v2617_v60  ;;  %v943_v8 = vmul.f32 %v942_v6, %v2619_v61  ;;  %v979_v14 = vstv %s1704_s21  ;;  %s1707_s6 = sld [smem:[#allocation9 + $0x16]] }
 0x131   : > { %v980_v16 = vmul.f32 %v979_v14, %v2619_v61  ;;  %s2091_s21 = smov 78  }
 0x132   : > { %v1008_v17 = vstv %s1754_s30  ;;  %s1709_s30 = sld [smem:[#allocation9 + $0x18]] }
 0x134   : > { %708 = vrot.lane.b32.xlu1 %v706_v11, %s2078_s26  ;;  %698 = vrot.lane.b32.xlu0 %v696_v12, %s2078_s26  ;;  %v971_v11 = vmul.f32 %v970_v9, %v2617_v60  ;;  %v961_v12 = vmul.f32 %v960_v10, %v2619_v61  ;;  %v998_v18 = vstv %s1705_s4  ;;  %v1027_v21 = vstv %s1755_s16  ;;  %s2092_s4 = smov 62   ;;  %s1759_s16 = sld [smem:[#allocation9 + $0x4a]] }
 0x135   : > { %v1017_v22 = vstv %s1706_s27  ;;  %v1046_v26 = vstv %s1756_s29  ;;  %s1710_s27 = sld [smem:[#allocation9 + $0x19]]  ;;  %s1760_s29 = sld [smem:[#allocation9 + $0x4b]] }
 0x136   : > { %v838_v42 = vstv %s1745_s8  ;;  %s1749_s8 = sld [smem:[#allocation9 + $0x40]]  ;;  %v1036_v27 = vstv %s1707_s6  ;;  %s1711_s6 = sld [smem:[#allocation9 + $0x1a]] }
 0x137   : > { %v839_v44 = vmul.f32 %v838_v42, %v2617_v60 }
 0x138   : > { %727 = vrot.lane.b32.xlu1 %v725_v19, %s2069_s7  ;;  %717 = vrot.lane.b32.xlu0 %v715_v20, %s2069_s7  ;;  %v1009_v19 = vmul.f32 %v1008_v17, %v2617_v60  ;;  %v999_v20 = vmul.f32 %v998_v18, %v2619_v61 }
 0x13a   : > { %v1107_v42 = vstv %s1759_s16  ;;  %s1763_s16 = sld [smem:[#allocation9 + $0x4e]] }
 0x13c   : > { %746 = vrot.lane.b32.xlu1 %v744_v24, %s2079_s28  ;;  %736 = vrot.lane.b32.xlu0 %v734_v25, %s2079_s28  ;;  %v914_v58 = vstv %s1749_s8  ;;  %s1753_s8 = sld [smem:[#allocation9 + $0x44]]  ;;  %v1028_v24 = vmul.f32 %v1027_v21, %v2617_v60  ;;  %v1018_v25 = vmul.f32 %v1017_v22, %v2619_v61 }
 0x13d   : > { %v915_v62 = vmul.f32 %v914_v58, %v2617_v60 }
 0x140   : > { %765 = vrot.lane.b32.xlu1 %v763_v28, %s2080_s15  ;;  %755 = vrot.lane.b32.xlu0 %v753_v29, %s2080_s15  ;;  %s2083_s15 = smov 102   ;;  %v1047_v28 = vmul.f32 %v1046_v26, %v2617_v60  ;;  %v1037_v29 = vmul.f32 %v1036_v27, %v2619_v61 }
 0x142   : > { %v989_v13 = vstv %s1753_s8  ;;  %s1708_s8 = sld [smem:[#allocation9 + $0x17]] }
 0x143   : > { %v990_v15 = vmul.f32 %v989_v13, %v2617_v60 }
 0x144   : > { %784 = vrot.lane.b32.xlu1 %v782_v32, %s2066_s3  ;;  %774 = vrot.lane.b32.xlu0 %v772_v33, %s2066_s3  ;;  %s2082_s3 = smov 103  }
 0x148   : > { %803 = vrot.lane.b32.xlu1 %v801_v36, %s2081_s5  ;;  %793 = vrot.lane.b32.xlu0 %v791_v37, %s2081_s5  ;;  %s2084_s5 = smov 101   ;;  %v1055_v31 = vstv %s1708_s8  ;;  %v1074_v36 = vld [vmem:[#allocation4 + $0x1] sm:$0xf]  ;;  %v1075_v37 = vstv %s1709_s30  ;;  %s1712_s8 = sld [smem:[#allocation9 + $0x1b]] }
 0x149   : > { %v1056_v33 = vmul.f32 %v1055_v31, %v2619_v61  ;;  %v1076_v39 = vmul.f32 %v1075_v37, %v1074_v36  ;;  %s1713_s30 = sld [smem:[#allocation9 + $0x1c]] }
 0x14c   : > { %822 = vrot.lane.b32.xlu1 %v820_v40, %s2082_s3  ;;  %812 = vrot.lane.b32.xlu0 %v810_v41, %s2082_s3  ;;  %s2085_s3 = smov 100   ;;  %v2681_v40 = vld [vmem:[#allocation4 + $0x7] sm:$0x1f]  ;;  %v2683_v41 = vld [vmem:[#allocation4 + $0x1] sm:$0x1f] }
 0x14d   : > { %v1108_v61 = vmul.f32 %v1107_v42, %v2681_v40 }
 0x150   : > { %841 = vrot.lane.b32.xlu1 %v839_v44, %s2083_s15  ;;  %831 = vrot.lane.b32.xlu0 %v829_v45, %s2083_s15  ;;  %s2086_s15 = smov 84   ;;  %v1126_v44 = vstv %s1760_s29  ;;  %v1116_v45 = vstv %s1711_s6  ;;  %s1764_s29 = sld [smem:[#allocation9 + $0x4f]] }
 0x151   : > { %v1127_v46 = vmul.f32 %v1126_v44, %v2681_v40  ;;  %v1117_v47 = vmul.f32 %v1116_v45, %v2683_v41  ;;  %s1715_s6 = sld [smem:[#allocation9 + $0x1e]] }
 0x154   : > { %860 = vrot.lane.b32.xlu1 %v858_v48, %s2084_s5  ;;  %850 = vrot.lane.b32.xlu0 %v848_v49, %s2084_s5  ;;  %s2087_s5 = smov 83   ;;  %v1135_v49 = vstv %s1712_s8  ;;  %s2695_s8 = sld [smem:[#allocation9 + $0x1f]] }
 0x155   : > { %v1136_v51 = vmul.f32 %v1135_v49, %v2683_v41 }
 0x158   : > { %879 = vrot.lane.b32.xlu1 %v877_v52, %s2085_s3  ;;  %869 = vrot.lane.b32.xlu0 %v867_v53, %s2085_s3  ;;  %s2088_s3 = smov 82   ;;  %v1154_v53 = vstv %s1713_s30  ;;  %s2701_s30 = sld [smem:[#allocation9 + $0x20]] }
 0x159   : > { %v1155_v55 = vmul.f32 %v1154_v53, %v2683_v41 }
 0x15c   : > { %898 = vrot.lane.b32.xlu1 %v896_v56, %s2086_s15  ;;  %888 = vrot.lane.b32.xlu0 %v886_v57, %s2086_s15  ;;  %s2089_s15 = smov 80   ;;  %v1183_v56 = vstv %s1763_s16  ;;  %s2703_s16 = sld [smem:[#allocation9 + $0x52]] }
 0x15d   : > { %v1184_v58 = vmul.f32 %v1183_v56, %v2681_v40 }
 0x160   : > { %917 = vrot.lane.b32.xlu1 %v915_v62, %s2087_s5  ;;  %907 = vrot.lane.b32.xlu0 %v905_v63, %s2087_s5  ;;  %s1757_s5 = sld [smem:[#allocation9 + $0x48]]  ;;  %v1202_v62 = vstv %s1764_s29  ;;  %v1192_v63 = vstv %s1715_s6  ;;  %s2713_s29 = sld [smem:[#allocation9 + $0x53]] }
 0x161   : > { %s2720_s6 = sld [smem:[#allocation9 + $0x22]] }
 0x162   : > { %v1259_v21 = vstv %s2703_s16  ;;  %s2744_s16 = sld [smem:[#allocation9 + $0x56]] }
 0x164   : > { %936 = vrot.lane.b32.xlu1 %v934_v3, %s2088_s3  ;;  %926 = vrot.lane.b32.xlu0 %v924_v4, %s2088_s3  ;;  %s1758_s3 = sld [smem:[#allocation9 + $0x49]]  ;;  %v1203_v3 = vmul.f32 %v1202_v62, %v2681_v40  ;;  %v1193_v4 = vmul.f32 %v1192_v63, %v2683_v41 }
 0x166   : > { %v1065_v30 = vstv %s1757_s5  ;;  %s1761_s5 = sld [smem:[#allocation9 + $0x4c]] }
 0x167   : > { %v1066_v32 = vmul.f32 %v1065_v30, %v2617_v60  ;;  %v1096_v60 = vstv %s1710_s27  ;;  %s1714_s27 = sld [smem:[#allocation9 + $0x1d]] }
 0x168   : > { %954 = vrot.lane.b32.xlu1 %v952_v7, %s2060_s22  ;;  %945 = vrot.lane.b32.xlu0 %v943_v8, %s2060_s22  ;;  %s2090_s22 = smov 79   ;;  %v1097_v43 = vmul.f32 %v1096_v60, %v2683_v41  ;;  %v1211_v8 = vstv %s2695_s8  ;;  %s2730_s8 = sld [smem:[#allocation9 + $0x23]] }
 0x16a   : > { %v1086_v35 = vstv %s1758_s3  ;;  %s1762_s3 = sld [smem:[#allocation9 + $0x4d]] }
 0x16b   : > { %v1087_v38 = vmul.f32 %v1086_v35, %v1085_v34  ;;  %v1278_v34 = vstv %s2713_s29  ;;  %s2754_s29 = sld [smem:[#allocation9 + $0x57]] }
 0x16c   : > { %973 = vrot.lane.b32.xlu1 %v971_v11, %s2089_s15  ;;  %963 = vrot.lane.b32.xlu0 %v961_v12, %s2089_s15  ;;  %s2093_s15 = smov 61   ;;  %v1145_v48 = vstv %s1761_s5  ;;  %s2693_s5 = sld [smem:[#allocation9 + $0x50]] }
 0x16d   : > { %v1146_v50 = vmul.f32 %v1145_v48, %v2681_v40  ;;  %v1173_v57 = vstv %s1714_s27  ;;  %s2709_s27 = sld [smem:[#allocation9 + $0x21]] }
 0x16e   : > { %v1174_v59 = vmul.f32 %v1173_v57, %v2683_v41 }
 0x170   : > { %992 = vrot.lane.b32.xlu1 %v990_v15, %s2090_s22  ;;  %982 = vrot.lane.b32.xlu0 %v980_v16, %s2090_s22  ;;  %s2094_s22 = smov 60   ;;  %v1164_v52 = vstv %s1762_s3  ;;  %s2697_s3 = sld [smem:[#allocation9 + $0x51]]  ;;  %v1212_v15 = vmul.f32 %v1211_v8, %v2683_v41 }
 0x171   : > { %v1165_v54 = vmul.f32 %v1164_v52, %v2681_v40 }
 0x172   : > { %v1221_v7 = vstv %s2693_s5  ;;  %s2724_s5 = sld [smem:[#allocation9 + $0x54]] }
 0x173   : > { %v1222_v14 = vmul.f32 %v1221_v7, %v2681_v40  ;;  %v1249_v31 = vstv %s2709_s27  ;;  %s2750_s27 = sld [smem:[#allocation9 + $0x25]] }
 0x174   : > { %1011 = vrot.lane.b32.xlu1 %v1009_v19, %s2091_s21  ;;  %1001 = vrot.lane.b32.xlu0 %v999_v20, %s2091_s21  ;;  %s2095_s21 = smov 59   ;;  %v1230_v19 = vstv %s2701_s30  ;;  %s2740_s30 = sld [smem:[#allocation9 + $0x24]] }
 0x175   : > { %v1231_v27 = vmul.f32 %v1230_v19, %v2683_v41 }
 0x176   : > { %v1240_v10 = vstv %s2697_s3  ;;  %s2734_s3 = sld [smem:[#allocation9 + $0x55]] }
 0x177   : > { %v1241_v26 = vmul.f32 %v1240_v10, %v2681_v40 }
 0x178   : > { %1030 = vrot.lane.b32.xlu1 %v1028_v24, %s2092_s4  ;;  %1020 = vrot.lane.b32.xlu0 %v1018_v25, %s2092_s4  ;;  %s2096_s4 = smov 58  }
 0x17c   : > { %1049 = vrot.lane.b32.xlu1 %v1047_v28, %s2093_s15  ;;  %1039 = vrot.lane.b32.xlu0 %v1037_v29, %s2093_s15  ;;  %s2097_s15 = smov 57  }
 0x180   : > { %1068 = vrot.lane.b32.xlu1 %v1066_v32, %s2094_s22  ;;  %1058 = vrot.lane.b32.xlu0 %v1056_v33, %s2094_s22  ;;  %s2098_s22 = smov 56  }
 0x184   : > { %1089 = vrot.lane.b32.xlu1 %v1087_v38, %s2095_s21  ;;  %1078 = vrot.lane.b32.xlu0 %v1076_v39, %s2095_s21  ;;  %s2099_s21 = smov 40   ;;  %v1260_v38 = vmul.f32 %v1259_v21, %v2681_v40  ;;  %v1250_v39 = vmul.f32 %v1249_v31, %v2683_v41 }
 0x188   : > { %1110 = vrot.lane.b32.xlu1 %v1108_v61, %s2096_s4  ;;  %1099 = vrot.lane.b32.xlu0 %v1097_v43, %s2096_s4  ;;  %s2100_s4 = smov 39   ;;  %v1268_v43 = vstv %s2720_s6  ;;  %s2760_s6 = sld [smem:[#allocation9 + $0x26]] }
 0x18c   : > { %1129 = vrot.lane.b32.xlu1 %v1127_v46, %s2097_s15  ;;  %1119 = vrot.lane.b32.xlu0 %v1117_v47, %s2097_s15  ;;  %s2101_s15 = smov 38   ;;  %v1297_v46 = vstv %s2724_s5  ;;  %s2764_s5 = sld [smem:[#allocation9 + $0x58]] }
 0x190   : > { %1148 = vrot.lane.b32.xlu1 %v1146_v50, %s2098_s22  ;;  %1138 = vrot.lane.b32.xlu0 %v1136_v51, %s2098_s22  ;;  %s2102_s22 = smov 37   ;;  %v1279_v50 = vmul.f32 %v1278_v34, %v2681_v40  ;;  %v1269_v51 = vmul.f32 %v1268_v43, %v2683_v41 }
 0x194   : > { %1167 = vrot.lane.b32.xlu1 %v1165_v54, %s2099_s21  ;;  %1157 = vrot.lane.b32.xlu0 %v1155_v55, %s2099_s21  ;;  %s2103_s21 = smov 36   ;;  %v1287_v55 = vstv %s2730_s8  ;;  %s2770_s8 = sld [smem:[#allocation9 + $0x27]] }
 0x198   : > { %1186 = vrot.lane.b32.xlu1 %v1184_v58, %s2100_s4  ;;  %1176 = vrot.lane.b32.xlu0 %v1174_v59, %s2100_s4  ;;  %s2104_s4 = smov 35   ;;  %v1316_v58 = vstv %s2734_s3  ;;  %s2774_s3 = sld [smem:[#allocation9 + $0x59]] }
 0x19a   : > { %v652_v1 = vpop.permute.xlu1 %651  ;;  %v642_v2 = vpop.permute.xlu0 %641 }
 0x19b   : > { %v653_v5 = vrot.slane %v652_v1, 1  ;;  %v643_v6 = vrot.slane %v642_v2, 1 }
 0x19c   : > { %1205 = vrot.lane.b32.xlu1 %v1203_v3, %s2101_s15  ;;  %1195 = vrot.lane.b32.xlu0 %v1193_v4, %s2101_s15  ;;  %s2105_s15 = smov 34  }
 0x19d   : > { %v645_v9 = vsel %vm644_vm4, %v642_v2, %v643_v6  ;;  %v654_v16 = vsel %vm644_vm4, %v652_v1, %v653_v5  ;;  %v1298_v1 = vmul.f32 %v1297_v46, %v2681_v40  ;;  %v1288_v2 = vmul.f32 %v1287_v55, %v2683_v41 }
 0x19e   : > { %v647_v11 = vadd.f32 %v645_v9, %v2635_v23  ;;  %v671_v12 = vpop.permute.xlu1 %670  ;;  %v661_v13 = vpop.permute.xlu0 %660  ;;  %v1306_v6 = vstv %s2740_s30  ;;  %v1335_v9 = vstv %s2744_s16  ;;  %s2780_s30 = sld [smem:[#allocation9 + $0x28]]  ;;  %s2784_s16 = sld [smem:[#allocation9 + $0x5a]]  ;;  %vm3035_vm4 = vcmask 662528  }
 0x19f   : > { %v672_v17 = vrot.slane %v671_v12, 1  ;;  %v662_v18 = vrot.slane %v661_v13, 1 }
 0x1a0   : > { %v656_v20 = vadd.f32 %v654_v16, %v647_v11  ;;  %1224 = vrot.lane.b32.xlu1 %v1222_v14, %s2102_s22  ;;  %1214 = vrot.lane.b32.xlu0 %v1212_v15, %s2102_s22  ;;  %s2106_s22 = smov 18   ;;  %v1307_v14 = vmul.f32 %v1306_v6, %v2683_v41 }
 0x1a1   : > { %v664_v23 = vsel %vm663_vm6, %v661_v13, %v662_v18  ;;  %v673_v28 = vsel %vm663_vm6, %v671_v12, %v672_v17  ;;  %v1317_v13 = vmul.f32 %v1316_v58, %v2681_v40  ;;  %v1325_v18 = vstv %s2750_s27  ;;  %s2790_s27 = sld [smem:[#allocation9 + $0x29]] }
 0x1a2   : > { %v666_v22 = vadd.f32 %v664_v23, %v656_v20  ;;  %v690_v24 = vpop.permute.xlu1 %689  ;;  %v680_v25 = vpop.permute.xlu0 %679  ;;  %v1354_v23 = vstv %s2754_s29  ;;  %s2794_s29 = sld [smem:[#allocation9 + $0x5b]]  ;;  %vm966_vm6 = vcmask 654336  }
 0x1a3   : > { %v691_v29 = vrot.slane %v690_v24, 1  ;;  %v681_v30 = vrot.slane %v680_v25, 1 }
 0x1a4   : > { %v675_v32 = vadd.f32 %v673_v28, %v666_v22  ;;  %1243 = vrot.lane.b32.xlu1 %v1241_v26, %s2103_s21  ;;  %1233 = vrot.lane.b32.xlu0 %v1231_v27, %s2103_s21  ;;  %s2107_s21 = smov 17   ;;  %v1326_v26 = vmul.f32 %v1325_v18, %v2683_v41 }
 0x1a5   : > { %v683_v33 = vsel %vm682_vm7, %v680_v25, %v681_v30  ;;  %v692_v42 = vsel %vm682_vm7, %v690_v24, %v691_v29  ;;  %v1336_v25 = vmul.f32 %v1335_v9, %v2681_v40  ;;  %v1344_v30 = vstv %s2760_s6  ;;  %s2800_s6 = sld [smem:[#allocation9 + $0x2a]]  ;;  %vm3036_vm7 = vmmov %vm3035_vm4 }
 0x1a6   : > { %v685_v35 = vadd.f32 %v683_v33, %v675_v32  ;;  %v709_v36 = vpop.permute.xlu1 %708  ;;  %v699_v37 = vpop.permute.xlu0 %698  ;;  %v1373_v33 = vstv %s2764_s5  ;;  %s2804_s5 = sld [smem:[#allocation9 + $0x5c]] }
 0x1a7   : > { %v710_v60 = vrot.slane %v709_v36, 1  ;;  %v700_v61 = vrot.slane %v699_v37, 1 }
 0x1a8   : > { %v694_v44 = vadd.f32 %v692_v42, %v685_v35  ;;  %1262 = vrot.lane.b32.xlu1 %v1260_v38, %s2104_s4  ;;  %1252 = vrot.lane.b32.xlu0 %v1250_v39, %s2104_s4  ;;  %s2108_s4 = smov 16   ;;  %v1345_v38 = vmul.f32 %v1344_v30, %v2683_v41 }
 0x1a9   : > { %v702_v45 = vsel %vm701_vm8, %v699_v37, %v700_v61  ;;  %v711_v52 = vsel %vm701_vm8, %v709_v36, %v710_v60  ;;  %v1355_v37 = vmul.f32 %v1354_v23, %v2681_v40  ;;  %v1363_v61 = vstv %s2770_s8  ;;  %s2810_s8 = sld [smem:[#allocation9 + $0x2b]] }
 0x1aa   : > { %v704_v47 = vadd.f32 %v702_v45, %v694_v44  ;;  %v728_v48 = vpop.permute.xlu1 %727  ;;  %v718_v49 = vpop.permute.xlu0 %717  ;;  %v1392_v45 = vstv %s2774_s3  ;;  %s2111_s3 = smov 12  }
 0x1ab   : > { %v729_v53 = vrot.slane %v728_v48, 1  ;;  %v719_v54 = vrot.slane %v718_v49, 1 }
 0x1ac   : > { %v713_v56 = vadd.f32 %v711_v52, %v704_v47  ;;  %1281 = vrot.lane.b32.xlu1 %v1279_v50, %s2105_s15  ;;  %1271 = vrot.lane.b32.xlu0 %v1269_v51, %s2105_s15  ;;  %s2109_s15 = smov 15   ;;  %v1364_v50 = vmul.f32 %v1363_v61, %v2683_v41 }
 0x1ad   : > { %v721_v57 = vsel %vm720_vm9, %v718_v49, %v719_v54  ;;  %v730_v3 = vsel %vm720_vm9, %v728_v48, %v729_v53  ;;  %v1374_v49 = vmul.f32 %v1373_v33, %v2681_v40  ;;  %v1382_v54 = vstv %s2780_s30  ;;  %s2826_s30 = sld [smem:[#allocation9 + $0x5e]] }
 0x1ae   : > { %v723_v59 = vadd.f32 %v721_v57, %v713_v56  ;;  %v747_v62 = vpop.permute.xlu1 %746  ;;  %v737_v63 = vpop.permute.xlu0 %736  ;;  %v1411_v57 = vstv %s2784_s16  ;;  %s2838_s16 = sld [smem:[#allocation9 + $0x5f]] }
 0x1af   : > { %v748_v4 = vrot.slane %v747_v62, 1  ;;  %v738_v5 = vrot.slane %v737_v63, 1 }
 0x1b0   : > { %v732_v7 = vadd.f32 %v730_v3, %v723_v59  ;;  %1300 = vrot.lane.b32.xlu1 %v1298_v1, %s2106_s22  ;;  %1290 = vrot.lane.b32.xlu0 %v1288_v2, %s2106_s22  ;;  %s2110_s22 = smov 14   ;;  %v1383_v1 = vmul.f32 %v1382_v54, %v2683_v41 }
 0x1b1   : > { %v740_v8 = vsel %vm739_vm10, %v737_v63, %v738_v5  ;;  %v749_v15 = vsel %vm739_vm10, %v747_v62, %v748_v4  ;;  %v1393_v63 = vmul.f32 %v1392_v45, %v2681_v40  ;;  %v1401_v5 = vstv %s2790_s27  ;;  %s2852_s27 = sld [smem:[#allocation9 + $0x60]] }
 0x1b2   : > { %v742_v10 = vadd.f32 %v740_v8, %v732_v7  ;;  %v766_v11 = vpop.permute.xlu1 %765  ;;  %v756_v12 = vpop.permute.xlu0 %755  ;;  %v1429_v8 = vstv %s2794_s29  ;;  %s2112_s29 = smov 121  }
 0x1b3   : > { %v767_v16 = vrot.slane %v766_v11, 1  ;;  %v757_v17 = vrot.slane %v756_v12, 1 }
 0x1b4   : > { %v751_v19 = vadd.f32 %v749_v15, %v742_v10  ;;  %1319 = vrot.lane.b32.xlu1 %v1317_v13, %s2107_s21  ;;  %1309 = vrot.lane.b32.xlu0 %v1307_v14, %s2107_s21  ;;  %s2816_s21 = sld [smem:[#allocation9 + $0x5d]]  ;;  %v1402_v13 = vmul.f32 %v1401_v5, %v2683_v41 }
 0x1b5   : > { %v759_v20 = vsel %vm758_vm13, %v756_v12, %v757_v17  ;;  %v768_v27 = vsel %vm758_vm13, %v766_v11, %v767_v16  ;;  %v1412_v12 = vmul.f32 %v1411_v57, %v2681_v40  ;;  %v1420_v17 = vstv %s2800_s6  ;;  %s2113_s6 = smov 120  }
 0x1b6   : > { %v761_v21 = vadd.f32 %v759_v20, %v751_v19  ;;  %v785_v22 = vpop.permute.xlu1 %784  ;;  %v775_v24 = vpop.permute.xlu0 %774  ;;  %v1447_v20 = vstv %s2804_s5  ;;  %vm985_vm13 = vcmask 646144   ;;  %s2115_s5 = smov 118  }
 0x1b7   : > { %v786_v28 = vrot.slane %v785_v22, 1  ;;  %v776_v29 = vrot.slane %v775_v24, 1 }
 0x1b8   : > { %v770_v31 = vadd.f32 %v768_v27, %v761_v21  ;;  %1338 = vrot.lane.b32.xlu1 %v1336_v25, %s2108_s4  ;;  %1328 = vrot.lane.b32.xlu0 %v1326_v26, %s2108_s4  ;;  %v1421_v25 = vmul.f32 %v1420_v17, %v2683_v41  ;;  %s2832_s4 = sld [smem:[#allocation9 + $0x2d]] }
 0x1b9   : > { %v778_v32 = vsel %vm777_vm14, %v775_v24, %v776_v29  ;;  %v787_v39 = vsel %vm777_vm14, %v785_v22, %v786_v28  ;;  %v1430_v24 = vmul.f32 %v1429_v8, %v2681_v40  ;;  %v1438_v29 = vstv %s2810_s8  ;;  %s1685_s8 = sshll.u32 %s2243_s19, 2 }
 0x1ba   : > { %v780_v34 = vadd.f32 %v778_v32, %v770_v31  ;;  %v804_v35 = vpop.permute.xlu1 %803  ;;  %v794_v36 = vpop.permute.xlu0 %793  ;;  %v1465_v32 = vstv %s2816_s21  ;;  %vm1004_vm14 = vcmask 637952   ;;  %s1790_s21 = sshll.u32 %s2043_s12, 6  ;;  %s1567_s12 = scalar_lea.sflag [#allocation7], %s2243_s19 }
 0x1bb   : > { %v805_v42 = vrot.slane %v804_v35, 1  ;;  %v795_v60 = vrot.slane %v794_v36, 1 }
 0x1bc   : > { %v789_v43 = vadd.f32 %v787_v39, %v780_v34  ;;  %1357 = vrot.lane.b32.xlu1 %v1355_v37, %s2109_s15  ;;  %1347 = vrot.lane.b32.xlu0 %v1345_v38, %s2109_s15  ;;  %v1439_v37 = vmul.f32 %v1438_v29, %v2683_v41  ;;  %s2862_s15 = sld [smem:[#allocation9 + $0x61]] }
 0x1bd   : > { %v797_v44 = vsel %vm796_vm15, %v794_v36, %v795_v60  ;;  %v806_v51 = vsel %vm796_vm15, %v804_v35, %v805_v42  ;;  %v1448_v36 = vmul.f32 %v1447_v20, %v2681_v40  ;;  %vm1023_vm15 = vcmask 506880  }
 0x1be   : > { %v799_v46 = vadd.f32 %v797_v44, %v789_v43  ;;  %v823_v47 = vpop.permute.xlu1 %822  ;;  %v813_v48 = vpop.permute.xlu0 %812  ;;  %v1484_v44 = vstv %s2826_s30 }
 0x1bf   : > { %v824_v52 = vrot.slane %v823_v47, 1  ;;  %v814_v53 = vrot.slane %v813_v48, 1 }
 0x1c0   : > { %v808_v55 = vadd.f32 %v806_v51, %v799_v46  ;;  %1376 = vrot.lane.b32.xlu1 %v1374_v49, %s2110_s22  ;;  %1366 = vrot.lane.b32.xlu0 %v1364_v50, %s2110_s22  ;;  %s2114_s22 = smov 119  }
 0x1c1   : > { %v816_v56 = vsel %vm815_vm0, %v813_v48, %v814_v53  ;;  %v825_v2 = vsel %vm815_vm0, %v823_v47, %v824_v52  ;;  %v1466_v48 = vmul.f32 %v1465_v32, %v2681_v40  ;;  %v1474_v53 = vstv %s2832_s4 }
 0x1c2   : > { %v818_v58 = vadd.f32 %v816_v56, %v808_v55  ;;  %v842_v59 = vpop.permute.xlu1 %841  ;;  %v832_v62 = vpop.permute.xlu0 %831  ;;  %v1503_v56 = vstv %s2838_s16  ;;  %vm1042_vm0 = vcmask 498688   ;;  %s2901_s16 = scalar_lea.hbm %s2952_s2, %s1790_s21 }
 0x1c3   : > { %v843_v3 = vrot.slane %v842_v59, 1  ;;  %v833_v4 = vrot.slane %v832_v62, 1 }
 0x1c4   : > { %v827_v6 = vadd.f32 %v825_v2, %v818_v58  ;;  %1395 = vrot.lane.b32.xlu1 %v1393_v63, %s2072_s18  ;;  %1385 = vrot.lane.b32.xlu0 %v1383_v1, %s2072_s18  ;;  %s2822_s18 = sld [smem:[#allocation9 + $0x2c]]  ;;  %v1475_v63 = vmul.f32 %v1474_v53, %v2683_v41 }
 0x1c5   : > { %v835_v7 = vsel %vm834_vm11, %v832_v62, %v833_v4  ;;  %v844_v14 = vsel %vm834_vm11, %v842_v59, %v843_v3  ;;  %v1485_v62 = vmul.f32 %v1484_v44, %v2681_v40  ;;  %vm1061_vm11 = vcmask 490496  }
 0x1c6   : > { %v837_v9 = vadd.f32 %v835_v7, %v827_v6  ;;  %v861_v10 = vpop.permute.xlu1 %860  ;;  %v851_v11 = vpop.permute.xlu0 %850 }
 0x1c7   : > { %v862_v15 = vrot.slane %v861_v10, 1  ;;  %v852_v16 = vrot.slane %v851_v11, 1 }
 0x1c8   : > { %v846_v18 = vadd.f32 %v844_v14, %v837_v9  ;;  %1414 = vrot.lane.b32.xlu1 %v1412_v12, %s2111_s3  ;;  %1404 = vrot.lane.b32.xlu0 %v1402_v13, %s2111_s3  ;;  %v1522_v12 = vstv %s2852_s27 }
 0x1c9   : > { %v854_v19 = vsel %vm853_vm12, %v851_v11, %v852_v16  ;;  %v863_v26 = vsel %vm853_vm12, %v861_v10, %v862_v15  ;;  %v1504_v10 = vmul.f32 %v1503_v56, %v2681_v40  ;;  %vm1081_vm12 = vcmask 482304  }
 0x1ca   : > { %v856_v23 = vadd.f32 %v854_v19, %v846_v18  ;;  %v880_v21 = vpop.permute.xlu1 %879  ;;  %v870_v22 = vpop.permute.xlu0 %869  ;;  %v1456_v60 = vstv %s2822_s18  ;;  %v1541_v19 = vstv %s2862_s15  ;;  %s197_s18 = scalar_lea.vmem [#allocation10], %s1685_s8 }
 0x1cb   : > { %v881_v27 = vrot.slane %v880_v21, 1  ;;  %v871_v28 = vrot.slane %v870_v22, 1  ;;  %v1457_v49 = vmul.f32 %v1456_v60, %v2683_v41  ;;  %s1581_s3 = sshll.u32 %s197_s18, 4  ;;  %s2903_s3 = int_to_ptr.vmem [resolvable:$true] %s1581_s3 }
 0x1cc   : > { %v865_v30 = vadd.f32 %v863_v26, %v856_v23  ;;  %1432 = vrot.lane.b32.xlu1 %v1430_v24, %s2078_s26  ;;  %1423 = vrot.lane.b32.xlu0 %v1421_v25, %s2078_s26  ;;  %s2844_s26 = sld [smem:[#allocation9 + $0x2e]] }
 0x1cd   : > { %v873_v31 = vsel %vm872_vm1, %v870_v22, %v871_v28  ;;  %v882_v38 = vsel %vm872_vm1, %v880_v21, %v881_v27  ;;  %v1523_v22 = vmul.f32 %v1522_v12, %v2681_v40  ;;  %vm1102_vm1 = vcmask 474112  }
 0x1ce   : > { %v875_v33 = vadd.f32 %v873_v31, %v865_v30  ;;  %v899_v34 = vpop.permute.xlu1 %898  ;;  %v889_v35 = vpop.permute.xlu0 %888 }
 0x1cf   : > { %v900_v39 = vrot.slane %v899_v34, 1  ;;  %v890_v42 = vrot.slane %v889_v35, 1 }
 0x1d0   : > { %v884_v61 = vadd.f32 %v882_v38, %v875_v33  ;;  %1450 = vrot.lane.b32.xlu1 %v1448_v36, %s2069_s7  ;;  %1441 = vrot.lane.b32.xlu0 %v1439_v37, %s2069_s7  ;;  %s2856_s7 = sld [smem:[#allocation9 + $0x2f]] }
 0x1d1   : > { %v892_v43 = vsel %vm891_vm2, %v889_v35, %v890_v42  ;;  %v901_v50 = vsel %vm891_vm2, %v899_v34, %v900_v39  ;;  %v1542_v34 = vmul.f32 %v1541_v19, %v2681_v40  ;;  %vm1122_vm2 = vcmask 465920  }
 0x1d2   : > { %v894_v45 = vadd.f32 %v892_v43, %v884_v61  ;;  %v918_v46 = vpop.permute.xlu1 %917  ;;  %v908_v47 = vpop.permute.xlu0 %907  ;;  %v1493_v4 = vstv %s2844_s26  ;;  %s2116_s26 = smov [#allocation10]  }
 0x1d3   : > { %v919_v51 = vrot.slane %v918_v46, 1  ;;  %v909_v52 = vrot.slane %v908_v47, 1  ;;  %v1494_v11 = vmul.f32 %v1493_v4, %v2683_v41  ;;  %s1969_s27 = sshll.u32 %s2116_s26, 4  ;;  %s1970_s27 = int_to_ptr.vmem [resolvable:$false] %s1969_s27 }
 0x1d4   : > { %v903_v54 = vadd.f32 %v901_v50, %v894_v45  ;;  %1468 = vrot.lane.b32.xlu1 %v1466_v48, %s2079_s28  ;;  %1459 = vrot.lane.b32.xlu0 %v1457_v49, %s2079_s28  ;;  %s2868_s28 = sld [smem:[#allocation9 + $0x30]]  ;;  %p1972_p11 = scmp.lt.s32.totalorder %s2903_s3, %s1970_s27 }
 0x1d5   : > { %v911_v55 = vsel %vm910_vm5, %v908_v47, %v909_v52  ;;  %v920_v1 = vsel %vm910_vm5, %v918_v46, %v919_v51  ;;  %vm1141_vm5 = vcmask 457728  }
 0x1d6   : > { %v913_v57 = vadd.f32 %v911_v55, %v903_v54  ;;  %v937_v58 = vpop.permute.xlu1 %936  ;;  %v927_v59 = vpop.permute.xlu0 %926  ;;  %v1512_v16 = vstv %s2856_s7  ;;  %s1971_s7 = scalar_lea.vmem %s1970_s27, 128 }
 0x1d7   : > { %v938_v2 = vrot.slane %v937_v58, 1  ;;  %v928_v3 = vrot.slane %v927_v59, 1  ;;  %v1513_v24 = vmul.f32 %v1512_v16, %v2683_v41 }
 0x1d8   : > { %v922_v5 = vadd.f32 %v920_v1, %v913_v57  ;;  %1487 = vrot.lane.b32.xlu1 %v1485_v62, %s2112_s29  ;;  %1477 = vrot.lane.b32.xlu0 %v1475_v63, %s2112_s29 }
 0x1d9   : > { %v930_v6 = vsel %vm929_vm3, %v927_v59, %v928_v3  ;;  %v939_v13 = vsel %vm929_vm3, %v937_v58, %v938_v2  ;;  %vm1160_vm3 = vcmask 326656  }
 0x1da   : > { %v932_v7 = vadd.f32 %v930_v6, %v922_v5  ;;  %v955_v8 = vpop.permute.xlu1 %954  ;;  %v946_v9 = vpop.permute.xlu0 %945  ;;  %v1531_v28 = vstv %s2868_s28 }
 0x1db   : > { %v956_v14 = vrot.slane %v955_v8, 1  ;;  %v947_v15 = vrot.slane %v946_v9, 1  ;;  %v1532_v35 = vmul.f32 %v1531_v28, %v2683_v41 }
 0x1dc   : > { %v941_v17 = vadd.f32 %v939_v13, %v932_v7  ;;  %1506 = vrot.lane.b32.xlu1 %v1504_v10, %s2113_s6  ;;  %1496 = vrot.lane.b32.xlu0 %v1494_v11, %s2113_s6 }
 0x1dd   : > { %v948_v18 = vsel %vm3035_vm4, %v946_v9, %v947_v15  ;;  %v957_v25 = vsel %vm3036_vm7, %v955_v8, %v956_v14  ;;  %vm1179_vm4 = vcmask 318464   ;;  %vm1217_vm7 = vcmask 302080  }
 0x1de   : > { %v950_v20 = vadd.f32 %v948_v18, %v941_v17  ;;  %v974_v23 = vpop.permute.xlu1 %973  ;;  %v964_v21 = vpop.permute.xlu0 %963 }
 0x1df   : > { %v975_v26 = vrot.slane %v974_v23, 1  ;;  %v965_v27 = vrot.slane %v964_v21, 1 }
 0x1e0   : > { %v959_v29 = vadd.f32 %v957_v25, %v950_v20  ;;  %1525 = vrot.lane.b32.xlu1 %v1523_v22, %s2114_s22  ;;  %1515 = vrot.lane.b32.xlu0 %v1513_v24, %s2114_s22 }
 0x1e1   : > { %v967_v30 = vsel %vm966_vm6, %v964_v21, %v965_v27  ;;  %v976_v36 = vsel %vm966_vm6, %v974_v23, %v975_v26  ;;  %vm1198_vm6 = vcmask 310272  }
 0x1e2   : > { %v969_v31 = vadd.f32 %v967_v30, %v959_v29  ;;  %v993_v32 = vpop.permute.xlu1 %992  ;;  %v983_v33 = vpop.permute.xlu0 %982 }
 0x1e3   : > { %v994_v37 = vrot.slane %v993_v32, 1  ;;  %v984_v38 = vrot.slane %v983_v33, 1 }
 0x1e4   : > { %v978_v39 = vadd.f32 %v976_v36, %v969_v31  ;;  %1544 = vrot.lane.b32.xlu1 %v1542_v34, %s2115_s5  ;;  %1534 = vrot.lane.b32.xlu0 %v1532_v35, %s2115_s5 }
 0x1e5   : > { %v986_v42 = vsel %vm985_vm13, %v983_v33, %v984_v38  ;;  %v995_v44 = vsel %vm985_vm13, %v993_v32, %v994_v37  ;;  %vm1236_vm13 = vcmask 293888  }
 0x1e6   : > { %v988_v60 = vadd.f32 %v986_v42, %v978_v39  ;;  %v1012_v61 = vpop.permute.xlu1 %1011  ;;  %v1002_v43 = vpop.permute.xlu0 %1001 }
 0x1e7   : > { %v1013_v45 = vrot.slane %v1012_v61, 1  ;;  %v1003_v40 = vrot.slane %v1002_v43, 1 }
 0x1e8   : > { %v997_v46 = vadd.f32 %v995_v44, %v988_v60 }
 0x1e9   : > { %v1005_v41 = vsel %vm1004_vm14, %v1002_v43, %v1003_v40  ;;  %v1014_v50 = vsel %vm1004_vm14, %v1012_v61, %v1013_v45  ;;  %vm1255_vm14 = vcmask 285696  }
 0x1ea   : > { %v1007_v47 = vadd.f32 %v1005_v41, %v997_v46  ;;  %v1031_v48 = vpop.permute.xlu1 %1030  ;;  %v1021_v49 = vpop.permute.xlu0 %1020 }
 0x1eb   : > { %v1032_v51 = vrot.slane %v1031_v48, 1  ;;  %v1022_v52 = vrot.slane %v1021_v49, 1 }
 0x1ec   : > { %v1016_v53 = vadd.f32 %v1014_v50, %v1007_v47 }
 0x1ed   : > { %v1024_v54 = vsel %vm1023_vm15, %v1021_v49, %v1022_v52  ;;  %v1033_v58 = vsel %vm1023_vm15, %v1031_v48, %v1032_v51  ;;  %vm1274_vm15 = vcmask 277504  }
 0x1ee   : > { %v1026_v55 = vadd.f32 %v1024_v54, %v1016_v53  ;;  %v1050_v56 = vpop.permute.xlu1 %1049  ;;  %v1040_v57 = vpop.permute.xlu0 %1039 }
 0x1ef   : > { %v1051_v59 = vrot.slane %v1050_v56, 1  ;;  %v1041_v62 = vrot.slane %v1040_v57, 1 }
 0x1f0   : > { %v1035_v63 = vadd.f32 %v1033_v58, %v1026_v55 }
 0x1f1   : > { %v1043_v1 = vsel %vm1042_vm0, %v1040_v57, %v1041_v62  ;;  %v1052_v5 = vsel %vm1042_vm0, %v1050_v56, %v1051_v59  ;;  %vm1293_vm0 = vcmask 146432  }
 0x1f2   : > { %v1045_v2 = vadd.f32 %v1043_v1, %v1035_v63  ;;  %v1069_v3 = vpop.permute.xlu1 %1068  ;;  %v1059_v4 = vpop.permute.xlu0 %1058 }
 0x1f3   : > { %v1070_v6 = vrot.slane %v1069_v3, 1  ;;  %v1060_v7 = vrot.slane %v1059_v4, 1 }
 0x1f4   : > { %v1054_v8 = vadd.f32 %v1052_v5, %v1045_v2 }
 0x1f5   : > { %v1062_v9 = vsel %vm1061_vm11, %v1059_v4, %v1060_v7  ;;  %v1071_v13 = vsel %vm1061_vm11, %v1069_v3, %v1070_v6  ;;  %vm1312_vm11 = vcmask 138240  }
 0x1f6   : > { %v1064_v10 = vadd.f32 %v1062_v9, %v1054_v8  ;;  %v1090_v11 = vpop.permute.xlu1 %1089  ;;  %v1079_v12 = vpop.permute.xlu0 %1078 }
 0x1f7   : > { %v1091_v14 = vrot.slane %v1090_v11, 7  ;;  %v1080_v15 = vrot.slane %v1079_v12, 7 }
 0x1f8   : > { %v1073_v16 = vadd.f32 %v1071_v13, %v1064_v10 }
 0x1f9   : > { %v1082_v17 = vsel %vm1081_vm12, %v1080_v15, %v1079_v12  ;;  %v1092_v23 = vsel %vm1081_vm12, %v1091_v14, %v1090_v11  ;;  %vm1331_vm12 = vcmask 130048  }
 0x1fa   : > { %v1084_v18 = vadd.f32 %v1082_v17, %v1073_v16  ;;  %v1111_v19 = vpop.permute.xlu1 %1110  ;;  %v1100_v20 = vpop.permute.xlu0 %1099 }
 0x1fb   : > { %v1112_v21 = vrot.slane %v1111_v19, 7  ;;  %v1101_v22 = vrot.slane %v1100_v20, 7 }
 0x1fc   : > { %v1094_v24 = vadd.f32 %v1092_v23, %v1084_v18 }
 0x1fd   : > { %v1103_v25 = vsel %vm1102_vm1, %v1101_v22, %v1100_v20  ;;  %v1113_v29 = vsel %vm1102_vm1, %v1112_v21, %v1111_v19  ;;  %vm1350_vm1 = vcmask 121856  }
 0x1fe   : > { %v1105_v26 = vadd.f32 %v1103_v25, %v1094_v24  ;;  %v1130_v27 = vpop.permute.xlu1 %1129  ;;  %v1120_v28 = vpop.permute.xlu0 %1119 }
 0x1ff   : > { %v1131_v30 = vrot.slane %v1130_v27, 7  ;;  %v1121_v31 = vrot.slane %v1120_v28, 7 }
 0x200   : > { %v1115_v32 = vadd.f32 %v1113_v29, %v1105_v26 }
 0x201   : > { %v1123_v33 = vsel %vm1122_vm2, %v1121_v31, %v1120_v28  ;;  %v1132_v37 = vsel %vm1122_vm2, %v1131_v30, %v1130_v27  ;;  %vm1369_vm2 = vcmask 113664  }
 0x202   : > { %v1125_v34 = vadd.f32 %v1123_v33, %v1115_v32  ;;  %v1149_v35 = vpop.permute.xlu1 %1148  ;;  %v1139_v36 = vpop.permute.xlu0 %1138 }
 0x203   : > { %v1150_v38 = vrot.slane %v1149_v35, 7  ;;  %v1140_v39 = vrot.slane %v1139_v36, 7 }
 0x204   : > { %v1134_v42 = vadd.f32 %v1132_v37, %v1125_v34 }
 0x205   : > { %v1142_v60 = vsel %vm1141_vm5, %v1140_v39, %v1139_v36  ;;  %v1151_v45 = vsel %vm1141_vm5, %v1150_v38, %v1149_v35  ;;  %vm1388_vm5 = vcmask 105472  }
 0x206   : > { %v1144_v61 = vadd.f32 %v1142_v60, %v1134_v42  ;;  %v1168_v43 = vpop.permute.xlu1 %1167  ;;  %v1158_v44 = vpop.permute.xlu0 %1157 }
 0x207   : > { %v1169_v40 = vrot.slane %v1168_v43, 7  ;;  %v1159_v46 = vrot.slane %v1158_v44, 7 }
 0x208   : > { %v1153_v41 = vadd.f32 %v1151_v45, %v1144_v61 }
 0x209   : > { %v1161_v47 = vsel %vm1160_vm3, %v1159_v46, %v1158_v44  ;;  %v1170_v51 = vsel %vm1160_vm3, %v1169_v40, %v1168_v43  ;;  %vm1407_vm3 = vcmask 97280  }
 0x20a   : > { %v1163_v48 = vadd.f32 %v1161_v47, %v1153_v41  ;;  %v1187_v49 = vpop.permute.xlu1 %1186  ;;  %v1177_v50 = vpop.permute.xlu0 %1176 }
 0x20b   : > { %v1188_v52 = vrot.slane %v1187_v49, 7  ;;  %v1178_v53 = vrot.slane %v1177_v50, 7 }
 0x20c   : > { %v1172_v54 = vadd.f32 %v1170_v51, %v1163_v48 }
 0x20d   : > { %v1180_v55 = vsel %vm1179_vm4, %v1178_v53, %v1177_v50  ;;  %v1189_v59 = vsel %vm1179_vm4, %v1188_v52, %v1187_v49  ;;  %vm1480_vm4 = vcmask 990208  }
 0x20e   : > { %v1182_v56 = vadd.f32 %v1180_v55, %v1172_v54  ;;  %v1206_v57 = vpop.permute.xlu1 %1205  ;;  %v1196_v58 = vpop.permute.xlu0 %1195 }
 0x20f   : > { %v1207_v62 = vrot.slane %v1206_v57, 7  ;;  %v1197_v63 = vrot.slane %v1196_v58, 7 }
 0x210   : > { %v1191_v1 = vadd.f32 %v1189_v59, %v1182_v56 }
 0x211   : > { %v1199_v2 = vsel %vm1198_vm6, %v1197_v63, %v1196_v58  ;;  %v1208_v6 = vsel %vm1198_vm6, %v1207_v62, %v1206_v57  ;;  %vm1560_vm6 = vcmask 564224  }
 0x212   : > { %v1201_v3 = vadd.f32 %v1199_v2, %v1191_v1  ;;  %v1225_v4 = vpop.permute.xlu1 %1224  ;;  %v1215_v5 = vpop.permute.xlu0 %1214 }
 0x213   : > { %v1226_v7 = vrot.slane %v1225_v4, 7  ;;  %v1216_v8 = vrot.slane %v1215_v5, 7 }
 0x214   : > { %v1210_v9 = vadd.f32 %v1208_v6, %v1201_v3 }
 0x215   : > { %v1218_v10 = vsel %vm1217_vm7, %v1216_v8, %v1215_v5  ;;  %v1227_v14 = vsel %vm1217_vm7, %v1226_v7, %v1225_v4  ;;  %vm1563_vm7 = vcmp.lt.s32.totalorder %v220_v0, 512 }
 0x216   : > { %v1220_v11 = vadd.f32 %v1218_v10, %v1210_v9  ;;  %v1244_v12 = vpop.permute.xlu1 %1243  ;;  %v1234_v13 = vpop.permute.xlu0 %1233 }
 0x217   : > { %v1245_v15 = vrot.slane %v1244_v12, 7  ;;  %v1235_v16 = vrot.slane %v1234_v13, 7 }
 0x218   : > { %v1229_v17 = vadd.f32 %v1227_v14, %v1220_v11 }
 0x219   : > { %v1237_v18 = vsel %vm1236_vm13, %v1235_v16, %v1234_v13  ;;  %v1246_v21 = vsel %vm1236_vm13, %v1245_v15, %v1244_v12 }
 0x21a   : > { %v1239_v19 = vadd.f32 %v1237_v18, %v1229_v17  ;;  %v1263_v20 = vpop.permute.xlu1 %1262  ;;  %v1253_v23 = vpop.permute.xlu0 %1252 }
 0x21b   : > { %v1264_v22 = vrot.slane %v1263_v20, 7  ;;  %v1254_v24 = vrot.slane %v1253_v23, 7 }
 0x21c   : > { %v1248_v25 = vadd.f32 %v1246_v21, %v1239_v19 }
 0x21d   : > { %v1256_v26 = vsel %vm1255_vm14, %v1254_v24, %v1253_v23  ;;  %v1265_v30 = vsel %vm1255_vm14, %v1264_v22, %v1263_v20 }
 0x21e   : > { %v1258_v27 = vadd.f32 %v1256_v26, %v1248_v25  ;;  %v1282_v28 = vpop.permute.xlu1 %1281  ;;  %v1272_v29 = vpop.permute.xlu0 %1271 }
 0x21f   : > { %v1283_v31 = vrot.slane %v1282_v28, 7  ;;  %v1273_v32 = vrot.slane %v1272_v29, 7 }
 0x220   : > { %v1267_v33 = vadd.f32 %v1265_v30, %v1258_v27 }
 0x221   : > { %v1275_v34 = vsel %vm1274_vm15, %v1273_v32, %v1272_v29  ;;  %v1284_v38 = vsel %vm1274_vm15, %v1283_v31, %v1282_v28 }
 0x222   : > { %v1277_v35 = vadd.f32 %v1275_v34, %v1267_v33  ;;  %v1301_v36 = vpop.permute.xlu1 %1300  ;;  %v1291_v37 = vpop.permute.xlu0 %1290 }
 0x223   : > { %v1302_v39 = vrot.slane %v1301_v36, 7  ;;  %v1292_v42 = vrot.slane %v1291_v37, 7 }
 0x224   : > { %v1286_v60 = vadd.f32 %v1284_v38, %v1277_v35 }
 0x225   : > { %v1294_v61 = vsel %vm1293_vm0, %v1292_v42, %v1291_v37  ;;  %v1303_v40 = vsel %vm1293_vm0, %v1302_v39, %v1301_v36 }
 0x226   : > { %v1296_v43 = vadd.f32 %v1294_v61, %v1286_v60  ;;  %v1320_v44 = vpop.permute.xlu1 %1319  ;;  %v1310_v45 = vpop.permute.xlu0 %1309 }
 0x227   : > { %v1321_v46 = vrot.slane %v1320_v44, 7  ;;  %v1311_v41 = vrot.slane %v1310_v45, 7 }
 0x228   : > { %v1305_v47 = vadd.f32 %v1303_v40, %v1296_v43 }
 0x229   : > { %v1313_v48 = vsel %vm1312_vm11, %v1311_v41, %v1310_v45  ;;  %v1322_v52 = vsel %vm1312_vm11, %v1321_v46, %v1320_v44 }
 0x22a   : > { %v1315_v49 = vadd.f32 %v1313_v48, %v1305_v47  ;;  %v1339_v50 = vpop.permute.xlu1 %1338  ;;  %v1329_v51 = vpop.permute.xlu0 %1328 }
 0x22b   : > { %v1340_v53 = vrot.slane %v1339_v50, 7  ;;  %v1330_v54 = vrot.slane %v1329_v51, 7 }
 0x22c   : > { %v1324_v55 = vadd.f32 %v1322_v52, %v1315_v49 }
 0x22d   : > { %v1332_v56 = vsel %vm1331_vm12, %v1330_v54, %v1329_v51  ;;  %v1341_v62 = vsel %vm1331_vm12, %v1340_v53, %v1339_v50 }
 0x22e   : > { %v1334_v57 = vadd.f32 %v1332_v56, %v1324_v55  ;;  %v1358_v58 = vpop.permute.xlu1 %1357  ;;  %v1348_v59 = vpop.permute.xlu0 %1347 }
 0x22f   : > { %v1359_v63 = vrot.slane %v1358_v58, 7  ;;  %v1349_v1 = vrot.slane %v1348_v59, 7 }
 0x230   : > { %v1343_v2 = vadd.f32 %v1341_v62, %v1334_v57 }
 0x231   : > { %v1351_v3 = vsel %vm1350_vm1, %v1349_v1, %v1348_v59  ;;  %v1360_v7 = vsel %vm1350_vm1, %v1359_v63, %v1358_v58 }
 0x232   : > { %v1353_v4 = vadd.f32 %v1351_v3, %v1343_v2  ;;  %v1377_v5 = vpop.permute.xlu1 %1376  ;;  %v1367_v6 = vpop.permute.xlu0 %1366 }
 0x233   : > { %v1378_v8 = vrot.slane %v1377_v5, 7  ;;  %v1368_v9 = vrot.slane %v1367_v6, 7 }
 0x234   : > { %v1362_v10 = vadd.f32 %v1360_v7, %v1353_v4 }
 0x235   : > { %v1370_v11 = vsel %vm1369_vm2, %v1368_v9, %v1367_v6  ;;  %v1379_v15 = vsel %vm1369_vm2, %v1378_v8, %v1377_v5 }
 0x236   : > { %v1372_v12 = vadd.f32 %v1370_v11, %v1362_v10  ;;  %v1396_v13 = vpop.permute.xlu1 %1395  ;;  %v1386_v14 = vpop.permute.xlu0 %1385 }
 0x237   : > { %v1397_v16 = vrot.slane %v1396_v13, 7  ;;  %v1387_v17 = vrot.slane %v1386_v14, 7 }
 0x238   : > { %v1381_v18 = vadd.f32 %v1379_v15, %v1372_v12 }
 0x239   : > { %v1389_v19 = vsel %vm1388_vm5, %v1387_v17, %v1386_v14  ;;  %v1398_v22 = vsel %vm1388_vm5, %v1397_v16, %v1396_v13 }
 0x23a   : > { %v1391_v20 = vadd.f32 %v1389_v19, %v1381_v18  ;;  %v1415_v23 = vpop.permute.xlu1 %1414  ;;  %v1405_v21 = vpop.permute.xlu0 %1404 }
 0x23b   : > { %v1416_v24 = vrot.slane %v1415_v23, 7  ;;  %v1406_v25 = vrot.slane %v1405_v21, 7 }
 0x23c   : > { %v1400_v26 = vadd.f32 %v1398_v22, %v1391_v20 }
 0x23d   : > { %v1408_v27 = vsel %vm1407_vm3, %v1406_v25, %v1405_v21  ;;  %v1417_v31 = vsel %vm1407_vm3, %v1416_v24, %v1415_v23 }
 0x23e   : > { %v1410_v28 = vadd.f32 %v1408_v27, %v1400_v26  ;;  %v1433_v29 = vpop.permute.xlu1 %1432  ;;  %v1424_v30 = vpop.permute.xlu0 %1423 }
 0x23f   : > { %v1434_v32 = vrot.slane %v1433_v29, 1  ;;  %v1425_v33 = vrot.slane %v1424_v30, 1 }
 0x240   : > { %v1419_v34 = vadd.f32 %v1417_v31, %v1410_v28 }
 0x241   : > { %v1426_v35 = vsel %vm701_vm8, %v1424_v30, %v1425_v33  ;;  %v1435_v39 = vsel %vm701_vm8, %v1433_v29, %v1434_v32  ;;  %vm1499_vm8 = vcmask 982016  }
 0x242   : > { %v1428_v36 = vadd.f32 %v1426_v35, %v1419_v34  ;;  %v1451_v37 = vpop.permute.xlu1 %1450  ;;  %v1442_v38 = vpop.permute.xlu0 %1441 }
 0x243   : > { %v1452_v42 = vrot.slane %v1451_v37, 1  ;;  %v1443_v60 = vrot.slane %v1442_v38, 1 }
 0x244   : > { %v1437_v61 = vadd.f32 %v1435_v39, %v1428_v36 }
 0x245   : > { %v1444_v43 = vsel %vm720_vm9, %v1442_v38, %v1443_v60  ;;  %v1453_v46 = vsel %vm720_vm9, %v1451_v37, %v1452_v42  ;;  %vm1518_vm9 = vcmask 973824  }
 0x246   : > { %v1446_v44 = vadd.f32 %v1444_v43, %v1437_v61  ;;  %v1469_v45 = vpop.permute.xlu1 %1468  ;;  %v1460_v40 = vpop.permute.xlu0 %1459 }
 0x247   : > { %v1470_v41 = vrot.slane %v1469_v45, 1  ;;  %v1461_v47 = vrot.slane %v1460_v40, 1 }
 0x248   : > { %v1455_v48 = vadd.f32 %v1453_v46, %v1446_v44 }
 0x249   : > { %v1462_v49 = vsel %vm739_vm10, %v1460_v40, %v1461_v47  ;;  %v1471_v53 = vsel %vm739_vm10, %v1469_v45, %v1470_v41  ;;  %vm1537_vm10 = vcmask 965632  }
 0x24a   : > { %v1464_v50 = vadd.f32 %v1462_v49, %v1455_v48  ;;  %v1488_v51 = vpop.permute.xlu1 %1487  ;;  %v1478_v52 = vpop.permute.xlu0 %1477 }
 0x24b   : > { %v1489_v54 = vrot.slane %v1488_v51, 1  ;;  %v1479_v55 = vrot.slane %v1478_v52, 1 }
 0x24c   : > { %v1473_v56 = vadd.f32 %v1471_v53, %v1464_v50 }
 0x24d   : > { %v1481_v57 = vsel %vm1480_vm4, %v1478_v52, %v1479_v55  ;;  %v1490_v63 = vsel %vm1480_vm4, %v1488_v51, %v1489_v54 }
 0x24e   : > { %v1483_v58 = vadd.f32 %v1481_v57, %v1473_v56  ;;  %v1507_v59 = vpop.permute.xlu1 %1506  ;;  %v1497_v62 = vpop.permute.xlu0 %1496 }
 0x24f   : > { %v1508_v1 = vrot.slane %v1507_v59, 1  ;;  %v1498_v2 = vrot.slane %v1497_v62, 1 }
 0x250   : > { %v1492_v3 = vadd.f32 %v1490_v63, %v1483_v58 }
 0x251   : > { %v1500_v4 = vsel %vm1499_vm8, %v1497_v62, %v1498_v2  ;;  %v1509_v8 = vsel %vm1499_vm8, %v1507_v59, %v1508_v1 }
 0x252   : > { %v1502_v5 = vadd.f32 %v1500_v4, %v1492_v3  ;;  %v1526_v6 = vpop.permute.xlu1 %1525  ;;  %v1516_v7 = vpop.permute.xlu0 %1515 }
 0x253   : > { %v1527_v9 = vrot.slane %v1526_v6, 1  ;;  %v1517_v10 = vrot.slane %v1516_v7, 1 }
 0x254   : > { %v1511_v11 = vadd.f32 %v1509_v8, %v1502_v5 }
 0x255   : > { %v1519_v12 = vsel %vm1518_vm9, %v1516_v7, %v1517_v10  ;;  %v1528_v16 = vsel %vm1518_vm9, %v1526_v6, %v1527_v9 }
 0x256   : > { %v1521_v13 = vadd.f32 %v1519_v12, %v1511_v11  ;;  %v1545_v14 = vpop.permute.xlu1 %1544  ;;  %v1535_v15 = vpop.permute.xlu0 %1534 }
 0x257   : > { %v1546_v17 = vrot.slane %v1545_v14, 1  ;;  %v1536_v18 = vrot.slane %v1535_v15, 1 }
 0x258   : > { %v1530_v19 = vadd.f32 %v1528_v16, %v1521_v13 }
 0x259   : > { %v1538_v20 = vsel %vm1537_vm10, %v1535_v15, %v1536_v18  ;;  %v1547_v21 = vsel %vm1537_vm10, %v1545_v14, %v1546_v17 }
 0x25a   : > { %v1540_v23 = vadd.f32 %v1538_v20, %v1530_v19 }
 0x25c   : > { %v1549_v22 = vadd.f32 %v1547_v21, %v1540_v23 }
 0x25e   : > { %v1783_v24 = vmul.f32 -1.442695, %v1549_v22 }
 0x260   : > { %1922 = vpow2.f32 %v1783_v24 }
 0x26a   : > { %v1923_v25 = vpop.eup %1922 }
 0x26b   : > { %v1553_v26 = vadd.f32 1.0, %v1923_v25 }
 0x26d   : > { %1924 = vrcp.f32 %v1553_v26 }
 0x277   : > { %v1925_v27 = vpop.eup %1924 }
 0x278   : > { %1557 = vrot.lane.b32.xlu0 %v1925_v27, %s2059_s20  ;;  %s1965_s20 = scalar_lea.vmem %s2903_s3, 64 }
 0x279   : > { %p1966_p5 = scmp.ne.s32.totalorder %s2903_s3, %s1965_s20  ;;  %p1973_p1 = scmp.lt.s32.totalorder %s1971_s7, %s1965_s20 }
 0x27b   : > { %p1967_p4 = pnand %p1966_p5, %p3037_p0  ;;  %p1974_p2 = por %p1973_p1, %p1972_p11 }
 0x27d   : > { %p1968_p9 = pneg %p1967_p4 }
 0x27f   : > { %p1975_p3 = pnand %p1974_p2, %p1968_p9 }
 0x2ea   : > { %v1558_v28 = vpop.permute.xlu0 %1557 }
 0x2eb   : > { %v1559_v29 = vrot.slane %v1558_v28, 1 }
 0x2ed   : > { %v1561_v30 = vsel %vm1560_vm6, %v1558_v28, %v1559_v29 }
 0x2ee   : > { %1565 = vst.msk [vmem:[%s197_s18] sm:$0xf] %vm1563_vm7, %v1561_v30 }
 0x2ef   : > { %1978 = shalt.err (!%p1975_p3)
}
 0x2f0   : > { %s1979_s19 = scalar_lea.hbm %s2901_s16, 64  ;;  %s1983_s29 = scalar_lea.hbm %s2952_s2, 128 }
 0x2f1   : > { %p1980_p6 = scmp.ne.s32.totalorder %s2901_s16, %s1979_s19  ;;  %p1984_p12 = scmp.lt.u32.totalorder %s2901_s16, %s2952_s2 }
 0x2f2   : > { %p1985_p13 = scmp.lt.u32.totalorder %s1983_s29, %s1979_s19  ;;  %p1987_p5 = scmp.lt.u32.totalorder %s1979_s19, %s2901_s16 }
 0x2f3   : > { %p1981_p7 = pnand %p1980_p6, %p3037_p0 }
 0x2f4   : > { %p1986_p8 = por %p1985_p13, %p1984_p12 }
 0x2f5   : > { %p1982_p10 = pneg %p1981_p7 }
 0x2f6   : > { %p1988_p4 = por %p1987_p5, %p1986_p8 }
 0x2f8   : > { %p1989_p9 = pnand %p1988_p4, %p1982_p10 }
 0x2fa   : > { %1992 = shalt.err (!%p1989_p9)
}
 0x2fb   : > { %1796 = dma.vmem_to_hbm [thread:$0]  (%p3037_p0), %s2903_s3, 64, %s2901_s16, %s1567_s12  }
 0x2fc PF: > { %s1593_s5 = sand.u32 1, %s2031_s9   ;;  %p3038_p11 = scmp.ne.s32.totalorder %s2966_s25, 0 }
 0x2fd   : > { %p3039_p1 = scmp.ge.s32.totalorder %s2051_s14, 2  ;;  %s1594_s8 = scalar_lea.sflag [#allocation7], %s1593_s5 }
 0x2ff   : > { %p1803_p2 = pnand %p3039_p1, %p3038_p11 }
 0x301   : > { %2026 = dma.done.wait (!%p1803_p2), %s1594_s8, 64  }
 0x302   : > { %2028 = vsyncadd (!%p1803_p2), %s1594_s8, 4294967232  ;;  %s19_s14 = sadd.s32 1, %s2051_s14   ;;  %s3040_s9 = smov %s2035_s10 }
 0x303   : > { %p16_p3 = scmp.ge.s32.totalorder %s19_s14, 4   ;;  %s3041_s10 = smov %s2039_s11 }
 0x304   : > { %s3042_s11 = smov %s2194_s24  ;;  %s3043_s12 = smov %s2047_s13 }
 0x305   : > { %s3044_s13 = smov %s3046_s17  ;;  %18 = sbr.rel (!%p16_p3) target bundleno = 7 (0x7), region = 88 }
 0x30c   :  { %1599 = vsyncpa [#allocation6], 1 }
 0x30d   :  { %1601 = vsyncpa [#allocation6 + $0x1], 1 }
 0x30e   :  { %1602 = vsyncpa [#allocation7], 1 }
 0x30f   :  { %1604 = vsyncpa [#allocation7 + $0x1], 1 }
 0x310   :  { %1605 = vsyncpa [#allocation8], 1 }
 0x311   :  { %1607 = vsyncpa [#allocation8 + $0x1], 1 }

</bundles_post_ra>
